<compile_context>
chip_gen: v6e
topology: v6e:2x2x1
jax: 0.10.0
libtpu: 0.0.40
codegen_flags: <defaults>
</compile_context>

<pallas_src>
import math

import jax
import jax.numpy as jnp
from jax.experimental import pallas as pl
from jax.experimental.pallas import tpu as pltpu

# ----------------------- module hyper-parameters ----------------------------
INPUT_DIM = 5
OUTPUT_DIM = 4
NUM_LAYERS = 8
HIDDEN = 256
SKIP_EVERY = 3
NUM_FREQ = 10
ENC_DIM = INPUT_DIM * 2 * NUM_FREQ      # 100
ENC_PAD = 128                           # lane-aligned K (zero-padded)
COMPUTE_DTYPE = jnp.bfloat16            # MXU input dtype (f32 accumulation)


def _round_up(a, b):
    return ((a + b - 1) // b) * b


# ----------------------- sinusoidal encoder (XLA, elementwise) ---------------
def sinusoidal_encode(x):
    # matches torch: cat([sin(x[...,None]*f), cos(...)], -1).view(B, N, -1)
    freq = 2.0 ** jnp.arange(NUM_FREQ, dtype=x.dtype)            # [1,...,512]
    xe = x[..., None] * freq                                     # (B,N,5,10)
    enc = jnp.concatenate([jnp.sin(xe), jnp.cos(xe)], axis=-1)   # (B,N,5,20)
    return enc.reshape(x.shape[0], x.shape[1], -1)               # (B,N,100)


# ----------------------- parameter construction ------------------------------
def xavier_uniform(key, fan_in, fan_out, dtype=jnp.float32):
    bound = math.sqrt(6.0 / (fan_in + fan_out))
    return jax.random.uniform(key, (fan_in, fan_out), dtype, -bound, bound)


def init_model_params(key):
    """(in_features, out_features)-layout Linear params mirroring Ray2Ray."""
    keys = jax.random.split(key, NUM_LAYERS + 1)
    layers = [(xavier_uniform(keys[0], ENC_DIM, HIDDEN),
               jnp.zeros((HIDDEN,), jnp.float32))]
    for i in range(1, NUM_LAYERS):
        fan_in = ENC_DIM + HIDDEN if i % SKIP_EVERY == 0 else HIDDEN
        layers.append((xavier_uniform(keys[i], fan_in, HIDDEN),
                       jnp.zeros((HIDDEN,), jnp.float32)))
    final = (xavier_uniform(keys[NUM_LAYERS], HIDDEN, OUTPUT_DIM),
             jnp.zeros((OUTPUT_DIM,), jnp.float32))
    return layers, final


def prepare_kernel_params(layers, final):
    """Flat kernel param list: bf16 weights (K padded 100->128, skip layers
    split into Wh/Ws), f32 (1, out) biases.  Returns (params, per-layer tags)."""
    cd = COMPUTE_DTYPE
    params, tags = [], []

    w0, b0 = layers[0]
    params += [jnp.pad(w0, ((0, ENC_PAD - ENC_DIM), (0, 0))).astype(cd),
               b0.reshape(1, -1).astype(jnp.float32)]
    tags.append("plain")

    for i in range(1, NUM_LAYERS):
        w, b = layers[i]
        if i % SKIP_EVERY == 0:
            # torch: layer(cat((h, x_skip), -1)) -> rows [0:HIDDEN] hit h,
            # rows [HIDDEN:] hit the encoded skip input.
            wh = w[:HIDDEN, :].astype(cd)
            ws = jnp.pad(w[HIDDEN:, :],
                         ((0, ENC_PAD - ENC_DIM), (0, 0))).astype(cd)
            params += [wh, ws, b.reshape(1, -1).astype(jnp.float32)]
            tags.append("skip")
        else:
            params += [w.astype(cd), b.reshape(1, -1).astype(jnp.float32)]
            tags.append("plain")

    wf, bfin = final
    params += [wf.astype(cd), bfin.reshape(1, -1).astype(jnp.float32)]
    return params, tags


# ----------------------- Pallas kernel ---------------------------------------
def make_ray2ray_kernel(tags):
    cd = COMPUTE_DTYPE

    def kernel(*refs):
        x_ref = refs[0]
        out_ref = refs[-1]
        w_refs = refs[1:-1]

        x = x_ref[...]                                # (tm, 128) bf16 skip input
        idx = 0
        h = None
        for tag in tags:
            if tag == "plain":
                w = w_refs[idx][...]
                b = w_refs[idx + 1][...]
                idx += 2
                inp = x if h is None else h.astype(cd)
                z = jnp.dot(inp, w, preferred_element_type=jnp.float32) + b
            else:   # skip: h @ Wh + x_skip @ Ws + b == cat((h, x)) @ W + b
                wh = w_refs[idx][...]
                ws = w_refs[idx + 1][...]
                b = w_refs[idx + 2][...]
                idx += 3
                z = (jnp.dot(h.astype(cd), wh, preferred_element_type=jnp.float32)
                     + jnp.dot(x, ws, preferred_element_type=jnp.float32)
                     + b)
            h = jnp.maximum(z, 0.0)                   # ReLU in f32

        wf = w_refs[idx][...]
        bf = w_refs[idx + 1][...]
        out_ref[...] = jnp.dot(h.astype(cd), wf,
                               preferred_element_type=jnp.float32) + bf

    return kernel


# ----------------------- wrapper ----------------------------------------------
def ray2ray_forward(x, kernel_params, tags, *, tm=512):
    """x: (B, N, INPUT_DIM) f32 -> (B, N, OUTPUT_DIM) f32."""
    assert tm % 128 == 0
    B, N, D = x.shape
    assert D == INPUT_DIM
    M = B * N

    enc = sinusoidal_encode(x).reshape(M, ENC_DIM)
    enc = jnp.pad(enc, ((0, 0), (0, ENC_PAD - ENC_DIM))).astype(COMPUTE_DTYPE)

    # Large row tile to fill the MXU and amortise per-step overhead; shrink for
    # tiny inputs and prefer >=2 grid steps so v7x's 2 TensorCores both work.
    tm_eff = min(tm, _round_up(M, 128))
    if tm_eff > 128 and _round_up(M, tm_eff) // tm_eff < 2:
        tm_eff = _round_up(tm_eff // 2, 128)
    Mp = _round_up(M, tm_eff)
    if Mp != M:
        enc = jnp.pad(enc, ((0, Mp - M), (0, 0)))
    grid = (Mp // tm_eff,)

    in_specs = [pl.BlockSpec((tm_eff, ENC_PAD), lambda i: (i, 0))]
    for p in kernel_params:
        # Weights/biases: one full-array block, resident across the grid
        # (constant index_map -> Pallas does not re-DMA them per step).
        in_specs.append(pl.BlockSpec(p.shape, lambda i: (0, 0)))

    flops = Mp * sum(2 * p.shape[0] * p.shape[1]
                     for p in kernel_params if p.shape[0] > 1)
    bytes_accessed = (Mp * ENC_PAD * enc.dtype.itemsize
                      + sum(p.size * p.dtype.itemsize for p in kernel_params)
                      + Mp * OUTPUT_DIM * 4)

    out = pl.pallas_call(
        make_ray2ray_kernel(tags),
        out_shape=jax.ShapeDtypeStruct((Mp, OUTPUT_DIM), jnp.float32),
        grid_spec=pltpu.PrefetchScalarGridSpec(
            num_scalar_prefetch=0,
            grid=grid,
            in_specs=in_specs,
            out_specs=pl.BlockSpec((tm_eff, OUTPUT_DIM), lambda i: (i, 0)),
        ),
        compiler_params=pltpu.CompilerParams(
            dimension_semantics=("parallel",)),
        cost_estimate=pl.CostEstimate(
            flops=int(flops), transcendentals=0,
            bytes_accessed=int(bytes_accessed)),
    )(enc, *kernel_params)

    return out[:M].reshape(B, N, OUTPUT_DIM)


# ----------------------- pure-JAX references ----------------------------------
def ray2ray_reference_f32(x, layers, final):
    """Exact mirror of the PyTorch forward in f32 (HIGHEST matmul precision)."""
    prec = jax.lax.Precision.HIGHEST
    enc = sinusoidal_encode(x)
    B, N, _ = enc.shape
    xs = enc.reshape(B * N, ENC_DIM)
    h = None
    for i, (w, b) in enumerate(layers):
        if i == 0:
            inp = xs
        elif i % SKIP_EVERY == 0:
            inp = jnp.concatenate([h, xs], axis=-1)
        else:
            inp = h
        h = jnp.maximum(jnp.dot(inp, w, precision=prec) + b, 0.0)
    wf, bfin = final
    return (jnp.dot(h, wf, precision=prec) + bfin).reshape(B, N, OUTPUT_DIM)


def ray2ray_reference_mixed(x, layers, final):
    """Same mixed precision as the kernel (bf16 MXU inputs, f32 accumulation),
    with the literal cat((h, x_skip)) structure of the PyTorch module."""
    cd = COMPUTE_DTYPE
    enc = sinusoidal_encode(x)
    B, N, _ = enc.shape
    xs = enc.reshape(B * N, ENC_DIM).astype(cd)
    h = None
    for i, (w, b) in enumerate(layers):
        if i == 0:
            inp = xs
        elif i % SKIP_EVERY == 0:
            inp = jnp.concatenate([h.astype(cd), xs], axis=-1)
        else:
            inp = h.astype(cd)
        h = jnp.maximum(
            jnp.dot(inp, w.astype(cd), preferred_element_type=jnp.float32) + b,
            0.0)
    wf, bfin = final
    out = jnp.dot(h.astype(cd), wf.astype(cd),
                  preferred_element_type=jnp.float32) + bfin
    return out.reshape(B, N, OUTPUT_DIM)


# ----------------------- main -------------------------------------------------
if __name__ == "__main__":
    key = jax.random.PRNGKey(0)
    k_param, k_x = jax.random.split(key)

    layers, final = init_model_params(k_param)
    kernel_params, tags = prepare_kernel_params(layers, final)

    B, N = 2, 8
    x = jax.random.normal(k_x, (B, N, INPUT_DIM), jnp.float32)

    out = jax.block_until_ready(ray2ray_forward(x, kernel_params, tags))
    assert out.shape == (B, N, OUTPUT_DIM)

    # Tight check against a reference using the same mixed precision.
    ref_mixed = ray2ray_reference_mixed(x, layers, final)
    assert jnp.allclose(out, ref_mixed, rtol=1e-3, atol=1e-3), \
        "mismatch vs mixed-precision reference"

    # Looser sanity check against the full-f32 PyTorch-equivalent forward.
    ref_f32 = ray2ray_reference_f32(x, layers, final)
    assert jnp.allclose(out, ref_f32, rtol=5e-2, atol=5e-2), \
        "mismatch vs f32 reference"

    print("KERNEL_OK")
</pallas_src>

<mosaic_0001>
module attributes {stable_mosaic.version = 11 : i64} {
  func.func @kernel(%arg0: i32, %arg1: memref<128x128xbf16, #tpu.memory_space<vmem>>, %arg2: memref<128x256xbf16, #tpu.memory_space<vmem>>, %arg3: memref<1x256xf32, #tpu.memory_space<vmem>>, %arg4: memref<256x256xbf16, #tpu.memory_space<vmem>>, %arg5: memref<1x256xf32, #tpu.memory_space<vmem>>, %arg6: memref<256x256xbf16, #tpu.memory_space<vmem>>, %arg7: memref<1x256xf32, #tpu.memory_space<vmem>>, %arg8: memref<256x256xbf16, #tpu.memory_space<vmem>>, %arg9: memref<128x256xbf16, #tpu.memory_space<vmem>>, %arg10: memref<1x256xf32, #tpu.memory_space<vmem>>, %arg11: memref<256x256xbf16, #tpu.memory_space<vmem>>, %arg12: memref<1x256xf32, #tpu.memory_space<vmem>>, %arg13: memref<256x256xbf16, #tpu.memory_space<vmem>>, %arg14: memref<1x256xf32, #tpu.memory_space<vmem>>, %arg15: memref<256x256xbf16, #tpu.memory_space<vmem>>, %arg16: memref<128x256xbf16, #tpu.memory_space<vmem>>, %arg17: memref<1x256xf32, #tpu.memory_space<vmem>>, %arg18: memref<256x256xbf16, #tpu.memory_space<vmem>>, %arg19: memref<1x256xf32, #tpu.memory_space<vmem>>, %arg20: memref<256x4xbf16, #tpu.memory_space<vmem>>, %arg21: memref<1x4xf32, #tpu.memory_space<vmem>>, %arg22: memref<128x4xf32, #tpu.memory_space<vmem>>) attributes {dimension_semantics = [#tpu.dimension_semantics<parallel>], iteration_bounds = array<i64: 1>, scalar_prefetch = 0 : i64, scratch_operands = 0 : i64, tpu.core_type = #tpu.core_type<tc>, window_params = [{transform_indices = @transform_0, window_bounds = array<i64: 128, 128>}, {pipeline_mode = #tpu.pipeline_mode<synchronous>, transform_indices = @transform_1, window_bounds = array<i64: 128, 256>}, {pipeline_mode = #tpu.pipeline_mode<synchronous>, transform_indices = @transform_2, window_bounds = array<i64: 1, 256>}, {pipeline_mode = #tpu.pipeline_mode<synchronous>, transform_indices = @transform_3, window_bounds = array<i64: 256, 256>}, {pipeline_mode = #tpu.pipeline_mode<synchronous>, transform_indices = @transform_4, window_bounds = array<i64: 1, 256>}, {pipeline_mode = #tpu.pipeline_mode<synchronous>, transform_indices = @transform_5, window_bounds = array<i64: 256, 256>}, {pipeline_mode = #tpu.pipeline_mode<synchronous>, transform_indices = @transform_6, window_bounds = array<i64: 1, 256>}, {pipeline_mode = #tpu.pipeline_mode<synchronous>, transform_indices = @transform_7, window_bounds = array<i64: 256, 256>}, {pipeline_mode = #tpu.pipeline_mode<synchronous>, transform_indices = @transform_8, window_bounds = array<i64: 128, 256>}, {pipeline_mode = #tpu.pipeline_mode<synchronous>, transform_indices = @transform_9, window_bounds = array<i64: 1, 256>}, {pipeline_mode = #tpu.pipeline_mode<synchronous>, transform_indices = @transform_10, window_bounds = array<i64: 256, 256>}, {pipeline_mode = #tpu.pipeline_mode<synchronous>, transform_indices = @transform_11, window_bounds = array<i64: 1, 256>}, {pipeline_mode = #tpu.pipeline_mode<synchronous>, transform_indices = @transform_12, window_bounds = array<i64: 256, 256>}, {pipeline_mode = #tpu.pipeline_mode<synchronous>, transform_indices = @transform_13, window_bounds = array<i64: 1, 256>}, {pipeline_mode = #tpu.pipeline_mode<synchronous>, transform_indices = @transform_14, window_bounds = array<i64: 256, 256>}, {pipeline_mode = #tpu.pipeline_mode<synchronous>, transform_indices = @transform_15, window_bounds = array<i64: 128, 256>}, {pipeline_mode = #tpu.pipeline_mode<synchronous>, transform_indices = @transform_16, window_bounds = array<i64: 1, 256>}, {pipeline_mode = #tpu.pipeline_mode<synchronous>, transform_indices = @transform_17, window_bounds = array<i64: 256, 256>}, {pipeline_mode = #tpu.pipeline_mode<synchronous>, transform_indices = @transform_18, window_bounds = array<i64: 1, 256>}, {pipeline_mode = #tpu.pipeline_mode<synchronous>, transform_indices = @transform_19, window_bounds = array<i64: 256, 4>}, {pipeline_mode = #tpu.pipeline_mode<synchronous>, transform_indices = @transform_20, window_bounds = array<i64: 1, 4>}, {transform_indices = @transform_21, window_bounds = array<i64: 128, 4>}]} {
    %c0 = arith.constant 0 : index
    %c0_0 = arith.constant 0 : index
    %0 = vector.load %arg1[%c0, %c0_0] : memref<128x128xbf16, #tpu.memory_space<vmem>>, vector<128x128xbf16>
    %c0_1 = arith.constant 0 : index
    %c0_2 = arith.constant 0 : index
    %1 = vector.load %arg2[%c0_1, %c0_2] : memref<128x256xbf16, #tpu.memory_space<vmem>>, vector<128x256xbf16>
    %c0_3 = arith.constant 0 : index
    %c0_4 = arith.constant 0 : index
    %2 = vector.load %arg3[%c0_3, %c0_4] : memref<1x256xf32, #tpu.memory_space<vmem>>, vector<1x256xf32>
    %cst = arith.constant dense<0.000000e+00> : vector<128x256xf32>
    %3 = tpu.matmul %0, %1, %cst {dimension_numbers = #tpu.dot_dimension_numbers<[1], [0], [0], [1], [0, 0, 1, 1], [], []>} : vector<128x128xbf16>, vector<128x256xbf16>, vector<128x256xf32> -> vector<128x256xf32>
    %4 = vector.broadcast %2 : vector<1x256xf32> to vector<128x256xf32>
    %5 = arith.addf %3, %4 : vector<128x256xf32>
    %cst_5 = arith.constant 0.000000e+00 : f32
    %6 = vector.broadcast %cst_5 : f32 to vector<128x256xf32>
    %7 = arith.maximumf %5, %6 : vector<128x256xf32>
    %c0_6 = arith.constant 0 : index
    %c0_7 = arith.constant 0 : index
    %8 = vector.load %arg4[%c0_6, %c0_7] : memref<256x256xbf16, #tpu.memory_space<vmem>>, vector<256x256xbf16>
    %c0_8 = arith.constant 0 : index
    %c0_9 = arith.constant 0 : index
    %9 = vector.load %arg5[%c0_8, %c0_9] : memref<1x256xf32, #tpu.memory_space<vmem>>, vector<1x256xf32>
    %10 = arith.truncf %7 : vector<128x256xf32> to vector<128x256xbf16>
    %cst_10 = arith.constant dense<0.000000e+00> : vector<128x256xf32>
    %11 = tpu.matmul %10, %8, %cst_10 {dimension_numbers = #tpu.dot_dimension_numbers<[1], [0], [0], [1], [0, 0, 1, 1], [], []>} : vector<128x256xbf16>, vector<256x256xbf16>, vector<128x256xf32> -> vector<128x256xf32>
    %12 = vector.broadcast %9 : vector<1x256xf32> to vector<128x256xf32>
    %13 = arith.addf %11, %12 : vector<128x256xf32>
    %cst_11 = arith.constant 0.000000e+00 : f32
    %14 = vector.broadcast %cst_11 : f32 to vector<128x256xf32>
    %15 = arith.maximumf %13, %14 : vector<128x256xf32>
    %c0_12 = arith.constant 0 : index
    %c0_13 = arith.constant 0 : index
    %16 = vector.load %arg6[%c0_12, %c0_13] : memref<256x256xbf16, #tpu.memory_space<vmem>>, vector<256x256xbf16>
    %c0_14 = arith.constant 0 : index
    %c0_15 = arith.constant 0 : index
    %17 = vector.load %arg7[%c0_14, %c0_15] : memref<1x256xf32, #tpu.memory_space<vmem>>, vector<1x256xf32>
    %18 = arith.truncf %15 : vector<128x256xf32> to vector<128x256xbf16>
    %cst_16 = arith.constant dense<0.000000e+00> : vector<128x256xf32>
    %19 = tpu.matmul %18, %16, %cst_16 {dimension_numbers = #tpu.dot_dimension_numbers<[1], [0], [0], [1], [0, 0, 1, 1], [], []>} : vector<128x256xbf16>, vector<256x256xbf16>, vector<128x256xf32> -> vector<128x256xf32>
    %20 = vector.broadcast %17 : vector<1x256xf32> to vector<128x256xf32>
    %21 = arith.addf %19, %20 : vector<128x256xf32>
    %cst_17 = arith.constant 0.000000e+00 : f32
    %22 = vector.broadcast %cst_17 : f32 to vector<128x256xf32>
    %23 = arith.maximumf %21, %22 : vector<128x256xf32>
    %c0_18 = arith.constant 0 : index
    %c0_19 = arith.constant 0 : index
    %24 = vector.load %arg8[%c0_18, %c0_19] : memref<256x256xbf16, #tpu.memory_space<vmem>>, vector<256x256xbf16>
    %c0_20 = arith.constant 0 : index
    %c0_21 = arith.constant 0 : index
    %25 = vector.load %arg9[%c0_20, %c0_21] : memref<128x256xbf16, #tpu.memory_space<vmem>>, vector<128x256xbf16>
    %c0_22 = arith.constant 0 : index
    %c0_23 = arith.constant 0 : index
    %26 = vector.load %arg10[%c0_22, %c0_23] : memref<1x256xf32, #tpu.memory_space<vmem>>, vector<1x256xf32>
    %27 = arith.truncf %23 : vector<128x256xf32> to vector<128x256xbf16>
    %cst_24 = arith.constant dense<0.000000e+00> : vector<128x256xf32>
    %28 = tpu.matmul %27, %24, %cst_24 {dimension_numbers = #tpu.dot_dimension_numbers<[1], [0], [0], [1], [0, 0, 1, 1], [], []>} : vector<128x256xbf16>, vector<256x256xbf16>, vector<128x256xf32> -> vector<128x256xf32>
    %cst_25 = arith.constant dense<0.000000e+00> : vector<128x256xf32>
    %29 = tpu.matmul %0, %25, %cst_25 {dimension_numbers = #tpu.dot_dimension_numbers<[1], [0], [0], [1], [0, 0, 1, 1], [], []>} : vector<128x128xbf16>, vector<128x256xbf16>, vector<128x256xf32> -> vector<128x256xf32>
    %30 = arith.addf %28, %29 : vector<128x256xf32>
    %31 = vector.broadcast %26 : vector<1x256xf32> to vector<128x256xf32>
    %32 = arith.addf %30, %31 : vector<128x256xf32>
    %cst_26 = arith.constant 0.000000e+00 : f32
    %33 = vector.broadcast %cst_26 : f32 to vector<128x256xf32>
    %34 = arith.maximumf %32, %33 : vector<128x256xf32>
    %c0_27 = arith.constant 0 : index
    %c0_28 = arith.constant 0 : index
    %35 = vector.load %arg11[%c0_27, %c0_28] : memref<256x256xbf16, #tpu.memory_space<vmem>>, vector<256x256xbf16>
    %c0_29 = arith.constant 0 : index
    %c0_30 = arith.constant 0 : index
    %36 = vector.load %arg12[%c0_29, %c0_30] : memref<1x256xf32, #tpu.memory_space<vmem>>, vector<1x256xf32>
    %37 = arith.truncf %34 : vector<128x256xf32> to vector<128x256xbf16>
    %cst_31 = arith.constant dense<0.000000e+00> : vector<128x256xf32>
    %38 = tpu.matmul %37, %35, %cst_31 {dimension_numbers = #tpu.dot_dimension_numbers<[1], [0], [0], [1], [0, 0, 1, 1], [], []>} : vector<128x256xbf16>, vector<256x256xbf16>, vector<128x256xf32> -> vector<128x256xf32>
    %39 = vector.broadcast %36 : vector<1x256xf32> to vector<128x256xf32>
    %40 = arith.addf %38, %39 : vector<128x256xf32>
    %cst_32 = arith.constant 0.000000e+00 : f32
    %41 = vector.broadcast %cst_32 : f32 to vector<128x256xf32>
    %42 = arith.maximumf %40, %41 : vector<128x256xf32>
    %c0_33 = arith.constant 0 : index
    %c0_34 = arith.constant 0 : index
    %43 = vector.load %arg13[%c0_33, %c0_34] : memref<256x256xbf16, #tpu.memory_space<vmem>>, vector<256x256xbf16>
    %c0_35 = arith.constant 0 : index
    %c0_36 = arith.constant 0 : index
    %44 = vector.load %arg14[%c0_35, %c0_36] : memref<1x256xf32, #tpu.memory_space<vmem>>, vector<1x256xf32>
    %45 = arith.truncf %42 : vector<128x256xf32> to vector<128x256xbf16>
    %cst_37 = arith.constant dense<0.000000e+00> : vector<128x256xf32>
    %46 = tpu.matmul %45, %43, %cst_37 {dimension_numbers = #tpu.dot_dimension_numbers<[1], [0], [0], [1], [0, 0, 1, 1], [], []>} : vector<128x256xbf16>, vector<256x256xbf16>, vector<128x256xf32> -> vector<128x256xf32>
    %47 = vector.broadcast %44 : vector<1x256xf32> to vector<128x256xf32>
    %48 = arith.addf %46, %47 : vector<128x256xf32>
    %cst_38 = arith.constant 0.000000e+00 : f32
    %49 = vector.broadcast %cst_38 : f32 to vector<128x256xf32>
    %50 = arith.maximumf %48, %49 : vector<128x256xf32>
    %c0_39 = arith.constant 0 : index
    %c0_40 = arith.constant 0 : index
    %51 = vector.load %arg15[%c0_39, %c0_40] : memref<256x256xbf16, #tpu.memory_space<vmem>>, vector<256x256xbf16>
    %c0_41 = arith.constant 0 : index
    %c0_42 = arith.constant 0 : index
    %52 = vector.load %arg16[%c0_41, %c0_42] : memref<128x256xbf16, #tpu.memory_space<vmem>>, vector<128x256xbf16>
    %c0_43 = arith.constant 0 : index
    %c0_44 = arith.constant 0 : index
    %53 = vector.load %arg17[%c0_43, %c0_44] : memref<1x256xf32, #tpu.memory_space<vmem>>, vector<1x256xf32>
    %54 = arith.truncf %50 : vector<128x256xf32> to vector<128x256xbf16>
    %cst_45 = arith.constant dense<0.000000e+00> : vector<128x256xf32>
    %55 = tpu.matmul %54, %51, %cst_45 {dimension_numbers = #tpu.dot_dimension_numbers<[1], [0], [0], [1], [0, 0, 1, 1], [], []>} : vector<128x256xbf16>, vector<256x256xbf16>, vector<128x256xf32> -> vector<128x256xf32>
    %cst_46 = arith.constant dense<0.000000e+00> : vector<128x256xf32>
    %56 = tpu.matmul %0, %52, %cst_46 {dimension_numbers = #tpu.dot_dimension_numbers<[1], [0], [0], [1], [0, 0, 1, 1], [], []>} : vector<128x128xbf16>, vector<128x256xbf16>, vector<128x256xf32> -> vector<128x256xf32>
    %57 = arith.addf %55, %56 : vector<128x256xf32>
    %58 = vector.broadcast %53 : vector<1x256xf32> to vector<128x256xf32>
    %59 = arith.addf %57, %58 : vector<128x256xf32>
    %cst_47 = arith.constant 0.000000e+00 : f32
    %60 = vector.broadcast %cst_47 : f32 to vector<128x256xf32>
    %61 = arith.maximumf %59, %60 : vector<128x256xf32>
    %c0_48 = arith.constant 0 : index
    %c0_49 = arith.constant 0 : index
    %62 = vector.load %arg18[%c0_48, %c0_49] : memref<256x256xbf16, #tpu.memory_space<vmem>>, vector<256x256xbf16>
    %c0_50 = arith.constant 0 : index
    %c0_51 = arith.constant 0 : index
    %63 = vector.load %arg19[%c0_50, %c0_51] : memref<1x256xf32, #tpu.memory_space<vmem>>, vector<1x256xf32>
    %64 = arith.truncf %61 : vector<128x256xf32> to vector<128x256xbf16>
    %cst_52 = arith.constant dense<0.000000e+00> : vector<128x256xf32>
    %65 = tpu.matmul %64, %62, %cst_52 {dimension_numbers = #tpu.dot_dimension_numbers<[1], [0], [0], [1], [0, 0, 1, 1], [], []>} : vector<128x256xbf16>, vector<256x256xbf16>, vector<128x256xf32> -> vector<128x256xf32>
    %66 = vector.broadcast %63 : vector<1x256xf32> to vector<128x256xf32>
    %67 = arith.addf %65, %66 : vector<128x256xf32>
    %cst_53 = arith.constant 0.000000e+00 : f32
    %68 = vector.broadcast %cst_53 : f32 to vector<128x256xf32>
    %69 = arith.maximumf %67, %68 : vector<128x256xf32>
    %c0_54 = arith.constant 0 : index
    %c0_55 = arith.constant 0 : index
    %70 = vector.load %arg20[%c0_54, %c0_55] : memref<256x4xbf16, #tpu.memory_space<vmem>>, vector<256x4xbf16>
    %c0_56 = arith.constant 0 : index
    %c0_57 = arith.constant 0 : index
    %71 = vector.load %arg21[%c0_56, %c0_57] : memref<1x4xf32, #tpu.memory_space<vmem>>, vector<1x4xf32>
    %72 = arith.truncf %69 : vector<128x256xf32> to vector<128x256xbf16>
    %cst_58 = arith.constant dense<0.000000e+00> : vector<128x4xf32>
    %73 = tpu.matmul %72, %70, %cst_58 {dimension_numbers = #tpu.dot_dimension_numbers<[1], [0], [0], [1], [0, 0, 1, 1], [], []>} : vector<128x256xbf16>, vector<256x4xbf16>, vector<128x4xf32> -> vector<128x4xf32>
    %74 = vector.broadcast %71 : vector<1x4xf32> to vector<128x4xf32>
    %75 = arith.addf %73, %74 : vector<128x4xf32>
    %c0_59 = arith.constant 0 : index
    %c0_60 = arith.constant 0 : index
    %76 = vector.load %arg22[%c0_59, %c0_60] : memref<128x4xf32, #tpu.memory_space<vmem>>, vector<128x4xf32>
    tpu.vector_store %arg22[%c0_59, %c0_60], %75 {strides = array<i32>} : memref<128x4xf32, #tpu.memory_space<vmem>>, vector<128x4xf32>,
    return
  }
  func.func @transform_0(%arg0: i32) -> (i32, i32) {
    %c0_i32 = arith.constant 0 : i32
    %c0_i32_0 = arith.constant 0 : i32
    return %arg0, %c0_i32 : i32, i32
  }
  func.func @transform_1(%arg0: i32) -> (i32, i32) {
    %c0_i32 = arith.constant 0 : i32
    %c0_i32_0 = arith.constant 0 : i32
    %c0_i32_1 = arith.constant 0 : i32
    return %c0_i32, %c0_i32_0 : i32, i32
  }
  func.func @transform_2(%arg0: i32) -> (i32, i32) {
    %c0_i32 = arith.constant 0 : i32
    %c0_i32_0 = arith.constant 0 : i32
    %c0_i32_1 = arith.constant 0 : i32
    return %c0_i32, %c0_i32_0 : i32, i32
  }
  func.func @transform_3(%arg0: i32) -> (i32, i32) {
    %c0_i32 = arith.constant 0 : i32
    %c0_i32_0 = arith.constant 0 : i32
    %c0_i32_1 = arith.constant 0 : i32
    return %c0_i32, %c0_i32_0 : i32, i32
  }
  func.func @transform_4(%arg0: i32) -> (i32, i32) {
    %c0_i32 = arith.constant 0 : i32
    %c0_i32_0 = arith.constant 0 : i32
    %c0_i32_1 = arith.constant 0 : i32
    return %c0_i32, %c0_i32_0 : i32, i32
  }
  func.func @transform_5(%arg0: i32) -> (i32, i32) {
    %c0_i32 = arith.constant 0 : i32
    %c0_i32_0 = arith.constant 0 : i32
    %c0_i32_1 = arith.constant 0 : i32
    return %c0_i32, %c0_i32_0 : i32, i32
  }
  func.func @transform_6(%arg0: i32) -> (i32, i32) {
    %c0_i32 = arith.constant 0 : i32
    %c0_i32_0 = arith.constant 0 : i32
    %c0_i32_1 = arith.constant 0 : i32
    return %c0_i32, %c0_i32_0 : i32, i32
  }
  func.func @transform_7(%arg0: i32) -> (i32, i32) {
    %c0_i32 = arith.constant 0 : i32
    %c0_i32_0 = arith.constant 0 : i32
    %c0_i32_1 = arith.constant 0 : i32
    return %c0_i32, %c0_i32_0 : i32, i32
  }
  func.func @transform_8(%arg0: i32) -> (i32, i32) {
    %c0_i32 = arith.constant 0 : i32
    %c0_i32_0 = arith.constant 0 : i32
    %c0_i32_1 = arith.constant 0 : i32
    return %c0_i32, %c0_i32_0 : i32, i32
  }
  func.func @transform_9(%arg0: i32) -> (i32, i32) {
    %c0_i32 = arith.constant 0 : i32
    %c0_i32_0 = arith.constant 0 : i32
    %c0_i32_1 = arith.constant 0 : i32
    return %c0_i32, %c0_i32_0 : i32, i32
  }
  func.func @transform_10(%arg0: i32) -> (i32, i32) {
    %c0_i32 = arith.constant 0 : i32
    %c0_i32_0 = arith.constant 0 : i32
    %c0_i32_1 = arith.constant 0 : i32
    return %c0_i32, %c0_i32_0 : i32, i32
  }
  func.func @transform_11(%arg0: i32) -> (i32, i32) {
    %c0_i32 = arith.constant 0 : i32
    %c0_i32_0 = arith.constant 0 : i32
    %c0_i32_1 = arith.constant 0 : i32
    return %c0_i32, %c0_i32_0 : i32, i32
  }
  func.func @transform_12(%arg0: i32) -> (i32, i32) {
    %c0_i32 = arith.constant 0 : i32
    %c0_i32_0 = arith.constant 0 : i32
    %c0_i32_1 = arith.constant 0 : i32
    return %c0_i32, %c0_i32_0 : i32, i32
  }
  func.func @transform_13(%arg0: i32) -> (i32, i32) {
    %c0_i32 = arith.constant 0 : i32
    %c0_i32_0 = arith.constant 0 : i32
    %c0_i32_1 = arith.constant 0 : i32
    return %c0_i32, %c0_i32_0 : i32, i32
  }
  func.func @transform_14(%arg0: i32) -> (i32, i32) {
    %c0_i32 = arith.constant 0 : i32
    %c0_i32_0 = arith.constant 0 : i32
    %c0_i32_1 = arith.constant 0 : i32
    return %c0_i32, %c0_i32_0 : i32, i32
  }
  func.func @transform_15(%arg0: i32) -> (i32, i32) {
    %c0_i32 = arith.constant 0 : i32
    %c0_i32_0 = arith.constant 0 : i32
    %c0_i32_1 = arith.constant 0 : i32
    return %c0_i32, %c0_i32_0 : i32, i32
  }
  func.func @transform_16(%arg0: i32) -> (i32, i32) {
    %c0_i32 = arith.constant 0 : i32
    %c0_i32_0 = arith.constant 0 : i32
    %c0_i32_1 = arith.constant 0 : i32
    return %c0_i32, %c0_i32_0 : i32, i32
  }
  func.func @transform_17(%arg0: i32) -> (i32, i32) {
    %c0_i32 = arith.constant 0 : i32
    %c0_i32_0 = arith.constant 0 : i32
    %c0_i32_1 = arith.constant 0 : i32
    return %c0_i32, %c0_i32_0 : i32, i32
  }
  func.func @transform_18(%arg0: i32) -> (i32, i32) {
    %c0_i32 = arith.constant 0 : i32
    %c0_i32_0 = arith.constant 0 : i32
    %c0_i32_1 = arith.constant 0 : i32
    return %c0_i32, %c0_i32_0 : i32, i32
  }
  func.func @transform_19(%arg0: i32) -> (i32, i32) {
    %c0_i32 = arith.constant 0 : i32
    %c0_i32_0 = arith.constant 0 : i32
    %c0_i32_1 = arith.constant 0 : i32
    return %c0_i32, %c0_i32_0 : i32, i32
  }
  func.func @transform_20(%arg0: i32) -> (i32, i32) {
    %c0_i32 = arith.constant 0 : i32
    %c0_i32_0 = arith.constant 0 : i32
    %c0_i32_1 = arith.constant 0 : i32
    return %c0_i32, %c0_i32_0 : i32, i32
  }
  func.func @transform_21(%arg0: i32) -> (i32, i32) {
    %c0_i32 = arith.constant 0 : i32
    %c0_i32_0 = arith.constant 0 : i32
    return %arg0, %c0_i32 : i32, i32
  }
}

</mosaic_0001>

<bundles_post_ra>
// kernel: tpu_custom_call.1
= control target key start
LH: loop header
LB: loop body
LE: loop exit
PB: predicated region body
PF: predicated region fallthrough
CT: control target
= control target key end

     0   :  { %s5737_s0 = inlined_call_operand.hbm [shape: bf16[128,128], index: 0, kind: input, shape index: {}]   ;;  %s5738_s1 = inlined_call_operand.vmem [shape: bf16[128,256], index: 1, kind: input, shape index: {}]   ;;  %s5739_s2 = inlined_call_operand.vmem [shape: f32[1,256], index: 2, kind: input, shape index: {}]   ;;  %s5740_s3 = inlined_call_operand.hbm [shape: bf16[256,256], index: 3, kind: input, shape index: {}]   ;;  %s5741_s4 = inlined_call_operand.vmem [shape: f32[1,256], index: 4, kind: input, shape index: {}]   ;;  %s5742_s5 = inlined_call_operand.hbm [shape: bf16[256,256], index: 5, kind: input, shape index: {}]   ;;  %s5743_s6 = inlined_call_operand.vmem [shape: f32[1,256], index: 6, kind: input, shape index: {}]   ;;  %s5744_s7 = inlined_call_operand.hbm [shape: bf16[256,256], index: 7, kind: input, shape index: {}]   ;;  %s5745_s8 = inlined_call_operand.hbm [shape: bf16[128,256], index: 8, kind: input, shape index: {}]   ;;  %s5746_s9 = inlined_call_operand.vmem [shape: f32[1,256], index: 9, kind: input, shape index: {}]   ;;  %s5747_s10 = inlined_call_operand.hbm [shape: bf16[256,256], index: 10, kind: input, shape index: {}]   ;;  %s5748_s11 = inlined_call_operand.vmem [shape: f32[1,256], index: 11, kind: input, shape index: {}]   ;;  %s5749_s12 = inlined_call_operand.hbm [shape: bf16[256,256], index: 12, kind: input, shape index: {}]   ;;  %s5750_s13 = inlined_call_operand.vmem [shape: f32[1,256], index: 13, kind: input, shape index: {}]   ;;  %s5751_s14 = inlined_call_operand.hbm [shape: bf16[256,256], index: 14, kind: input, shape index: {}]   ;;  %s5752_s15 = inlined_call_operand.hbm [shape: bf16[128,256], index: 15, kind: input, shape index: {}]   ;;  %s5753_s16 = inlined_call_operand.vmem [shape: f32[1,256], index: 16, kind: input, shape index: {}]   ;;  %s5754_s17 = inlined_call_operand.hbm [shape: bf16[256,256], index: 17, kind: input, shape index: {}]   ;;  %s5755_s18 = inlined_call_operand.vmem [shape: f32[1,256], index: 18, kind: input, shape index: {}]   ;;  %s5756_s19 = inlined_call_operand.vmem [shape: bf16[256,4], index: 19, kind: input, shape index: {}]   ;;  %s5757_s20 = inlined_call_operand.vmem [shape: f32[1,4], index: 20, kind: input, shape index: {}]   ;;  %s5758_s21 = inlined_call_operand.vmem [shape: f32[128,4], index: 21, kind: output, shape index: {}]  }
   0x1   :  { %5760 = sst [smem:[#allocation24_spill]] %s5737_s0 }
   0x2   :  { %5761 = sst [smem:[#allocation25_spill]] %s5738_s1 }
   0x3   :  { %5762 = sst [smem:[#allocation26_spill]] %s5739_s2 }
   0x4   :  { %5763 = sst [smem:[#allocation27_spill]] %s5740_s3 }
   0x5   :  { %5764 = sst [smem:[#allocation28_spill]] %s5741_s4 }
   0x6   :  { %5765 = sst [smem:[#allocation29_spill]] %s5742_s5 }
   0x7   :  { %26 = vsyncpa [#allocation3], 0 }
   0x8   :  { %27 = vsyncpa [#allocation5], 0 }
   0x9   :  { %28 = vsyncpa [#allocation8], 0 }
   0xa   :  { %29 = vsyncpa [#allocation11], 0 }
   0xb   :  { %30 = vsyncpa [#allocation14], 0 }
   0xc   :  { %31 = vsyncpa [#allocation17], 0  ;;  %s4886_s2 = smov [#allocation4]  }
   0xd   :  { %s53_s25 = sshll.u32 %s4886_s2, 4  ;;  %s54_s25 = int_to_ptr.vmem [resolvable:$true] %s53_s25 }
   0xe   :  { %s4682_s26 = scalar_lea.vmem %s54_s25, 4096  ;;  %p4687_p1 = scmp.lt.s32.totalorder %s54_s25, %s54_s25 }
   0xf   :  { %p4683_p0 = scmp.ne.s32.totalorder %s54_s25, %s4682_s26  ;;  %p4688_p2 = scmp.lt.s32.totalorder %s4682_s26, %s4682_s26 }
  0x11   :  { %p4689_p3 = por %p4688_p2, %p4687_p1 }
  0x13   :  { %p4690_p4 = pnand %p4689_p3, %p4683_p0 }
  0x15   :  { %4693 = shalt.err (!%p4690_p4)
}
  0x16   :  { %s4887_s27 = smov 128   ;;  %s4888_s3 = smov 8  }
  0x17   :  { %s5766_s0 = sld [smem:[#allocation27_spill]]  ;;  %s4889_s4 = smov [#allocation7]  }
  0x18   :  { %s81_s30 = sshll.u32 %s4889_s4, 4  ;;  %s4890_s5 = smov [#allocation10]   ;;  %s82_s30 = int_to_ptr.vmem [resolvable:$true] %s81_s30 }
  0x19   :  { %s107_s22 = sshll.u32 %s4890_s5, 4  ;;  %s4702_s23 = scalar_lea.vmem %s82_s30, 4096  ;;  %s108_s22 = int_to_ptr.vmem [resolvable:$true] %s107_s22 }
  0x1a   :  { %p4703_p5 = scmp.ne.s32.totalorder %s82_s30, %s4702_s23  ;;  %p4707_p6 = scmp.lt.s32.totalorder %s82_s30, %s82_s30 }
  0x1b   :  { %p4708_p7 = scmp.lt.s32.totalorder %s4702_s23, %s4702_s23 }
  0x1d   :  { %59 = dma.hbm_to_vmem [thread:$0]  %s5766_s0, 4096, %s54_s25, [#allocation5], %s4887_s27, %s4887_s27, %s4888_s3  }
  0x1e   :  { %p4709_p8 = por %p4708_p7, %p4707_p6 }
  0x20   :  { %p4710_p9 = pnand %p4709_p8, %p4703_p5 }
  0x22   :  { %4713 = shalt.err (!%p4710_p9)
}
  0x23   :  { %87 = dma.hbm_to_vmem [thread:$0]  %s5744_s7, 4096, %s82_s30, [#allocation8], %s4887_s27, %s4887_s27, %s4888_s3  }
  0x24   :  { %s4722_s2 = scalar_lea.vmem %s108_s22, 4096  ;;  %p4727_p11 = scmp.lt.s32.totalorder %s108_s22, %s108_s22 }
  0x25   :  { %p4723_p10 = scmp.ne.s32.totalorder %s108_s22, %s4722_s2  ;;  %p4728_p12 = scmp.lt.s32.totalorder %s4722_s2, %s4722_s2 }
  0x27   :  { %p4729_p13 = por %p4728_p12, %p4727_p11 }
  0x29   :  { %p4730_p0 = pnand %p4729_p13, %p4723_p10 }
  0x2b   :  { %4733 = shalt.err (!%p4730_p0)
}
  0x2c   :  { %113 = dma.hbm_to_vmem [thread:$0]  %s5747_s10, 4096, %s108_s22, [#allocation11], %s4887_s27, %s4887_s27, %s4888_s3  }
  0x2d   :  { %s4891_s28 = smov [#allocation13]   ;;  %s4892_s0 = smov [#allocation2]  }
  0x2e   :  { %s135_s29 = sshll.u32 %s4891_s28, 4  ;;  %s37_s7 = sshll.u32 %s4892_s0, 4  ;;  %s136_s29 = int_to_ptr.vmem [resolvable:$true] %s135_s29  ;;  %s38_s7 = int_to_ptr.vmem [resolvable:$true] %s37_s7 }
  0x2f   :  { %s4742_s4 = scalar_lea.vmem %s136_s29, 4096  ;;  %p4747_p2 = scmp.lt.s32.totalorder %s136_s29, %s136_s29 }
  0x30   :  { %p4743_p1 = scmp.ne.s32.totalorder %s136_s29, %s4742_s4  ;;  %p4748_p3 = scmp.lt.s32.totalorder %s4742_s4, %s4742_s4 }
  0x32   :  { %p4749_p4 = por %p4748_p3, %p4747_p2 }
  0x34   :  { %p4750_p5 = pnand %p4749_p4, %p4743_p1 }
  0x36   :  { %4753 = shalt.err (!%p4750_p5)
}
  0x37   :  { %141 = dma.hbm_to_vmem [thread:$0]  %s5751_s14, 4096, %s136_s29, [#allocation14], %s4887_s27, %s4887_s27, %s4888_s3  }
  0x38   :  { %s4762_s10 = scalar_lea.vmem %s38_s7, 1024  ;;  %p4767_p7 = scmp.lt.s32.totalorder %s38_s7, %s38_s7 }
  0x39   :  { %p4763_p6 = scmp.ne.s32.totalorder %s38_s7, %s4762_s10  ;;  %p4768_p8 = scmp.lt.s32.totalorder %s4762_s10, %s4762_s10 }
  0x3b   :  { %p4769_p9 = por %p4768_p8, %p4767_p7 }
  0x3d   :  { %p4770_p10 = pnand %p4769_p9, %p4763_p6 }
  0x3f   :  { %4773 = shalt.err (!%p4770_p10)
}
  0x40   :  { %s4893_s22 = smov 64   ;;  %s4894_s23 = smov 4  }
  0x41   :  { %s5767_s2 = sld [smem:[#allocation24_spill]]  ;;  %s4895_s25 = smov [#allocation6]  }
  0x42   :  { %s67_s26 = sshll.u32 %s4895_s25, 4  ;;  %s4896_s28 = smov [#allocation9]   ;;  %s68_s26 = int_to_ptr.vmem [resolvable:$true] %s67_s26 }
  0x43   :  { %s93_s0 = sshll.u32 %s4896_s28, 4  ;;  %s4782_s14 = scalar_lea.vmem %s68_s26, 4096  ;;  %s94_s0 = int_to_ptr.vmem [resolvable:$true] %s93_s0 }
  0x44   :  { %p4783_p11 = scmp.ne.s32.totalorder %s68_s26, %s4782_s14  ;;  %p4787_p12 = scmp.lt.s32.totalorder %s68_s26, %s68_s26 }
  0x45   :  { %p4788_p13 = scmp.lt.s32.totalorder %s4782_s14, %s4782_s14 }
  0x47   :  { %43 = dma.hbm_to_vmem [thread:$0]  %s5767_s2, 1024, %s38_s7, [#allocation3], %s4893_s22, %s4893_s22, %s4894_s23  }
  0x48   :  { %p4789_p0 = por %p4788_p13, %p4787_p12 }
  0x4a   :  { %p4790_p1 = pnand %p4789_p0, %p4783_p11 }
  0x4c   :  { %4793 = shalt.err (!%p4790_p1)
}
  0x4d   :  { %s5768_s30 = sld [smem:[#allocation29_spill]]  ;;  %s4802_s7 = scalar_lea.vmem %s94_s0, 2048 }
  0x4e   :  { %p4803_p2 = scmp.ne.s32.totalorder %s94_s0, %s4802_s7  ;;  %p4807_p3 = scmp.lt.s32.totalorder %s94_s0, %s94_s0 }
  0x4f   :  { %p4808_p4 = scmp.lt.s32.totalorder %s4802_s7, %s4802_s7 }
  0x51   :  { %p4809_p5 = por %p4808_p4, %p4807_p3 }
  0x53   :  { %73 = dma.hbm_to_vmem [thread:$0]  %s5768_s30, 4096, %s68_s26, [#allocation5], %s4887_s27, %s4887_s27, %s4888_s3  }
  0x54   :  { %p4810_p6 = pnand %p4809_p5, %p4803_p2 }
  0x56   :  { %4813 = shalt.err (!%p4810_p6)
}
  0x57   :  { %99 = dma.hbm_to_vmem [thread:$0]  %s5745_s8, 2048, %s94_s0, [#allocation8], %s4887_s27, %s4887_s27, %s4888_s3  }
  0x58   :  { %s4897_s22 = smov [#allocation12]   ;;  %s4898_s1 = smov [#allocation15]  }
  0x59   :  { %s121_s23 = sshll.u32 %s4897_s22, 4  ;;  %s147_s24 = sshll.u32 %s4898_s1, 4  ;;  %s122_s23 = int_to_ptr.vmem [resolvable:$true] %s121_s23  ;;  %s148_s24 = int_to_ptr.vmem [resolvable:$true] %s147_s24 }
  0x5a   :  { %s4822_s2 = scalar_lea.vmem %s122_s23, 4096  ;;  %p4827_p8 = scmp.lt.s32.totalorder %s122_s23, %s122_s23 }
  0x5b   :  { %p4823_p7 = scmp.ne.s32.totalorder %s122_s23, %s4822_s2  ;;  %p4828_p9 = scmp.lt.s32.totalorder %s4822_s2, %s4822_s2 }
  0x5d   :  { %p4829_p10 = por %p4828_p9, %p4827_p8 }
  0x5f   :  { %p4830_p11 = pnand %p4829_p10, %p4823_p7 }
  0x61   :  { %4833 = shalt.err (!%p4830_p11)
}
  0x62   :  { %127 = dma.hbm_to_vmem [thread:$0]  %s5749_s12, 4096, %s122_s23, [#allocation11], %s4887_s27, %s4887_s27, %s4888_s3  }
  0x63   :  { %s4842_s8 = scalar_lea.vmem %s148_s24, 2048  ;;  %p4847_p13 = scmp.lt.s32.totalorder %s148_s24, %s148_s24 }
  0x64   :  { %p4843_p12 = scmp.ne.s32.totalorder %s148_s24, %s4842_s8  ;;  %p4848_p0 = scmp.lt.s32.totalorder %s4842_s8, %s4842_s8 }
  0x66   :  { %p4849_p1 = por %p4848_p0, %p4847_p13 }
  0x68   :  { %p4850_p2 = pnand %p4849_p1, %p4843_p12 }
  0x6a   :  { %4853 = shalt.err (!%p4850_p2)
}
  0x6b   :  { %153 = dma.hbm_to_vmem [thread:$0]  %s5752_s15, 2048, %s148_s24, [#allocation14], %s4887_s27, %s4887_s27, %s4888_s3  }
  0x6c   :  { %s4899_s14 = smov [#allocation16]  }
  0x6d   :  { %s161_s29 = sshll.u32 %s4899_s14, 4  ;;  %s162_s29 = int_to_ptr.vmem [resolvable:$true] %s161_s29 }
  0x6e   :  { %s4862_s4 = scalar_lea.vmem %s162_s29, 4096  ;;  %p4867_p4 = scmp.lt.s32.totalorder %s162_s29, %s162_s29 }
  0x6f   :  { %p4863_p3 = scmp.ne.s32.totalorder %s162_s29, %s4862_s4  ;;  %p4868_p5 = scmp.lt.s32.totalorder %s4862_s4, %s4862_s4 }
  0x71   :  { %p4869_p6 = por %p4868_p5, %p4867_p4 }
  0x73   :  { %p4870_p7 = pnand %p4869_p6, %p4863_p3 }
  0x75   :  { %4873 = shalt.err (!%p4870_p7)
}
  0x76   :  { %167 = dma.hbm_to_vmem [thread:$0]  %s5754_s17, 4096, %s162_s29, [#allocation17], %s4887_s27, %s4887_s27, %s4888_s3  }
  0x77   :  { %4874 = dma.done.wait [#allocation3], 1024  }
  0x78   :  { %4875 = vsyncadd [#allocation3], 4294966272 }
  0x79   :  { %4876 = dma.done.wait [#allocation5], 8192  }
  0x7a   :  { %4877 = vsyncadd [#allocation5], 4294959104 }
  0x7b   :  { %4878 = dma.done.wait [#allocation8], 6144  }
  0x7c   :  { %4879 = vsyncadd [#allocation8], 4294961152 }
  0x7d   :  { %4880 = dma.done.wait [#allocation11], 8192  }
  0x7e   :  { %4881 = vsyncadd [#allocation11], 4294959104 }
  0x7f   :  { %4882 = dma.done.wait [#allocation14], 6144  }
  0x80   :  { %4883 = vsyncadd [#allocation14], 4294961152 }
  0x81   :  { %4884 = dma.done.wait [#allocation17], 4096  }
  0x82   :  { %4885 = vsyncadd [#allocation17], 4294963200  ;;  %v4900_v0 = vmov 0   ;;  %s5769_s5 = sld [smem:[#allocation25_spill]]  ;;  %v4258_v14 = vld [vmem:[#allocation4 + $0x74] ss:$8 sps:$4 sm:$0xff]  }
  0x83   :  { %409 = vmatprep.mubr.bf16.mxu0 %v4900_v0  ;;  %v4260_v15 = vld [vmem:[#allocation4 + $0x70] ss:$8 sps:$4 sm:$0xff]   ;;  %v4261_v16 = vld [vmem:[#allocation4 + $0x64] ss:$8 sps:$4 sm:$0xff]   ;;  %742 = vmatprep.subr.bf16.mxu1 %v4258_v14  ;;  %v4263_v17 = vld [vmem:[#allocation4 + $0x60] ss:$8 sps:$4 sm:$0xff]  }
  0x84   :  { %743 = vmatpush1.bf16.msra.mxu1 %v4260_v15  ;;  %v4264_v19 = vld [vmem:[#allocation4 + $0x54] ss:$8 sps:$4 sm:$0xff]   ;;  %v4266_v21 = vld [vmem:[#allocation4 + $0x50] ss:$8 sps:$4 sm:$0xff]   ;;  %v4267_v23 = vld [vmem:[#allocation4 + $0x44] ss:$8 sps:$4 sm:$0xff]  }
  0x85   :  { %744 = vmatprep.subr.bf16.mxu1 %v4261_v16  ;;  %v4250_v24 = vld [vmem:[#allocation2] sm:$0xff]   ;;  %v4270_v26 = vld [vmem:[#allocation4 + $0x34] ss:$8 sps:$4 sm:$0xff]   ;;  %v4272_v27 = vld [vmem:[#allocation4 + $0x30] ss:$8 sps:$4 sm:$0xff]   ;;  %s5770_s26 = sld [smem:[#allocation26_spill]] }
  0x86   :  { %v4269_v25 = vld [vmem:[#allocation4 + $0x40] ss:$8 sps:$4 sm:$0xff]   ;;  %v4273_v28 = vld [vmem:[#allocation4 + $0x24] ss:$8 sps:$4 sm:$0xff]   ;;  %v4276_v31 = vld [vmem:[#allocation4 + $0x14] ss:$8 sps:$4 sm:$0xff]  }
  0x87   :  { %v4251_v29 = vld [vmem:[#allocation2 + $0x8] sm:$0xff]   ;;  %v4278_v32 = vld [vmem:[#allocation4 + $0x10] ss:$8 sps:$4 sm:$0xff]   ;;  %v4282_v36 = vld [vmem:[#allocation4 + $0xf4] ss:$8 sps:$4 sm:$0xff]   ;;  %s5771_s0 = sld [smem:[#allocation28_spill]] }
  0x88   :  { %v4226_v1 = vld [vmem:[%s5769_s5 + $0x74] ss:$8 sps:$4 sm:$0xff]   ;;  %v4228_v2 = vld [vmem:[%s5769_s5 + $0x70] ss:$8 sps:$4 sm:$0xff]   ;;  %v4229_v3 = vld [vmem:[%s5769_s5 + $0x64] ss:$8 sps:$4 sm:$0xff]   ;;  %745 = vmatpush1.bf16.msra.mxu1 %v4263_v17 }
  0x89   :  { %377 = vmatprep.subr.bf16.mxu0 %v4226_v1  ;;  %v4231_v4 = vld [vmem:[%s5769_s5 + $0x60] ss:$8 sps:$4 sm:$0xff]   ;;  %v4232_v5 = vld [vmem:[%s5769_s5 + $0x54] ss:$8 sps:$4 sm:$0xff]   ;;  %v4234_v6 = vld [vmem:[%s5769_s5 + $0x50] ss:$8 sps:$4 sm:$0xff]   ;;  %746 = vmatprep.subr.bf16.mxu1 %v4264_v19 }
  0x8a   :  { %378 = vmatpush1.bf16.msra.mxu0 %v4228_v2  ;;  %v4235_v7 = vld [vmem:[%s5769_s5 + $0x44] ss:$8 sps:$4 sm:$0xff]   ;;  %v4237_v8 = vld [vmem:[%s5769_s5 + $0x40] ss:$8 sps:$4 sm:$0xff]   ;;  %v4238_v9 = vld [vmem:[%s5769_s5 + $0x34] ss:$8 sps:$4 sm:$0xff]  }
  0x8b   :  { %379 = vmatprep.subr.bf16.mxu0 %v4229_v3  ;;  %v4240_v10 = vld [vmem:[%s5769_s5 + $0x30] ss:$8 sps:$4 sm:$0xff]   ;;  %v4241_v11 = vld [vmem:[%s5769_s5 + $0x24] ss:$8 sps:$4 sm:$0xff]   ;;  %v4243_v12 = vld [vmem:[%s5769_s5 + $0x20] ss:$8 sps:$4 sm:$0xff]  }
  0x8c   :  { %v4244_v13 = vld [vmem:[%s5769_s5 + $0x14] ss:$8 sps:$4 sm:$0xff]   ;;  %v4246_v18 = vld [vmem:[%s5769_s5 + $0x10] ss:$8 sps:$4 sm:$0xff]   ;;  %v4247_v20 = vld [vmem:[%s5769_s5 + $0x4] ss:$8 sps:$4 sm:$0xff]   ;;  %747 = vmatpush1.bf16.msra.mxu1 %v4266_v21 }
  0x8d   :  { %v4249_v22 = vld [vmem:[%s5769_s5] ss:$8 sps:$4 sm:$0xff]   ;;  %748 = vmatprep.subr.bf16.mxu1 %v4267_v23  ;;  %v4279_v33 = vld [vmem:[#allocation4 + $0x4] ss:$8 sps:$4 sm:$0xff]   ;;  %v4252_v34 = vld [vmem:[#allocation2 + $0x10] sm:$0xff]   ;;  %vm3807_vm0 = vcmask 31744  }
  0x8e   :  { %380 = vmatpush1.bf16.msra.mxu0 %v4231_v4  ;;  %v4275_v30 = vld [vmem:[#allocation4 + $0x20] ss:$8 sps:$4 sm:$0xff]   ;;  %v4284_v37 = vld [vmem:[#allocation4 + $0xf0] ss:$8 sps:$4 sm:$0xff]   ;;  %v4285_v38 = vld [vmem:[#allocation4 + $0xe4] ss:$8 sps:$4 sm:$0xff]  }
  0x8f   :  { %381 = vmatprep.subr.bf16.mxu0 %v4232_v5  ;;  %v4281_v35 = vld [vmem:[#allocation4] ss:$8 sps:$4 sm:$0xff]   ;;  %v4253_v39 = vld [vmem:[#allocation2 + $0x18] sm:$0xff]   ;;  %v4291_v43 = vld [vmem:[#allocation4 + $0xc4] ss:$8 sps:$4 sm:$0xff]  }
  0x90   :  { %749 = vmatpush1.bf16.msra.mxu1 %v4269_v25  ;;  %v4287_v40 = vld [vmem:[#allocation4 + $0xe0] ss:$8 sps:$4 sm:$0xff]   ;;  %v4288_v41 = vld [vmem:[#allocation4 + $0xd4] ss:$8 sps:$4 sm:$0xff]   ;;  %v4290_v42 = vld [vmem:[#allocation4 + $0xd0] ss:$8 sps:$4 sm:$0xff]  }
  0x91   :  { %750 = vmatprep.subr.bf16.mxu1 %v4270_v26  ;;  %v4254_v44 = vld [vmem:[#allocation2 + $0x20] sm:$0xff]   ;;  %v4294_v46 = vld [vmem:[#allocation4 + $0xb4] ss:$8 sps:$4 sm:$0xff]   ;;  %v4296_v47 = vld [vmem:[#allocation4 + $0xb0] ss:$8 sps:$4 sm:$0xff]  }
  0x92   :  { %382 = vmatpush1.bf16.msra.mxu0 %v4234_v6  ;;  %v4293_v45 = vld [vmem:[#allocation4 + $0xc0] ss:$8 sps:$4 sm:$0xff]   ;;  %v4256_v49 = vld [vmem:[#allocation2 + $0x30] sm:$0xff]   ;;  %v4257_v50 = vld [vmem:[#allocation2 + $0x38] sm:$0xff]  }
  0x93   :  { %383 = vmatprep.subr.bf16.mxu0 %v4235_v7  ;;  %v4255_v48 = vld [vmem:[#allocation2 + $0x28] sm:$0xff]   ;;  %v4300_v53 = vld [vmem:[#allocation4 + $0x94] ss:$8 sps:$4 sm:$0xff]   ;;  %v4302_v54 = vld [vmem:[#allocation4 + $0x90] ss:$8 sps:$4 sm:$0xff]  }
  0x94   :  { %751 = vmatpush1.bf16.msra.mxu1 %v4272_v27  ;;  %v4297_v51 = vld [vmem:[#allocation4 + $0xa4] ss:$8 sps:$4 sm:$0xff]   ;;  %v4299_v52 = vld [vmem:[#allocation4 + $0xa0] ss:$8 sps:$4 sm:$0xff]   ;;  %v4306_v57 = vld [vmem:[#allocation6 + $0x70] ss:$8 sps:$4 sm:$0xff]  }
  0x95   :  { %752 = vmatprep.subr.bf16.mxu1 %v4273_v28  ;;  %v4303_v55 = vld [vmem:[#allocation4 + $0x84] ss:$8 sps:$4 sm:$0xff]   ;;  %v4305_v56 = vld [vmem:[#allocation4 + $0x80] ss:$8 sps:$4 sm:$0xff]   ;;  %v4308_v58 = vld [vmem:[#allocation6 + $0x74] ss:$8 sps:$4 sm:$0xff]  }
  0x96   :  { %384 = vmatpush1.bf16.msra.mxu0 %v4237_v8  ;;  %v4311_v59 = vld [vmem:[#allocation6 + $0x64] ss:$8 sps:$4 sm:$0xff]   ;;  %v4309_v60 = vld [vmem:[#allocation6 + $0x60] ss:$8 sps:$4 sm:$0xff]   ;;  %v4314_v61 = vld [vmem:[#allocation6 + $0x54] ss:$8 sps:$4 sm:$0xff]  }
  0x97   :  { %385 = vmatprep.subr.bf16.mxu0 %v4238_v9  ;;  %v4312_v62 = vld [vmem:[#allocation6 + $0x50] ss:$8 sps:$4 sm:$0xff]   ;;  %v4317_v63 = vld [vmem:[#allocation6 + $0x44] ss:$8 sps:$4 sm:$0xff]   ;;  %v4315_v1 = vld [vmem:[#allocation6 + $0x40] ss:$8 sps:$4 sm:$0xff]  }
  0x98   :  { %753 = vmatpush1.bf16.msra.mxu1 %v4275_v30  ;;  %v4320_v2 = vld [vmem:[#allocation6 + $0x34] ss:$8 sps:$4 sm:$0xff]   ;;  %v4318_v3 = vld [vmem:[#allocation6 + $0x30] ss:$8 sps:$4 sm:$0xff]   ;;  %v4323_v4 = vld [vmem:[#allocation6 + $0x24] ss:$8 sps:$4 sm:$0xff]  }
  0x99   :  { %754 = vmatprep.subr.bf16.mxu1 %v4276_v31  ;;  %v4321_v5 = vld [vmem:[#allocation6 + $0x20] ss:$8 sps:$4 sm:$0xff]   ;;  %v4326_v6 = vld [vmem:[#allocation6 + $0x14] ss:$8 sps:$4 sm:$0xff]   ;;  %v4324_v7 = vld [vmem:[#allocation6 + $0x10] ss:$8 sps:$4 sm:$0xff]  }
  0x9a   :  { %386 = vmatpush1.bf16.msra.mxu0 %v4240_v10  ;;  %v4329_v8 = vld [vmem:[#allocation6 + $0x4] ss:$8 sps:$4 sm:$0xff]   ;;  %v4327_v9 = vld [vmem:[#allocation6] ss:$8 sps:$4 sm:$0xff]   ;;  %v4332_v10 = vld [vmem:[#allocation6 + $0xf4] ss:$8 sps:$4 sm:$0xff]  }
  0x9b   :  { %387 = vmatprep.subr.bf16.mxu0 %v4241_v11  ;;  %v4330_v11 = vld [vmem:[#allocation6 + $0xf0] ss:$8 sps:$4 sm:$0xff]   ;;  %v4338_v14 = vld [vmem:[#allocation6 + $0xd4] ss:$8 sps:$4 sm:$0xff]   ;;  %v4341_v16 = vld [vmem:[#allocation6 + $0xc4] ss:$8 sps:$4 sm:$0xff]  }
  0x9c   :  { %755 = vmatpush1.bf16.msra.mxu1 %v4278_v32  ;;  %v4336_v15 = vld [vmem:[#allocation6 + $0xd0] ss:$8 sps:$4 sm:$0xff]   ;;  %v4339_v17 = vld [vmem:[#allocation6 + $0xc0] ss:$8 sps:$4 sm:$0xff]  }
  0x9d   :  { %756 = vmatprep.subr.bf16.mxu1 %v4279_v33  ;;  %v4342_v19 = vld [vmem:[#allocation6 + $0xb0] ss:$8 sps:$4 sm:$0xff]  }
  0x9e   :  { %388 = vmatpush1.bf16.msra.mxu0 %v4243_v12  ;;  %v4335_v12 = vld [vmem:[#allocation6 + $0xe4] ss:$8 sps:$4 sm:$0xff]  }
  0x9f   :  { %389 = vmatprep.subr.bf16.mxu0 %v4244_v13  ;;  %v4333_v13 = vld [vmem:[#allocation6 + $0xe0] ss:$8 sps:$4 sm:$0xff]  }
  0xa0   :  { %757 = vmatpush1.bf16.msra.mxu1 %v4281_v35 }
  0xa1   :  { %758 = vmatprep.subr.bf16.mxu1 %v4282_v36 }
  0xa2   :  { %390 = vmatpush1.bf16.msra.mxu0 %v4246_v18  ;;  %v4344_v18 = vld [vmem:[#allocation6 + $0xb4] ss:$8 sps:$4 sm:$0xff]  }
  0xa3   :  { %391 = vmatprep.subr.bf16.mxu0 %v4247_v20  ;;  %v239_v20 = vlaneseq }
  0xa4   :  { %759 = vmatpush2.bf16.msra.mxu1 %v4284_v37 }
  0xa5   :  { %760 = vmatprep.subr.bf16.mxu1 %v4285_v38  ;;  %v240_v21 = vshrl.u32 %v239_v20, 7 }
  0xa6   :  { %392 = vmatpush1.bf16.msra.mxu0 %v4249_v22 }
  0xa7   :  { %1107 = vmatprep.subr.bf16.mxu0 %v4308_v58  ;;  %v5124_v22 = vsub.s32 1, %v240_v21  ;;  %v5126_v23 = vsub.s32 0, %v240_v21 }
  0xa8   :  { %761 = vmatpush2.bf16.msra.mxu1 %v4287_v40 }
  0xa9   :  { %410 = vmatmul.mubr.bf16.vlgmr.msra.gmra.mxu0 %v4250_v24  ;;  %762 = vmatprep.subr.bf16.mxu1 %v4288_v41  ;;  %v237_v24 = vld [vmem:[%s5770_s26] sm:$0x3] }
  0xaa   :  { %419 = vmatprep.mubr.bf16.mxu0 %v4900_v0  ;;  %1108 = vmatpush1.bf16.msra.mxu0 %v4306_v57  ;;  %v5132_v26 = vrot.slane %v237_v24, %v5124_v22  ;;  %v5135_v27 = vrot.slane %v237_v24, %v5126_v23 }
  0xab   :  { %1109 = vmatprep.subr.bf16.mxu0 %v4311_v59 }
  0xac   :  { %763 = vmatpush2.bf16.msra.mxu1 %v4290_v42 }
  0xad   :  { %764 = vmatprep.subr.bf16.mxu1 %v4291_v43 }
  0xae   :  { %1110 = vmatpush1.bf16.msra.mxu0 %v4309_v60 }
  0xaf   :  { %1111 = vmatprep.subr.bf16.mxu0 %v4314_v61 }
  0xb0   :  { %765 = vmatpush2.bf16.msra.mxu1 %v4293_v45 }
  0xb1   :  { %420 = vmatmul.mubr.bf16.gmra.mxu0 %v4251_v29  ;;  %766 = vmatprep.subr.bf16.mxu1 %v4294_v46 }
  0xb2   :  { %429 = vmatprep.mubr.bf16.mxu0 %v4900_v0  ;;  %1112 = vmatpush1.bf16.msra.mxu0 %v4312_v62 }
  0xb3   :  { %1113 = vmatprep.subr.bf16.mxu0 %v4317_v63 }
  0xb4   :  { %767 = vmatpush2.bf16.msra.mxu1 %v4296_v47 }
  0xb5   :  { %768 = vmatprep.subr.bf16.mxu1 %v4297_v51 }
  0xb6   :  { %1114 = vmatpush1.bf16.msra.mxu0 %v4315_v1 }
  0xb7   :  { %1115 = vmatprep.subr.bf16.mxu0 %v4320_v2 }
  0xb8   :  { %769 = vmatpush2.bf16.msra.mxu1 %v4299_v52 }
  0xb9   :  { %430 = vmatmul.mubr.bf16.gmra.mxu0 %v4252_v34  ;;  %770 = vmatprep.subr.bf16.mxu1 %v4300_v53 }
  0xba   :  { %439 = vmatprep.mubr.bf16.mxu0 %v4900_v0  ;;  %1116 = vmatpush1.bf16.msra.mxu0 %v4318_v3 }
  0xbb   :  { %1117 = vmatprep.subr.bf16.mxu0 %v4323_v4 }
  0xbc   :  { %771 = vmatpush2.bf16.msra.mxu1 %v4302_v54 }
  0xbd   :  { %772 = vmatprep.subr.bf16.mxu1 %v4303_v55 }
  0xbe   :  { %1118 = vmatpush1.bf16.msra.mxu0 %v4321_v5 }
  0xbf   :  { %1119 = vmatprep.subr.bf16.mxu0 %v4326_v6 }
  0xc0   :  { %773 = vmatpush2.bf16.msra.mxu1 %v4305_v56 }
  0xc1   :  { %440 = vmatmul.mubr.bf16.gmra.mxu0 %v4253_v39 }
  0xc2   :  { %449 = vmatprep.mubr.bf16.mxu0 %v4900_v0  ;;  %1120 = vmatpush1.bf16.msra.mxu0 %v4324_v7 }
  0xc3   :  { %1121 = vmatprep.subr.bf16.mxu0 %v4329_v8 }
  0xc6   :  { %1122 = vmatpush1.bf16.msra.mxu0 %v4327_v9 }
  0xc7   :  { %1123 = vmatprep.subr.bf16.mxu0 %v4332_v10 }
  0xc9   :  { %450 = vmatmul.mubr.bf16.gmra.mxu0 %v4254_v44 }
  0xca   :  { %459 = vmatprep.mubr.bf16.mxu0 %v4900_v0  ;;  %1124 = vmatpush2.bf16.msra.mxu0 %v4330_v11 }
  0xcb   :  { %1125 = vmatprep.subr.bf16.mxu0 %v4335_v12 }
  0xce   :  { %1126 = vmatpush2.bf16.msra.mxu0 %v4333_v13 }
  0xcf   :  { %1127 = vmatprep.subr.bf16.mxu0 %v4338_v14 }
  0xd1   :  { %460 = vmatmul.mubr.bf16.gmra.mxu0 %v4255_v48 }
  0xd2   :  { %469 = vmatprep.mubr.bf16.mxu0 %v4900_v0  ;;  %1128 = vmatpush2.bf16.msra.mxu0 %v4336_v15 }
  0xd3   :  { %1129 = vmatprep.subr.bf16.mxu0 %v4341_v16 }
  0xd6   :  { %1130 = vmatpush2.bf16.msra.mxu0 %v4339_v17 }
  0xd7   :  { %1131 = vmatprep.subr.bf16.mxu0 %v4344_v18 }
  0xd9   :  { %470 = vmatmul.mubr.bf16.gmra.mxu0 %v4256_v49 }
  0xda   :  { %479 = vmatprep.mubr.bf16.mxu0 %v4900_v0  ;;  %1132 = vmatpush2.bf16.msra.mxu0 %v4342_v19 }
  0xe1   :  { %480 = vmatmul.mubr.bf16.gmra.mxu0 %v4257_v50 }
 0x169   :  { %v411_v25 = vpop.f32.mrf.mxu0 }
 0x16a   :  { %v412_v32 = vadd.f32 %v411_v25, %v5135_v27 }
 0x16b   :  { %v413_v28 = vpop.f32.mrf.mxu0 }
 0x16c   :  { %v414_v30 = vadd.f32 %v413_v28, %v5132_v26  ;;  %v490_v39 = vmax.f32 %v412_v32, 0.0 }
 0x16d   :  { %v415_v29 = vpop.f32.mrf.mxu0 }
 0x16e   :  { %v416_v31 = vadd.f32 %v415_v29, %v5135_v27  ;;  %v491_v37 = vmax.f32 %v414_v30, 0.0 }
 0x16f   :  { %v417_v33 = vpop.f32.mrf.mxu0 }
 0x170   :  { %v418_v34 = vadd.f32 %v417_v33, %v5132_v26  ;;  %v492_v35 = vmax.f32 %v416_v31, 0.0 }
 0x171   :  { %v421_v36 = vpop.f32.mrf.mxu0 }
 0x172   :  { %v493_v38 = vmax.f32 %v418_v34, 0.0  ;;  %v555_v42 = vpack.c.bf16 %v492_v35, %v490_v39  ;;  %v422_v46 = vadd.f32 %v421_v36, %v5135_v27 }
 0x173   :  { %v423_v40 = vpop.f32.mrf.mxu0 }
 0x174   :  { %v556_v41 = vpack.c.bf16 %v493_v38, %v491_v37  ;;  %v424_v44 = vadd.f32 %v423_v40, %v5132_v26  ;;  %v494_v53 = vmax.f32 %v422_v46, 0.0 }
 0x175   :  { %v425_v43 = vpop.f32.mrf.mxu0 }
 0x176   :  { %v426_v45 = vadd.f32 %v425_v43, %v5135_v27  ;;  %774 = vmatprep.mubr.bf16.mxu1 %v556_v41  ;;  %v495_v51 = vmax.f32 %v424_v44, 0.0 }
 0x177   :  { %v427_v47 = vpop.f32.mrf.mxu0  ;;  %775 = vmatmul.mubr.bf16.vlgmr.msra.gmra.mxu1 %v555_v42 }
 0x178   :  { %v428_v48 = vadd.f32 %v427_v47, %v5132_v26  ;;  %v496_v49 = vmax.f32 %v426_v45, 0.0 }
 0x179   :  { %v431_v50 = vpop.f32.mrf.mxu0 }
 0x17a   :  { %v497_v52 = vmax.f32 %v428_v48, 0.0  ;;  %v557_v56 = vpack.c.bf16 %v496_v49, %v494_v53  ;;  %v432_v60 = vadd.f32 %v431_v50, %v5135_v27 }
 0x17b   :  { %v433_v54 = vpop.f32.mrf.mxu0 }
 0x17c   :  { %v558_v55 = vpack.c.bf16 %v497_v52, %v495_v51  ;;  %v434_v58 = vadd.f32 %v433_v54, %v5132_v26  ;;  %v498_v4 = vmax.f32 %v432_v60, 0.0 }
 0x17d   :  { %v435_v57 = vpop.f32.mrf.mxu0 }
 0x17e   :  { %v436_v59 = vadd.f32 %v435_v57, %v5135_v27  ;;  %784 = vmatprep.mubr.bf16.mxu1 %v558_v55  ;;  %v499_v2 = vmax.f32 %v434_v58, 0.0 }
 0x17f   :  { %v437_v61 = vpop.f32.mrf.mxu0  ;;  %785 = vmatmul.mubr.bf16.gmra.mxu1 %v557_v56 }
 0x180   :  { %v438_v62 = vadd.f32 %v437_v61, %v5132_v26  ;;  %v500_v63 = vmax.f32 %v436_v59, 0.0 }
 0x181   :  { %v441_v1 = vpop.f32.mrf.mxu0 }
 0x182   :  { %v501_v3 = vmax.f32 %v438_v62, 0.0  ;;  %v559_v7 = vpack.c.bf16 %v500_v63, %v498_v4  ;;  %v442_v11 = vadd.f32 %v441_v1, %v5135_v27 }
 0x183   :  { %v443_v5 = vpop.f32.mrf.mxu0 }
 0x184   :  { %v560_v6 = vpack.c.bf16 %v501_v3, %v499_v2  ;;  %v444_v9 = vadd.f32 %v443_v5, %v5132_v26  ;;  %v502_v18 = vmax.f32 %v442_v11, 0.0 }
 0x185   :  { %v445_v8 = vpop.f32.mrf.mxu0 }
 0x186   :  { %v446_v10 = vadd.f32 %v445_v8, %v5135_v27  ;;  %794 = vmatprep.mubr.bf16.mxu1 %v560_v6  ;;  %v503_v16 = vmax.f32 %v444_v9, 0.0 }
 0x187   :  { %v447_v12 = vpop.f32.mrf.mxu0  ;;  %795 = vmatmul.mubr.bf16.gmra.mxu1 %v559_v7 }
 0x188   :  { %v448_v13 = vadd.f32 %v447_v12, %v5132_v26  ;;  %v504_v14 = vmax.f32 %v446_v10, 0.0 }
 0x189   :  { %v451_v15 = vpop.f32.mrf.mxu0 }
 0x18a   :  { %v505_v17 = vmax.f32 %v448_v13, 0.0  ;;  %v561_v21 = vpack.c.bf16 %v504_v14, %v502_v18  ;;  %v452_v29 = vadd.f32 %v451_v15, %v5135_v27  ;;  %v4345_v18 = vld [vmem:[#allocation6 + $0xa0] ss:$8 sps:$4 sm:$0xff]  }
 0x18b   :  { %v453_v19 = vpop.f32.mrf.mxu0 }
 0x18c   :  { %v562_v20 = vpack.c.bf16 %v505_v17, %v503_v16  ;;  %v454_v25 = vadd.f32 %v453_v19, %v5132_v26  ;;  %v506_v36 = vmax.f32 %v452_v29, 0.0  ;;  %v4347_v17 = vld [vmem:[#allocation6 + $0xa4] ss:$8 sps:$4 sm:$0xff]   ;;  %v4350_v19 = vld [vmem:[#allocation6 + $0x94] ss:$8 sps:$4 sm:$0xff]  }
 0x18d   :  { %v455_v24 = vpop.f32.mrf.mxu0  ;;  %1133 = vmatprep.subr.bf16.mxu0 %v4347_v17  ;;  %v4363_v29 = vld [vmem:[#allocation9 + $0x60] ss:$8 sps:$4 sm:$0xff]  }
 0x18e   :  { %v456_v28 = vadd.f32 %v455_v24, %v5135_v27  ;;  %804 = vmatprep.mubr.bf16.mxu1 %v562_v20  ;;  %v507_v34 = vmax.f32 %v454_v25, 0.0  ;;  %1134 = vmatpush2.bf16.msra.mxu0 %v4345_v18  ;;  %v4353_v20 = vld [vmem:[#allocation6 + $0x84] ss:$8 sps:$4 sm:$0xff]   ;;  %v4356_v24 = vld [vmem:[#allocation9 + $0x74] ss:$8 sps:$4 sm:$0xff]  }
 0x18f   :  { %v457_v30 = vpop.f32.mrf.mxu0  ;;  %805 = vmatmul.mubr.bf16.gmra.mxu1 %v561_v21  ;;  %1135 = vmatprep.subr.bf16.mxu0 %v4350_v19  ;;  %v4354_v21 = vld [vmem:[#allocation9 + $0x70] ss:$8 sps:$4 sm:$0xff]   ;;  %v4359_v25 = vld [vmem:[#allocation7 + $0x74] ss:$8 sps:$4 sm:$0xff]  }
 0x190   :  { %v458_v31 = vadd.f32 %v457_v30, %v5132_v26  ;;  %v508_v32 = vmax.f32 %v456_v28, 0.0  ;;  %1397 = vmatprep.subr.bf16.mxu1 %v4356_v24  ;;  %v4365_v28 = vld [vmem:[#allocation9 + $0x64] ss:$8 sps:$4 sm:$0xff]   ;;  %v4374_v30 = vld [vmem:[#allocation9 + $0x54] ss:$8 sps:$4 sm:$0xff]  }
 0x191   :  { %v461_v33 = vpop.f32.mrf.mxu0  ;;  %1398 = vmatpush1.bf16.msra.mxu1 %v4354_v21 }
 0x192   :  { %v509_v35 = vmax.f32 %v458_v31, 0.0  ;;  %v563_v39 = vpack.c.bf16 %v508_v32, %v506_v36  ;;  %v462_v43 = vadd.f32 %v461_v33, %v5135_v27  ;;  %1399 = vmatprep.subr.bf16.mxu1 %v4365_v28  ;;  %v4372_v31 = vld [vmem:[#allocation9 + $0x50] ss:$8 sps:$4 sm:$0xff]   ;;  %v4383_v32 = vld [vmem:[#allocation9 + $0x44] ss:$8 sps:$4 sm:$0xff]  }
 0x193   :  { %v463_v37 = vpop.f32.mrf.mxu0  ;;  %v4381_v33 = vld [vmem:[#allocation9 + $0x40] ss:$8 sps:$4 sm:$0xff]   ;;  %v4401_v36 = vld [vmem:[#allocation9 + $0x24] ss:$8 sps:$4 sm:$0xff]  }
 0x194   :  { %v564_v38 = vpack.c.bf16 %v509_v35, %v507_v34  ;;  %v464_v41 = vadd.f32 %v463_v37, %v5132_v26  ;;  %v510_v50 = vmax.f32 %v462_v43, 0.0  ;;  %v4392_v34 = vld [vmem:[#allocation9 + $0x34] ss:$8 sps:$4 sm:$0xff]   ;;  %v4390_v35 = vld [vmem:[#allocation9 + $0x30] ss:$8 sps:$4 sm:$0xff]  }
 0x195   :  { %v465_v40 = vpop.f32.mrf.mxu0  ;;  %1400 = vmatpush1.bf16.msra.mxu1 %v4363_v29  ;;  %v4399_v37 = vld [vmem:[#allocation9 + $0x20] ss:$8 sps:$4 sm:$0xff]  }
 0x196   :  { %v466_v42 = vadd.f32 %v465_v40, %v5135_v27  ;;  %814 = vmatprep.mubr.bf16.mxu1 %v564_v38  ;;  %v511_v48 = vmax.f32 %v464_v41, 0.0  ;;  %1401 = vmatprep.subr.bf16.mxu1 %v4374_v30  ;;  %v4410_v38 = vld [vmem:[#allocation9 + $0x14] ss:$8 sps:$4 sm:$0xff]   ;;  %v554_v40 = vld [vmem:[%s5771_s0] sm:$0x3] }
 0x197   :  { %v467_v44 = vpop.f32.mrf.mxu0  ;;  %815 = vmatmul.mubr.bf16.gmra.mxu1 %v563_v39  ;;  %v4408_v39 = vld [vmem:[#allocation9 + $0x10] ss:$8 sps:$4 sm:$0xff]   ;;  %v5177_v43 = vrot.slane %v554_v40, %v5126_v23 }
 0x198   :  { %v468_v45 = vadd.f32 %v467_v44, %v5132_v26  ;;  %v512_v46 = vmax.f32 %v466_v42, 0.0  ;;  %v5174_v42 = vrot.slane %v554_v40, %v5124_v22 }
 0x199   :  { %v471_v47 = vpop.f32.mrf.mxu0  ;;  %1402 = vmatpush1.bf16.msra.mxu1 %v4372_v31 }
 0x19a   :  { %v513_v49 = vmax.f32 %v468_v45, 0.0  ;;  %v565_v53 = vpack.c.bf16 %v512_v46, %v510_v50  ;;  %v472_v57 = vadd.f32 %v471_v47, %v5135_v27  ;;  %1403 = vmatprep.subr.bf16.mxu1 %v4383_v32 }
 0x19b   :  { %v473_v51 = vpop.f32.mrf.mxu0 }
 0x19c   :  { %v566_v52 = vpack.c.bf16 %v513_v49, %v511_v48  ;;  %v474_v55 = vadd.f32 %v473_v51, %v5132_v26  ;;  %v514_v1 = vmax.f32 %v472_v57, 0.0 }
 0x19d   :  { %v475_v54 = vpop.f32.mrf.mxu0  ;;  %1404 = vmatpush1.bf16.msra.mxu1 %v4381_v33  ;;  %v4375_v33 = vld [vmem:[#allocation7 + $0x30] ss:$8 sps:$4 sm:$0xff]  }
 0x19e   :  { %v476_v56 = vadd.f32 %v475_v54, %v5135_v27  ;;  %824 = vmatprep.mubr.bf16.mxu1 %v566_v52  ;;  %v515_v62 = vmax.f32 %v474_v55, 0.0  ;;  %1405 = vmatprep.subr.bf16.mxu1 %v4392_v34 }
 0x19f   :  { %v477_v58 = vpop.f32.mrf.mxu0  ;;  %825 = vmatmul.mubr.bf16.gmra.mxu1 %v565_v53 }
 0x1a0   :  { %v478_v59 = vadd.f32 %v477_v58, %v5132_v26  ;;  %v516_v60 = vmax.f32 %v476_v56, 0.0  ;;  %v4357_v58 = vld [vmem:[#allocation7 + $0x70] ss:$8 sps:$4 sm:$0xff]  }
 0x1a1   :  { %v481_v61 = vpop.f32.mrf.mxu0  ;;  %1406 = vmatpush1.bf16.msra.mxu1 %v4390_v35 }
 0x1a2   :  { %v517_v63 = vmax.f32 %v478_v59, 0.0  ;;  %v567_v4 = vpack.c.bf16 %v516_v60, %v514_v1  ;;  %v482_v8 = vadd.f32 %v481_v61, %v5135_v27  ;;  %1407 = vmatprep.subr.bf16.mxu1 %v4401_v36  ;;  %v4362_v61 = vld [vmem:[#allocation7 + $0x64] ss:$8 sps:$4 sm:$0xff]  }
 0x1a3   :  { %v483_v2 = vpop.f32.mrf.mxu0  ;;  %v4380_v36 = vld [vmem:[#allocation7 + $0x24] ss:$8 sps:$4 sm:$0xff]  }
 0x1a4   :  { %v568_v3 = vpack.c.bf16 %v517_v63, %v515_v62  ;;  %v484_v6 = vadd.f32 %v483_v2, %v5132_v26  ;;  %v518_v14 = vmax.f32 %v482_v8, 0.0 }
 0x1a5   :  { %v485_v5 = vpop.f32.mrf.mxu0  ;;  %1408 = vmatpush1.bf16.msra.mxu1 %v4399_v37 }
 0x1a6   :  { %v486_v7 = vadd.f32 %v485_v5, %v5135_v27  ;;  %834 = vmatprep.mubr.bf16.mxu1 %v568_v3  ;;  %v519_v12 = vmax.f32 %v484_v6, 0.0  ;;  %v4348_v27 = vld [vmem:[#allocation6 + $0x90] ss:$8 sps:$4 sm:$0xff]   ;;  %1409 = vmatprep.subr.bf16.mxu1 %v4410_v38 }
 0x1a7   :  { %v487_v9 = vpop.f32.mrf.mxu0  ;;  %835 = vmatmul.mubr.bf16.gmra.mxu1 %v567_v4  ;;  %1136 = vmatpush2.bf16.msra.mxu0 %v4348_v27  ;;  %v4360_v4 = vld [vmem:[#allocation7 + $0x60] ss:$8 sps:$4 sm:$0xff]  }
 0x1a8   :  { %v488_v10 = vadd.f32 %v487_v9, %v5132_v26  ;;  %v520_v11 = vmax.f32 %v486_v7, 0.0  ;;  %v4351_v26 = vld [vmem:[#allocation6 + $0x80] ss:$8 sps:$4 sm:$0xff]   ;;  %1137 = vmatprep.subr.bf16.mxu0 %v4353_v20  ;;  %v4368_v7 = vld [vmem:[#allocation7 + $0x54] ss:$8 sps:$4 sm:$0xff]  }
 0x1a9   :  { %1410 = vmatpush1.bf16.msra.mxu1 %v4408_v39 }
 0x1aa   :  { %v521_v13 = vmax.f32 %v488_v10, 0.0  ;;  %v569_v16 = vpack.c.bf16 %v520_v11, %v518_v14 }
 0x1ab   :  { %1138 = vmatpush2.bf16.msra.mxu0 %v4351_v26  ;;  %v4369_v26 = vld [vmem:[#allocation7 + $0x40] ss:$8 sps:$4 sm:$0xff]  }
 0x1ac   :  { %v570_v15 = vpack.c.bf16 %v521_v13, %v519_v12  ;;  %1670 = vmatprep.subr.bf16.mxu0 %v4359_v25  ;;  %v4366_v13 = vld [vmem:[#allocation7 + $0x50] ss:$8 sps:$4 sm:$0xff]   ;;  %v4377_v25 = vld [vmem:[#allocation7 + $0x34] ss:$8 sps:$4 sm:$0xff]  }
 0x1ae   :  { %844 = vmatprep.mubr.bf16.mxu1 %v570_v15 }
 0x1af   :  { %845 = vmatmul.mubr.bf16.gmra.mxu1 %v569_v16  ;;  %v4371_v16 = vld [vmem:[#allocation7 + $0x44] ss:$8 sps:$4 sm:$0xff]  }
 0x1b0   :  { %1429 = vmatprep.mubr.bf16.mxu1 %v4900_v0 }
 0x237   :  { %v776_v41 = vpop.f32.mrf.mxu1 }
 0x238   :  { %v777_v48 = vadd.f32 %v776_v41, %v5177_v43 }
 0x239   :  { %v778_v44 = vpop.f32.mrf.mxu1 }
 0x23a   :  { %v779_v46 = vadd.f32 %v778_v44, %v5174_v42  ;;  %v855_v55 = vmax.f32 %v777_v48, 0.0  ;;  %v4378_v44 = vld [vmem:[#allocation7 + $0x20] ss:$8 sps:$4 sm:$0xff]  }
 0x23b   :  { %v780_v45 = vpop.f32.mrf.mxu1 }
 0x23c   :  { %v781_v47 = vadd.f32 %v780_v45, %v5177_v43  ;;  %v856_v53 = vmax.f32 %v779_v46, 0.0 }
 0x23d   :  { %v782_v49 = vpop.f32.mrf.mxu1 }
 0x23e   :  { %v783_v50 = vadd.f32 %v782_v49, %v5174_v42  ;;  %v857_v51 = vmax.f32 %v781_v47, 0.0  ;;  %v4386_v47 = vld [vmem:[#allocation7 + $0x14] ss:$8 sps:$4 sm:$0xff]  }
 0x23f   :  { %v786_v52 = vpop.f32.mrf.mxu1 }
 0x240   :  { %v858_v54 = vmax.f32 %v783_v50, 0.0  ;;  %v920_v59 = vpack.c.bf16 %v857_v51, %v855_v55  ;;  %v787_v1 = vadd.f32 %v786_v52, %v5177_v43 }
 0x241   :  { %v788_v56 = vpop.f32.mrf.mxu1 }
 0x242   :  { %v921_v57 = vpack.c.bf16 %v858_v54, %v856_v53  ;;  %v789_v62 = vadd.f32 %v788_v56, %v5174_v42  ;;  %v859_v10 = vmax.f32 %v787_v1, 0.0  ;;  %v4384_v53 = vld [vmem:[#allocation7 + $0x10] ss:$8 sps:$4 sm:$0xff]   ;;  %v4389_v56 = vld [vmem:[#allocation7 + $0x4] ss:$8 sps:$4 sm:$0xff]  }
 0x243   :  { %v790_v60 = vpop.f32.mrf.mxu1 }
 0x244   :  { %v791_v63 = vadd.f32 %v790_v60, %v5177_v43  ;;  %1139 = vmatprep.mubr.bf16.mxu0 %v921_v57  ;;  %v860_v8 = vmax.f32 %v789_v62, 0.0  ;;  %v4387_v62 = vld [vmem:[#allocation7] ss:$8 sps:$4 sm:$0xff]  }
 0x245   :  { %v792_v2 = vpop.f32.mrf.mxu1  ;;  %1140 = vmatmul.mubr.bf16.vlgmr.msra.gmra.mxu0 %v920_v59 }
 0x246   :  { %v793_v3 = vadd.f32 %v792_v2, %v5174_v42  ;;  %1671 = vmatpush1.bf16.msra.mxu0 %v4357_v58  ;;  %v861_v5 = vmax.f32 %v791_v63, 0.0  ;;  %v4395_v2 = vld [vmem:[#allocation7 + $0xf4] ss:$8 sps:$4 sm:$0xff]  }
 0x247   :  { %v796_v6 = vpop.f32.mrf.mxu1  ;;  %1672 = vmatprep.subr.bf16.mxu0 %v4362_v61 }
 0x248   :  { %v862_v9 = vmax.f32 %v793_v3, 0.0  ;;  %v922_v14 = vpack.c.bf16 %v861_v5, %v859_v10  ;;  %v797_v19 = vadd.f32 %v796_v6, %v5177_v43 }
 0x249   :  { %v798_v11 = vpop.f32.mrf.mxu1 }
 0x24a   :  { %v923_v12 = vpack.c.bf16 %v862_v9, %v860_v8  ;;  %1673 = vmatpush1.bf16.msra.mxu0 %v4360_v4  ;;  %v799_v17 = vadd.f32 %v798_v11, %v5174_v42  ;;  %v863_v30 = vmax.f32 %v797_v19, 0.0  ;;  %v4393_v8 = vld [vmem:[#allocation7 + $0xf0] ss:$8 sps:$4 sm:$0xff]   ;;  %v4398_v11 = vld [vmem:[#allocation7 + $0xe4] ss:$8 sps:$4 sm:$0xff]  }
 0x24b   :  { %v800_v15 = vpop.f32.mrf.mxu1  ;;  %1674 = vmatprep.subr.bf16.mxu0 %v4368_v7 }
 0x24c   :  { %v801_v18 = vadd.f32 %v800_v15, %v5177_v43  ;;  %1149 = vmatprep.mubr.bf16.mxu0 %v923_v12  ;;  %v864_v28 = vmax.f32 %v799_v17, 0.0  ;;  %v4396_v17 = vld [vmem:[#allocation7 + $0xe0] ss:$8 sps:$4 sm:$0xff]  }
 0x24d   :  { %v802_v27 = vpop.f32.mrf.mxu1  ;;  %1150 = vmatmul.mubr.bf16.gmra.mxu0 %v922_v14 }
 0x24e   :  { %v803_v20 = vadd.f32 %v802_v27, %v5174_v42  ;;  %1675 = vmatpush1.bf16.msra.mxu0 %v4366_v13  ;;  %v865_v21 = vmax.f32 %v801_v18, 0.0  ;;  %v4404_v27 = vld [vmem:[#allocation7 + $0xd4] ss:$8 sps:$4 sm:$0xff]  }
 0x24f   :  { %v806_v24 = vpop.f32.mrf.mxu1  ;;  %1676 = vmatprep.subr.bf16.mxu0 %v4371_v16 }
 0x250   :  { %v866_v29 = vmax.f32 %v803_v20, 0.0  ;;  %v924_v34 = vpack.c.bf16 %v865_v21, %v863_v30  ;;  %v807_v39 = vadd.f32 %v806_v24, %v5177_v43 }
 0x251   :  { %v808_v31 = vpop.f32.mrf.mxu1 }
 0x252   :  { %v925_v32 = vpack.c.bf16 %v866_v29, %v864_v28  ;;  %1677 = vmatpush1.bf16.msra.mxu0 %v4369_v26  ;;  %v809_v37 = vadd.f32 %v808_v31, %v5174_v42  ;;  %v867_v50 = vmax.f32 %v807_v39, 0.0  ;;  %v4402_v28 = vld [vmem:[#allocation7 + $0xd0] ss:$8 sps:$4 sm:$0xff]   ;;  %v4407_v31 = vld [vmem:[#allocation7 + $0xc4] ss:$8 sps:$4 sm:$0xff]  }
 0x253   :  { %v810_v35 = vpop.f32.mrf.mxu1  ;;  %1678 = vmatprep.subr.bf16.mxu0 %v4377_v25 }
 0x254   :  { %v811_v38 = vadd.f32 %v810_v35, %v5177_v43  ;;  %1159 = vmatprep.mubr.bf16.mxu0 %v925_v32  ;;  %v868_v48 = vmax.f32 %v809_v37, 0.0  ;;  %v4405_v37 = vld [vmem:[#allocation7 + $0xc0] ss:$8 sps:$4 sm:$0xff]  }
 0x255   :  { %v812_v40 = vpop.f32.mrf.mxu1  ;;  %1160 = vmatmul.mubr.bf16.gmra.mxu0 %v924_v34 }
 0x256   :  { %v813_v41 = vadd.f32 %v812_v40, %v5174_v42  ;;  %1679 = vmatpush1.bf16.msra.mxu0 %v4375_v33  ;;  %v869_v45 = vmax.f32 %v811_v38, 0.0  ;;  %v4413_v40 = vld [vmem:[#allocation7 + $0xb4] ss:$8 sps:$4 sm:$0xff]  }
 0x257   :  { %v816_v46 = vpop.f32.mrf.mxu1  ;;  %1680 = vmatprep.subr.bf16.mxu0 %v4380_v36 }
 0x258   :  { %v870_v49 = vmax.f32 %v813_v41, 0.0  ;;  %v926_v54 = vpack.c.bf16 %v869_v45, %v867_v50  ;;  %v817_v59 = vadd.f32 %v816_v46, %v5177_v43 }
 0x259   :  { %v818_v51 = vpop.f32.mrf.mxu1 }
 0x25a   :  { %v927_v52 = vpack.c.bf16 %v870_v49, %v868_v48  ;;  %1681 = vmatpush1.bf16.msra.mxu0 %v4378_v44  ;;  %v819_v57 = vadd.f32 %v818_v51, %v5174_v42  ;;  %v871_v5 = vmax.f32 %v817_v59, 0.0  ;;  %v4411_v48 = vld [vmem:[#allocation7 + $0xb0] ss:$8 sps:$4 sm:$0xff]  }
 0x25b   :  { %v820_v55 = vpop.f32.mrf.mxu1  ;;  %1682 = vmatprep.subr.bf16.mxu0 %v4386_v47 }
 0x25c   :  { %v821_v58 = vadd.f32 %v820_v55, %v5177_v43  ;;  %1169 = vmatprep.mubr.bf16.mxu0 %v927_v52  ;;  %v872_v3 = vmax.f32 %v819_v57, 0.0 }
 0x25d   :  { %v822_v60 = vpop.f32.mrf.mxu1  ;;  %1170 = vmatmul.mubr.bf16.gmra.mxu0 %v926_v54 }
 0x25e   :  { %v823_v61 = vadd.f32 %v822_v60, %v5174_v42  ;;  %1683 = vmatpush1.bf16.msra.mxu0 %v4384_v53  ;;  %v873_v63 = vmax.f32 %v821_v58, 0.0 }
 0x25f   :  { %v826_v1 = vpop.f32.mrf.mxu1  ;;  %1684 = vmatprep.subr.bf16.mxu0 %v4389_v56 }
 0x260   :  { %v874_v4 = vmax.f32 %v823_v61, 0.0  ;;  %v928_v9 = vpack.c.bf16 %v873_v63, %v871_v5  ;;  %v827_v14 = vadd.f32 %v826_v1, %v5177_v43  ;;  %v4414_v63 = vld [vmem:[#allocation7 + $0xa0] ss:$8 sps:$4 sm:$0xff]   ;;  %v4419_v1 = vld [vmem:[#allocation9 + $0x4] ss:$8 sps:$4 sm:$0xff]  }
 0x261   :  { %v828_v6 = vpop.f32.mrf.mxu1  ;;  %1411 = vmatprep.subr.bf16.mxu1 %v4419_v1  ;;  %v4423_v5 = vld [vmem:[#allocation7 + $0x80] ss:$8 sps:$4 sm:$0xff]  }
 0x262   :  { %v929_v7 = vpack.c.bf16 %v874_v4, %v872_v3  ;;  %1685 = vmatpush1.bf16.msra.mxu0 %v4387_v62  ;;  %v829_v12 = vadd.f32 %v828_v6, %v5174_v42  ;;  %v875_v21 = vmax.f32 %v827_v14, 0.0  ;;  %v4416_v62 = vld [vmem:[#allocation7 + $0xa4] ss:$8 sps:$4 sm:$0xff]   ;;  %v4420_v3 = vld [vmem:[#allocation7 + $0x90] ss:$8 sps:$4 sm:$0xff]  }
 0x263   :  { %v830_v10 = vpop.f32.mrf.mxu1  ;;  %1686 = vmatprep.subr.bf16.mxu0 %v4395_v2  ;;  %v4417_v2 = vld [vmem:[#allocation9] ss:$8 sps:$4 sm:$0xff]   ;;  %v4425_v4 = vld [vmem:[#allocation7 + $0x84] ss:$8 sps:$4 sm:$0xff]   ;;  %v4428_v14 = vld [vmem:[#allocation10 + $0x74] ss:$8 sps:$4 sm:$0xff]  }
 0x264   :  { %v831_v13 = vadd.f32 %v830_v10, %v5177_v43  ;;  %1179 = vmatprep.mubr.bf16.mxu0 %v929_v7  ;;  %v876_v20 = vmax.f32 %v829_v12, 0.0  ;;  %1412 = vmatpush1.bf16.msra.mxu1 %v4417_v2  ;;  %v4659_v6 = vld [vmem:[#allocation2 + $0x8] sm:$0xff]   ;;  %v4660_v7 = vld [vmem:[#allocation2 + $0x10] sm:$0xff]   ;;  %v4665_v12 = vld [vmem:[#allocation2 + $0x38] sm:$0xff]  }
 0x265   :  { %v832_v15 = vpop.f32.mrf.mxu1  ;;  %1180 = vmatmul.mubr.bf16.gmra.mxu0 %v928_v9  ;;  %v4662_v9 = vld [vmem:[#allocation2 + $0x20] sm:$0xff]   ;;  %v4663_v10 = vld [vmem:[#allocation2 + $0x28] sm:$0xff]   ;;  %2078 = vmatprep.subr.bf16.mxu1 %v4428_v14 }
 0x266   :  { %v833_v16 = vadd.f32 %v832_v15, %v5174_v42  ;;  %1687 = vmatpush2.bf16.msra.mxu0 %v4393_v8  ;;  %v877_v18 = vmax.f32 %v831_v13, 0.0  ;;  %v4661_v8 = vld [vmem:[#allocation2 + $0x18] sm:$0xff]   ;;  %v4431_v15 = vld [vmem:[#allocation10 + $0x64] ss:$8 sps:$4 sm:$0xff]  }
 0x267   :  { %v836_v19 = vpop.f32.mrf.mxu1  ;;  %1688 = vmatprep.subr.bf16.mxu0 %v4398_v11  ;;  %v4664_v11 = vld [vmem:[#allocation2 + $0x30] sm:$0xff]  }
 0x268   :  { %v878_v26 = vmax.f32 %v833_v16, 0.0  ;;  %v930_v29 = vpack.c.bf16 %v877_v18, %v875_v21  ;;  %v837_v34 = vadd.f32 %v836_v19, %v5177_v43  ;;  %v4426_v13 = vld [vmem:[#allocation10 + $0x70] ss:$8 sps:$4 sm:$0xff]   ;;  %v4429_v16 = vld [vmem:[#allocation10 + $0x60] ss:$8 sps:$4 sm:$0xff]  }
 0x269   :  { %v838_v24 = vpop.f32.mrf.mxu1  ;;  %v4432_v18 = vld [vmem:[#allocation10 + $0x50] ss:$8 sps:$4 sm:$0xff]   ;;  %v4437_v19 = vld [vmem:[#allocation10 + $0x44] ss:$8 sps:$4 sm:$0xff]  }
 0x26a   :  { %v931_v25 = vpack.c.bf16 %v878_v26, %v876_v20  ;;  %1689 = vmatpush2.bf16.msra.mxu0 %v4396_v17  ;;  %v839_v32 = vadd.f32 %v838_v24, %v5174_v42  ;;  %v879_v45 = vmax.f32 %v837_v34, 0.0  ;;  %v4434_v17 = vld [vmem:[#allocation10 + $0x54] ss:$8 sps:$4 sm:$0xff]   ;;  %v4438_v26 = vld [vmem:[#allocation10 + $0x30] ss:$8 sps:$4 sm:$0xff]  }
 0x26b   :  { %v840_v30 = vpop.f32.mrf.mxu1  ;;  %1690 = vmatprep.subr.bf16.mxu0 %v4404_v27  ;;  %v4435_v27 = vld [vmem:[#allocation10 + $0x40] ss:$8 sps:$4 sm:$0xff]   ;;  %v4440_v20 = vld [vmem:[#allocation10 + $0x34] ss:$8 sps:$4 sm:$0xff]   ;;  %v4443_v21 = vld [vmem:[#allocation10 + $0x24] ss:$8 sps:$4 sm:$0xff]  }
 0x26c   :  { %v841_v33 = vadd.f32 %v840_v30, %v5177_v43  ;;  %1189 = vmatprep.mubr.bf16.mxu0 %v931_v25  ;;  %v880_v41 = vmax.f32 %v839_v32, 0.0  ;;  %v4441_v24 = vld [vmem:[#allocation10 + $0x20] ss:$8 sps:$4 sm:$0xff]   ;;  %v4446_v25 = vld [vmem:[#allocation10 + $0x14] ss:$8 sps:$4 sm:$0xff]  }
 0x26d   :  { %v842_v35 = vpop.f32.mrf.mxu1  ;;  %1190 = vmatmul.mubr.bf16.gmra.mxu0 %v930_v29  ;;  %v4449_v29 = vld [vmem:[#allocation10 + $0x4] ss:$8 sps:$4 sm:$0xff]   ;;  %v4447_v30 = vld [vmem:[#allocation10] ss:$8 sps:$4 sm:$0xff]   ;;  %v4450_v32 = vld [vmem:[#allocation10 + $0xf0] ss:$8 sps:$4 sm:$0xff]  }
 0x26e   :  { %v843_v36 = vadd.f32 %v842_v35, %v5174_v42  ;;  %1691 = vmatpush2.bf16.msra.mxu0 %v4402_v28  ;;  %v881_v38 = vmax.f32 %v841_v33, 0.0  ;;  %v4444_v28 = vld [vmem:[#allocation10 + $0x10] ss:$8 sps:$4 sm:$0xff]   ;;  %v4455_v33 = vld [vmem:[#allocation10 + $0xe4] ss:$8 sps:$4 sm:$0xff]  }
 0x26f   :  { %v846_v39 = vpop.f32.mrf.mxu1  ;;  %1692 = vmatprep.subr.bf16.mxu0 %v4407_v31  ;;  %v4452_v31 = vld [vmem:[#allocation10 + $0xf4] ss:$8 sps:$4 sm:$0xff]   ;;  %v4453_v34 = vld [vmem:[#allocation10 + $0xe0] ss:$8 sps:$4 sm:$0xff]  }
 0x270   :  { %v882_v44 = vmax.f32 %v843_v36, 0.0  ;;  %v932_v49 = vpack.c.bf16 %v881_v38, %v879_v45  ;;  %v847_v53 = vadd.f32 %v846_v39, %v5177_v43  ;;  %v4458_v35 = vld [vmem:[#allocation10 + $0xd4] ss:$8 sps:$4 sm:$0xff]   ;;  %v4456_v36 = vld [vmem:[#allocation10 + $0xd0] ss:$8 sps:$4 sm:$0xff]  }
 0x271   :  { %v848_v46 = vpop.f32.mrf.mxu1  ;;  %v4459_v38 = vld [vmem:[#allocation10 + $0xc0] ss:$8 sps:$4 sm:$0xff]   ;;  %v4464_v39 = vld [vmem:[#allocation10 + $0xb4] ss:$8 sps:$4 sm:$0xff]  }
 0x272   :  { %v933_v47 = vpack.c.bf16 %v882_v44, %v880_v41  ;;  %1693 = vmatpush2.bf16.msra.mxu0 %v4405_v37  ;;  %v849_v51 = vadd.f32 %v848_v46, %v5174_v42  ;;  %v883_v59 = vmax.f32 %v847_v53, 0.0  ;;  %v4461_v37 = vld [vmem:[#allocation10 + $0xc4] ss:$8 sps:$4 sm:$0xff]   ;;  %v919_v41 = vld [vmem:[%s5743_s6] sm:$0x3] }
 0x273   :  { %v850_v50 = vpop.f32.mrf.mxu1  ;;  %1694 = vmatprep.subr.bf16.mxu0 %v4413_v40  ;;  %v4462_v40 = vld [vmem:[#allocation10 + $0xb0] ss:$8 sps:$4 sm:$0xff]   ;;  %v5222_v45 = vrot.slane %v919_v41, %v5124_v22  ;;  %v5225_v46 = vrot.slane %v919_v41, %v5126_v23 }
 0x274   :  { %v851_v52 = vadd.f32 %v850_v50, %v5177_v43  ;;  %1199 = vmatprep.mubr.bf16.mxu0 %v933_v47  ;;  %v884_v57 = vmax.f32 %v849_v51, 0.0  ;;  %v4422_v43 = vld [vmem:[#allocation7 + $0x94] ss:$8 sps:$4 sm:$0xff]  }
 0x275   :  { %v852_v54 = vpop.f32.mrf.mxu1  ;;  %1200 = vmatmul.mubr.bf16.gmra.mxu0 %v932_v49 }
 0x276   :  { %v853_v55 = vadd.f32 %v852_v54, %v5174_v42  ;;  %1695 = vmatpush2.bf16.msra.mxu0 %v4411_v48  ;;  %v885_v56 = vmax.f32 %v851_v52, 0.0  ;;  %v4658_v42 = vld [vmem:[#allocation2] sm:$0xff]  }
 0x277   :  { %1696 = vmatprep.subr.bf16.mxu0 %v4416_v62  ;;  %1430 = vmatmul.mubr.bf16.vlgmr.msra.gmra.mxu1 %v4658_v42 }
 0x278   :  { %v886_v58 = vmax.f32 %v853_v55, 0.0  ;;  %v934_v61 = vpack.c.bf16 %v885_v56, %v883_v59  ;;  %1439 = vmatprep.mubr.bf16.mxu1 %v4900_v0  ;;  %2079 = vmatpush1.bf16.msra.mxu1 %v4426_v13 }
 0x279   :  { %2080 = vmatprep.subr.bf16.mxu1 %v4431_v15 }
 0x27a   :  { %v935_v60 = vpack.c.bf16 %v886_v58, %v884_v57  ;;  %1697 = vmatpush2.bf16.msra.mxu0 %v4414_v63 }
 0x27b   :  { %1698 = vmatprep.subr.bf16.mxu0 %v4422_v43 }
 0x27c   :  { %1209 = vmatprep.mubr.bf16.mxu0 %v935_v60  ;;  %2081 = vmatpush1.bf16.msra.mxu1 %v4429_v16 }
 0x27d   :  { %1210 = vmatmul.mubr.bf16.gmra.mxu0 %v934_v61  ;;  %2082 = vmatprep.subr.bf16.mxu1 %v4434_v17 }
 0x27e   :  { %1699 = vmatpush2.bf16.msra.mxu0 %v4420_v3 }
 0x27f   :  { %1700 = vmatprep.subr.bf16.mxu0 %v4425_v4  ;;  %1440 = vmatmul.mubr.bf16.gmra.mxu1 %v4659_v6 }
 0x280   :  { %1449 = vmatprep.mubr.bf16.mxu1 %v4900_v0  ;;  %2083 = vmatpush1.bf16.msra.mxu1 %v4432_v18 }
 0x281   :  { %2084 = vmatprep.subr.bf16.mxu1 %v4437_v19 }
 0x282   :  { %1701 = vmatpush2.bf16.msra.mxu0 %v4423_v5 }
 0x284   :  { %2085 = vmatpush1.bf16.msra.mxu1 %v4435_v27 }
 0x285   :  { %2086 = vmatprep.subr.bf16.mxu1 %v4440_v20 }
 0x287   :  { %1450 = vmatmul.mubr.bf16.gmra.mxu1 %v4660_v7 }
 0x288   :  { %1459 = vmatprep.mubr.bf16.mxu1 %v4900_v0  ;;  %2087 = vmatpush1.bf16.msra.mxu1 %v4438_v26 }
 0x289   :  { %2088 = vmatprep.subr.bf16.mxu1 %v4443_v21 }
 0x28c   :  { %2089 = vmatpush1.bf16.msra.mxu1 %v4441_v24 }
 0x28d   :  { %2090 = vmatprep.subr.bf16.mxu1 %v4446_v25 }
 0x28f   :  { %1460 = vmatmul.mubr.bf16.gmra.mxu1 %v4661_v8 }
 0x290   :  { %1469 = vmatprep.mubr.bf16.mxu1 %v4900_v0  ;;  %2091 = vmatpush1.bf16.msra.mxu1 %v4444_v28 }
 0x291   :  { %2092 = vmatprep.subr.bf16.mxu1 %v4449_v29 }
 0x294   :  { %2093 = vmatpush1.bf16.msra.mxu1 %v4447_v30 }
 0x295   :  { %2094 = vmatprep.subr.bf16.mxu1 %v4452_v31 }
 0x297   :  { %1470 = vmatmul.mubr.bf16.gmra.mxu1 %v4662_v9 }
 0x298   :  { %1479 = vmatprep.mubr.bf16.mxu1 %v4900_v0  ;;  %2095 = vmatpush2.bf16.msra.mxu1 %v4450_v32 }
 0x299   :  { %2096 = vmatprep.subr.bf16.mxu1 %v4455_v33 }
 0x29c   :  { %2097 = vmatpush2.bf16.msra.mxu1 %v4453_v34 }
 0x29d   :  { %2098 = vmatprep.subr.bf16.mxu1 %v4458_v35 }
 0x29f   :  { %1480 = vmatmul.mubr.bf16.gmra.mxu1 %v4663_v10 }
 0x2a0   :  { %1489 = vmatprep.mubr.bf16.mxu1 %v4900_v0  ;;  %2099 = vmatpush2.bf16.msra.mxu1 %v4456_v36 }
 0x2a1   :  { %2100 = vmatprep.subr.bf16.mxu1 %v4461_v37 }
 0x2a4   :  { %2101 = vmatpush2.bf16.msra.mxu1 %v4459_v38 }
 0x2a5   :  { %2102 = vmatprep.subr.bf16.mxu1 %v4464_v39 }
 0x2a7   :  { %1490 = vmatmul.mubr.bf16.gmra.mxu1 %v4664_v11 }
 0x2a8   :  { %1499 = vmatprep.mubr.bf16.mxu1 %v4900_v0  ;;  %2103 = vmatpush2.bf16.msra.mxu1 %v4462_v40 }
 0x2af   :  { %1500 = vmatmul.mubr.bf16.gmra.mxu1 %v4665_v12 }
 0x305   :  { %v1141_v44 = vpop.f32.mrf.mxu0 }
 0x306   :  { %v1142_v51 = vadd.f32 %v1141_v44, %v5225_v46 }
 0x307   :  { %v1143_v47 = vpop.f32.mrf.mxu0 }
 0x308   :  { %v1144_v49 = vadd.f32 %v1143_v47, %v5222_v45  ;;  %v1220_v58 = vmax.f32 %v1142_v51, 0.0 }
 0x309   :  { %v1145_v48 = vpop.f32.mrf.mxu0 }
 0x30a   :  { %v1146_v50 = vadd.f32 %v1145_v48, %v5225_v46  ;;  %v1221_v56 = vmax.f32 %v1144_v49, 0.0 }
 0x30b   :  { %v1147_v52 = vpop.f32.mrf.mxu0 }
 0x30c   :  { %v1148_v53 = vadd.f32 %v1147_v52, %v5222_v45  ;;  %v1222_v54 = vmax.f32 %v1146_v50, 0.0 }
 0x30d   :  { %v1151_v55 = vpop.f32.mrf.mxu0 }
 0x30e   :  { %v1223_v57 = vmax.f32 %v1148_v53, 0.0  ;;  %v1301_v61 = vpack.c.bf16 %v1222_v54, %v1220_v58  ;;  %v1152_v2 = vadd.f32 %v1151_v55, %v5225_v46 }
 0x30f   :  { %v1153_v59 = vpop.f32.mrf.mxu0 }
 0x310   :  { %v1302_v60 = vpack.c.bf16 %v1223_v57, %v1221_v56  ;;  %v1154_v63 = vadd.f32 %v1153_v59, %v5222_v45  ;;  %v1224_v7 = vmax.f32 %v1152_v2, 0.0 }
 0x311   :  { %v1155_v62 = vpop.f32.mrf.mxu0 }
 0x312   :  { %v1156_v1 = vadd.f32 %v1155_v62, %v5225_v46  ;;  %1702 = vmatprep.mubr.bf16.mxu0 %v1302_v60  ;;  %v1225_v5 = vmax.f32 %v1154_v63, 0.0 }
 0x313   :  { %v1157_v43 = vpop.f32.mrf.mxu0  ;;  %1703 = vmatmul.mubr.bf16.vlgmr.msra.gmra.mxu0 %v1301_v61 }
 0x314   :  { %v1158_v3 = vadd.f32 %v1157_v43, %v5222_v45  ;;  %v1226_v42 = vmax.f32 %v1156_v1, 0.0 }
 0x315   :  { %v1161_v4 = vpop.f32.mrf.mxu0 }
 0x316   :  { %v1227_v6 = vmax.f32 %v1158_v3, 0.0  ;;  %v1303_v10 = vpack.c.bf16 %v1226_v42, %v1224_v7  ;;  %v1162_v14 = vadd.f32 %v1161_v4, %v5225_v46 }
 0x317   :  { %v1163_v8 = vpop.f32.mrf.mxu0 }
 0x318   :  { %v1304_v9 = vpack.c.bf16 %v1227_v6, %v1225_v5  ;;  %v1164_v12 = vadd.f32 %v1163_v8, %v5222_v45  ;;  %v1228_v20 = vmax.f32 %v1162_v14, 0.0 }
 0x319   :  { %v1165_v11 = vpop.f32.mrf.mxu0 }
 0x31a   :  { %v1166_v13 = vadd.f32 %v1165_v11, %v5225_v46  ;;  %1712 = vmatprep.mubr.bf16.mxu0 %v1304_v9  ;;  %v1229_v19 = vmax.f32 %v1164_v12, 0.0 }
 0x31b   :  { %v1167_v15 = vpop.f32.mrf.mxu0  ;;  %1713 = vmatmul.mubr.bf16.gmra.mxu0 %v1303_v10 }
 0x31c   :  { %v1168_v16 = vadd.f32 %v1167_v15, %v5222_v45  ;;  %v1230_v17 = vmax.f32 %v1166_v13, 0.0 }
 0x31d   :  { %v1171_v18 = vpop.f32.mrf.mxu0 }
 0x31e   :  { %v1231_v27 = vmax.f32 %v1168_v16, 0.0  ;;  %v1305_v24 = vpack.c.bf16 %v1230_v17, %v1228_v20  ;;  %v1172_v30 = vadd.f32 %v1171_v18, %v5225_v46 }
 0x31f   :  { %v1173_v26 = vpop.f32.mrf.mxu0 }
 0x320   :  { %v1306_v21 = vpack.c.bf16 %v1231_v27, %v1229_v19  ;;  %v1174_v28 = vadd.f32 %v1173_v26, %v5222_v45  ;;  %v1232_v37 = vmax.f32 %v1172_v30, 0.0 }
 0x321   :  { %v1175_v25 = vpop.f32.mrf.mxu0 }
 0x322   :  { %v1176_v29 = vadd.f32 %v1175_v25, %v5225_v46  ;;  %1722 = vmatprep.mubr.bf16.mxu0 %v1306_v21  ;;  %v1233_v35 = vmax.f32 %v1174_v28, 0.0 }
 0x323   :  { %v1177_v31 = vpop.f32.mrf.mxu0  ;;  %1723 = vmatmul.mubr.bf16.gmra.mxu0 %v1305_v24 }
 0x324   :  { %v1178_v32 = vadd.f32 %v1177_v31, %v5222_v45  ;;  %v1234_v33 = vmax.f32 %v1176_v29, 0.0 }
 0x325   :  { %v1181_v34 = vpop.f32.mrf.mxu0 }
 0x326   :  { %v1235_v36 = vmax.f32 %v1178_v32, 0.0  ;;  %v1307_v40 = vpack.c.bf16 %v1234_v33, %v1232_v37  ;;  %v1182_v48 = vadd.f32 %v1181_v34, %v5225_v46  ;;  %v4465_v37 = vld [vmem:[#allocation10 + $0xa0] ss:$8 sps:$4 sm:$0xff]  }
 0x327   :  { %v1183_v38 = vpop.f32.mrf.mxu0 }
 0x328   :  { %v1308_v39 = vpack.c.bf16 %v1235_v36, %v1233_v35  ;;  %v1184_v44 = vadd.f32 %v1183_v38, %v5222_v45  ;;  %v1236_v55 = vmax.f32 %v1182_v48, 0.0  ;;  %v4467_v36 = vld [vmem:[#allocation10 + $0xa4] ss:$8 sps:$4 sm:$0xff]   ;;  %v4470_v38 = vld [vmem:[#allocation10 + $0x94] ss:$8 sps:$4 sm:$0xff]  }
 0x329   :  { %v1185_v41 = vpop.f32.mrf.mxu0  ;;  %2104 = vmatprep.subr.bf16.mxu1 %v4467_v36  ;;  %v4479_v48 = vld [vmem:[#allocation12 + $0x64] ss:$8 sps:$4 sm:$0xff]  }
 0x32a   :  { %v1186_v47 = vadd.f32 %v1185_v41, %v5225_v46  ;;  %1732 = vmatprep.mubr.bf16.mxu0 %v1308_v39  ;;  %v1237_v53 = vmax.f32 %v1184_v44, 0.0  ;;  %2105 = vmatpush2.bf16.msra.mxu1 %v4465_v37  ;;  %v4468_v39 = vld [vmem:[#allocation10 + $0x90] ss:$8 sps:$4 sm:$0xff]  }
 0x32b   :  { %v1187_v49 = vpop.f32.mrf.mxu0  ;;  %1733 = vmatmul.mubr.bf16.gmra.mxu0 %v1307_v40  ;;  %2106 = vmatprep.subr.bf16.mxu1 %v4470_v38  ;;  %v4471_v40 = vld [vmem:[#allocation10 + $0x80] ss:$8 sps:$4 sm:$0xff]   ;;  %v4474_v44 = vld [vmem:[#allocation12 + $0x70] ss:$8 sps:$4 sm:$0xff]  }
 0x32c   :  { %v1188_v50 = vadd.f32 %v1187_v49, %v5222_v45  ;;  %v1238_v51 = vmax.f32 %v1186_v47, 0.0  ;;  %v4476_v47 = vld [vmem:[#allocation12 + $0x74] ss:$8 sps:$4 sm:$0xff]  }
 0x32d   :  { %v1191_v52 = vpop.f32.mrf.mxu0  ;;  %2443 = vmatprep.subr.bf16.mxu0 %v4476_v47 }
 0x32e   :  { %v1239_v54 = vmax.f32 %v1188_v50, 0.0  ;;  %v1309_v58 = vpack.c.bf16 %v1238_v51, %v1236_v55  ;;  %v1192_v62 = vadd.f32 %v1191_v52, %v5225_v46  ;;  %2107 = vmatpush2.bf16.msra.mxu1 %v4468_v39  ;;  %2444 = vmatpush1.bf16.msra.mxu0 %v4474_v44  ;;  %v4477_v50 = vld [vmem:[#allocation12 + $0x60] ss:$8 sps:$4 sm:$0xff]   ;;  %v4482_v51 = vld [vmem:[#allocation12 + $0x54] ss:$8 sps:$4 sm:$0xff]  }
 0x32f   :  { %v1193_v56 = vpop.f32.mrf.mxu0  ;;  %2445 = vmatprep.subr.bf16.mxu0 %v4479_v48 }
 0x330   :  { %v1310_v57 = vpack.c.bf16 %v1239_v54, %v1237_v53  ;;  %v1194_v60 = vadd.f32 %v1193_v56, %v5222_v45  ;;  %v1240_v4 = vmax.f32 %v1192_v62, 0.0  ;;  %v4480_v53 = vld [vmem:[#allocation12 + $0x50] ss:$8 sps:$4 sm:$0xff]   ;;  %v4485_v54 = vld [vmem:[#allocation12 + $0x44] ss:$8 sps:$4 sm:$0xff]  }
 0x331   :  { %v1195_v59 = vpop.f32.mrf.mxu0  ;;  %v4483_v56 = vld [vmem:[#allocation12 + $0x40] ss:$8 sps:$4 sm:$0xff]  }
 0x332   :  { %v1196_v61 = vadd.f32 %v1195_v59, %v5225_v46  ;;  %1742 = vmatprep.mubr.bf16.mxu0 %v1310_v57  ;;  %v1241_v3 = vmax.f32 %v1194_v60, 0.0  ;;  %2446 = vmatpush1.bf16.msra.mxu0 %v4477_v50  ;;  %v4488_v57 = vld [vmem:[#allocation12 + $0x34] ss:$8 sps:$4 sm:$0xff]   ;;  %v4486_v59 = vld [vmem:[#allocation12 + $0x30] ss:$8 sps:$4 sm:$0xff]  }
 0x333   :  { %v1197_v63 = vpop.f32.mrf.mxu0  ;;  %1743 = vmatmul.mubr.bf16.gmra.mxu0 %v1309_v58  ;;  %2447 = vmatprep.subr.bf16.mxu0 %v4482_v51  ;;  %v4491_v60 = vld [vmem:[#allocation12 + $0x24] ss:$8 sps:$4 sm:$0xff]   ;;  %v4489_v62 = vld [vmem:[#allocation12 + $0x20] ss:$8 sps:$4 sm:$0xff]  }
 0x334   :  { %v1198_v1 = vadd.f32 %v1197_v63, %v5222_v45  ;;  %v1242_v2 = vmax.f32 %v1196_v61, 0.0  ;;  %v4494_v63 = vld [vmem:[#allocation12 + $0x14] ss:$8 sps:$4 sm:$0xff]  }
 0x335   :  { %v1201_v43 = vpop.f32.mrf.mxu0 }
 0x336   :  { %v1243_v42 = vmax.f32 %v1198_v1, 0.0  ;;  %v1311_v7 = vpack.c.bf16 %v1242_v2, %v1240_v4  ;;  %v1202_v11 = vadd.f32 %v1201_v43, %v5225_v46  ;;  %2448 = vmatpush1.bf16.msra.mxu0 %v4480_v53  ;;  %v4492_v2 = vld [vmem:[#allocation12 + $0x10] ss:$8 sps:$4 sm:$0xff]   ;;  %v4497_v43 = vld [vmem:[#allocation12 + $0x4] ss:$8 sps:$4 sm:$0xff]  }
 0x337   :  { %v1203_v5 = vpop.f32.mrf.mxu0  ;;  %2449 = vmatprep.subr.bf16.mxu0 %v4485_v54  ;;  %v4500_v4 = vld [vmem:[#allocation12 + $0xf4] ss:$8 sps:$4 sm:$0xff]  }
 0x338   :  { %v1312_v6 = vpack.c.bf16 %v1243_v42, %v1241_v3  ;;  %v1204_v9 = vadd.f32 %v1203_v5, %v5222_v45  ;;  %v1244_v18 = vmax.f32 %v1202_v11, 0.0  ;;  %v4495_v42 = vld [vmem:[#allocation12] ss:$8 sps:$4 sm:$0xff]  }
 0x339   :  { %v1205_v8 = vpop.f32.mrf.mxu0 }
 0x33a   :  { %v1206_v10 = vadd.f32 %v1205_v8, %v5225_v46  ;;  %1752 = vmatprep.mubr.bf16.mxu0 %v1312_v6  ;;  %v1245_v16 = vmax.f32 %v1204_v9, 0.0  ;;  %2450 = vmatpush1.bf16.msra.mxu0 %v4483_v56  ;;  %v4498_v6 = vld [vmem:[#allocation12 + $0xf0] ss:$8 sps:$4 sm:$0xff]   ;;  %v4501_v9 = vld [vmem:[#allocation12 + $0xe0] ss:$8 sps:$4 sm:$0xff]  }
 0x33b   :  { %v1207_v12 = vpop.f32.mrf.mxu0  ;;  %1753 = vmatmul.mubr.bf16.gmra.mxu0 %v1311_v7  ;;  %2451 = vmatprep.subr.bf16.mxu0 %v4488_v57  ;;  %v4503_v7 = vld [vmem:[#allocation12 + $0xe4] ss:$8 sps:$4 sm:$0xff]  }
 0x33c   :  { %v1208_v13 = vadd.f32 %v1207_v12, %v5222_v45  ;;  %v1246_v14 = vmax.f32 %v1206_v10, 0.0  ;;  %v4506_v10 = vld [vmem:[#allocation12 + $0xd4] ss:$8 sps:$4 sm:$0xff]   ;;  %v4504_v12 = vld [vmem:[#allocation12 + $0xd0] ss:$8 sps:$4 sm:$0xff]  }
 0x33d   :  { %v1211_v15 = vpop.f32.mrf.mxu0 }
 0x33e   :  { %v1247_v17 = vmax.f32 %v1208_v13, 0.0  ;;  %v1313_v20 = vpack.c.bf16 %v1246_v14, %v1244_v18  ;;  %v1212_v25 = vadd.f32 %v1211_v15, %v5225_v46  ;;  %2452 = vmatpush1.bf16.msra.mxu0 %v4486_v59  ;;  %v4509_v13 = vld [vmem:[#allocation12 + $0xc4] ss:$8 sps:$4 sm:$0xff]   ;;  %v4507_v15 = vld [vmem:[#allocation12 + $0xc0] ss:$8 sps:$4 sm:$0xff]  }
 0x33f   :  { %v1213_v19 = vpop.f32.mrf.mxu0  ;;  %2453 = vmatprep.subr.bf16.mxu0 %v4491_v60  ;;  %v4510_v18 = vld [vmem:[#allocation12 + $0xb0] ss:$8 sps:$4 sm:$0xff]  }
 0x340   :  { %v1314_v27 = vpack.c.bf16 %v1247_v17, %v1245_v16  ;;  %v1214_v21 = vadd.f32 %v1213_v19, %v5222_v45  ;;  %v1248_v33 = vmax.f32 %v1212_v25, 0.0  ;;  %v4512_v16 = vld [vmem:[#allocation12 + $0xb4] ss:$8 sps:$4 sm:$0xff]  }
 0x341   :  { %v1215_v26 = vpop.f32.mrf.mxu0 }
 0x342   :  { %v1216_v24 = vadd.f32 %v1215_v26, %v5225_v46  ;;  %1762 = vmatprep.mubr.bf16.mxu0 %v1314_v27  ;;  %v1249_v31 = vmax.f32 %v1214_v21, 0.0  ;;  %v4473_v46 = vld [vmem:[#allocation10 + $0x84] ss:$8 sps:$4 sm:$0xff]   ;;  %2454 = vmatpush1.bf16.msra.mxu0 %v4489_v62  ;;  %v1300_v26 = vld [vmem:[%s5746_s9] sm:$0x3] }
 0x343   :  { %v1217_v28 = vpop.f32.mrf.mxu0  ;;  %1763 = vmatmul.mubr.bf16.gmra.mxu0 %v1313_v20  ;;  %2108 = vmatprep.subr.bf16.mxu1 %v4473_v46 }
 0x344   :  { %v1218_v29 = vadd.f32 %v1217_v28, %v5222_v45  ;;  %v1250_v30 = vmax.f32 %v1216_v24, 0.0  ;;  %2109 = vmatpush2.bf16.msra.mxu1 %v4471_v40  ;;  %v5259_v45 = vpop.f32.mrf.mxu1  ;;  %2455 = vmatprep.subr.bf16.mxu0 %v4494_v63  ;;  %v5298_v28 = vrot.slane %v1300_v26, %v5124_v22 }
 0x346   :  { %v1251_v32 = vmax.f32 %v1218_v29, 0.0  ;;  %v1315_v35 = vpack.c.bf16 %v1250_v30, %v1248_v33  ;;  %v5261_v41 = vpop.f32.mrf.mxu1  ;;  %2456 = vmatpush1.bf16.msra.mxu0 %v4492_v2  ;;  %v5302_v30 = vrot.slane %v1300_v26, %v5126_v23 }
 0x347   :  { %2457 = vmatprep.subr.bf16.mxu0 %v4497_v43 }
 0x348   :  { %v1316_v34 = vpack.c.bf16 %v1251_v32, %v1249_v31  ;;  %v5263_v49 = vpop.f32.mrf.mxu1 }
 0x34a   :  { %1772 = vmatprep.mubr.bf16.mxu0 %v1316_v34  ;;  %v5265_v52 = vpop.f32.mrf.mxu1  ;;  %2458 = vmatpush1.bf16.msra.mxu0 %v4495_v42 }
 0x34b   :  { %1773 = vmatmul.mubr.bf16.gmra.mxu0 %v1315_v35  ;;  %2459 = vmatprep.subr.bf16.mxu0 %v4500_v4 }
 0x34c   :  { %v5267_v55 = vpop.f32.mrf.mxu1 }
 0x34e   :  { %v5269_v58 = vpop.f32.mrf.mxu1  ;;  %2460 = vmatpush2.bf16.msra.mxu0 %v4498_v6 }
 0x34f   :  { %2461 = vmatprep.subr.bf16.mxu0 %v4503_v7 }
 0x350   :  { %v5271_v61 = vpop.f32.mrf.mxu1 }
 0x352   :  { %v5273_v1 = vpop.f32.mrf.mxu1  ;;  %2462 = vmatpush2.bf16.msra.mxu0 %v4501_v9 }
 0x353   :  { %2463 = vmatprep.subr.bf16.mxu0 %v4506_v10 }
 0x354   :  { %v5275_v3 = vpop.f32.mrf.mxu1 }
 0x356   :  { %v5277_v5 = vpop.f32.mrf.mxu1  ;;  %2464 = vmatpush2.bf16.msra.mxu0 %v4504_v12 }
 0x357   :  { %2465 = vmatprep.subr.bf16.mxu0 %v4509_v13 }
 0x358   :  { %v5279_v8 = vpop.f32.mrf.mxu1 }
 0x35a   :  { %v5281_v11 = vpop.f32.mrf.mxu1  ;;  %2466 = vmatpush2.bf16.msra.mxu0 %v4507_v15 }
 0x35b   :  { %2467 = vmatprep.subr.bf16.mxu0 %v4512_v16 }
 0x35c   :  { %v5283_v14 = vpop.f32.mrf.mxu1 }
 0x35e   :  { %v5285_v17 = vpop.f32.mrf.mxu1  ;;  %2468 = vmatpush2.bf16.msra.mxu0 %v4510_v18 }
 0x360   :  { %v5287_v19 = vpop.f32.mrf.mxu1 }
 0x362   :  { %v5289_v27 = vpop.f32.mrf.mxu1 }
 0x364   :  { %v5294_v24 = vpop.f32.mrf.mxu1 }
 0x366   :  { %v5305_v34 = vpop.f32.mrf.mxu1 }
 0x3d3   :  { %v1704_v20 = vpop.f32.mrf.mxu0 }
 0x3d4   :  { %v1705_v29 = vadd.f32 %v1704_v20, %v5259_v45 }
 0x3d5   :  { %v1706_v21 = vpop.f32.mrf.mxu0 }
 0x3d6   :  { %v1707_v25 = vadd.f32 %v1706_v21, %v5261_v41  ;;  %v1794_v38 = vadd.f32 %v5302_v30, %v1705_v29  ;;  %v5312_v41 = vpop.f32.mrf.mxu1 }
 0x3d7   :  { %v1708_v31 = vpop.f32.mrf.mxu0 }
 0x3d8   :  { %v1709_v32 = vadd.f32 %v1708_v31, %v5263_v49  ;;  %v1795_v35 = vadd.f32 %v5298_v28, %v1707_v25  ;;  %v1826_v49 = vmax.f32 %v1794_v38, 0.0  ;;  %v5317_v57 = vpop.f32.mrf.mxu1 }
 0x3d9   :  { %v1710_v33 = vpop.f32.mrf.mxu0 }
 0x3da   :  { %v1796_v36 = vadd.f32 %v5302_v30, %v1709_v32  ;;  %v1711_v37 = vadd.f32 %v1710_v33, %v5265_v52  ;;  %v1827_v44 = vmax.f32 %v1795_v35, 0.0  ;;  %v5324_v43 = vpop.f32.mrf.mxu1 }
 0x3db   :  { %v1714_v39 = vpop.f32.mrf.mxu0 }
 0x3dc   :  { %v1797_v46 = vadd.f32 %v5298_v28, %v1711_v37  ;;  %v1828_v40 = vmax.f32 %v1796_v36, 0.0  ;;  %v1715_v50 = vadd.f32 %v1714_v39, %v5267_v55  ;;  %v1483_v16 = vpop.f32.mrf.mxu1 }
 0x3dd   :  { %v1716_v45 = vpop.f32.mrf.mxu0 }
 0x3de   :  { %v1829_v47 = vmax.f32 %v1797_v46, 0.0  ;;  %v1717_v48 = vadd.f32 %v1716_v45, %v5269_v58  ;;  %v1891_v54 = vpack.c.bf16 %v1828_v40, %v1826_v49  ;;  %v1798_v58 = vadd.f32 %v5302_v30, %v1715_v50 }
 0x3df   :  { %v1718_v51 = vpop.f32.mrf.mxu0 }
 0x3e0   :  { %v1719_v53 = vadd.f32 %v1718_v51, %v5271_v61  ;;  %v1892_v52 = vpack.c.bf16 %v1829_v47, %v1827_v44  ;;  %v1799_v59 = vadd.f32 %v5298_v28, %v1717_v48  ;;  %v1830_v7 = vmax.f32 %v1798_v58, 0.0 }
 0x3e1   :  { %v1720_v56 = vpop.f32.mrf.mxu0 }
 0x3e2   :  { %v1800_v60 = vadd.f32 %v5302_v30, %v1719_v53  ;;  %v1721_v62 = vadd.f32 %v1720_v56, %v5273_v1  ;;  %2110 = vmatprep.mubr.bf16.mxu1 %v1892_v52  ;;  %v1831_v42 = vmax.f32 %v1799_v59, 0.0 }
 0x3e3   :  { %v1724_v63 = vpop.f32.mrf.mxu0  ;;  %2111 = vmatmul.mubr.bf16.vlgmr.msra.gmra.mxu1 %v1891_v54 }
 0x3e4   :  { %v1801_v55 = vadd.f32 %v5298_v28, %v1721_v62  ;;  %v1832_v2 = vmax.f32 %v1800_v60, 0.0  ;;  %v1725_v9 = vadd.f32 %v1724_v63, %v5275_v3 }
 0x3e5   :  { %v1726_v61 = vpop.f32.mrf.mxu0 }
 0x3e6   :  { %v1833_v4 = vmax.f32 %v1801_v55, 0.0  ;;  %v1727_v6 = vadd.f32 %v1726_v61, %v5277_v5  ;;  %v1893_v15 = vpack.c.bf16 %v1832_v2, %v1830_v7  ;;  %v1802_v21 = vadd.f32 %v5302_v30, %v1725_v9 }
 0x3e7   :  { %v1728_v10 = vpop.f32.mrf.mxu0 }
 0x3e8   :  { %v1729_v1 = vadd.f32 %v1728_v10, %v5279_v8  ;;  %v1894_v12 = vpack.c.bf16 %v1833_v4, %v1831_v42  ;;  %v1803_v18 = vadd.f32 %v5298_v28, %v1727_v6  ;;  %v1485_v8 = vpop.f32.mrf.mxu1  ;;  %v1834_v35 = vmax.f32 %v1802_v21, 0.0 }
 0x3e9   :  { %v1730_v13 = vpop.f32.mrf.mxu0 }
 0x3ea   :  { %v1804_v20 = vadd.f32 %v5302_v30, %v1729_v1  ;;  %v1731_v26 = vadd.f32 %v1730_v13, %v5281_v11  ;;  %2120 = vmatprep.mubr.bf16.mxu1 %v1894_v12  ;;  %v1835_v31 = vmax.f32 %v1803_v18, 0.0  ;;  %v1487_v40 = vpop.f32.mrf.mxu1 }
 0x3eb   :  { %v1734_v5 = vpop.f32.mrf.mxu0  ;;  %2121 = vmatmul.mubr.bf16.gmra.mxu1 %v1893_v15 }
 0x3ec   :  { %v1805_v3 = vadd.f32 %v5298_v28, %v1731_v26  ;;  %v1836_v25 = vmax.f32 %v1804_v20, 0.0  ;;  %v1735_v36 = vadd.f32 %v1734_v5, %v5283_v14 }
 0x3ed   :  { %v1736_v29 = vpop.f32.mrf.mxu0 }
 0x3ee   :  { %v1837_v32 = vmax.f32 %v1805_v3, 0.0  ;;  %v1737_v33 = vadd.f32 %v1736_v29, %v5285_v17  ;;  %v1895_v46 = vpack.c.bf16 %v1836_v25, %v1834_v35  ;;  %v1806_v48 = vadd.f32 %v5302_v30, %v1735_v36 }
 0x3ef   :  { %v1738_v37 = vpop.f32.mrf.mxu0 }
 0x3f0   :  { %v1739_v11 = vadd.f32 %v1738_v37, %v5287_v19  ;;  %v1896_v38 = vpack.c.bf16 %v1837_v32, %v1835_v31  ;;  %v1807_v45 = vadd.f32 %v5298_v28, %v1737_v33  ;;  %v1491_v19 = vpop.f32.mrf.mxu1  ;;  %v1838_v54 = vmax.f32 %v1806_v48, 0.0 }
 0x3f1   :  { %v1740_v39 = vpop.f32.mrf.mxu0 }
 0x3f2   :  { %v1808_v44 = vadd.f32 %v5302_v30, %v1739_v11  ;;  %v1741_v47 = vadd.f32 %v1740_v39, %v5289_v27  ;;  %2130 = vmatprep.mubr.bf16.mxu1 %v1896_v38  ;;  %v1839_v51 = vmax.f32 %v1807_v45, 0.0  ;;  %v1493_v63 = vpop.f32.mrf.mxu1 }
 0x3f3   :  { %v1744_v17 = vpop.f32.mrf.mxu0  ;;  %2131 = vmatmul.mubr.bf16.gmra.mxu1 %v1895_v46 }
 0x3f4   :  { %v1809_v14 = vadd.f32 %v5298_v28, %v1741_v47  ;;  %v1840_v49 = vmax.f32 %v1808_v44, 0.0  ;;  %v1745_v56 = vadd.f32 %v1744_v17, %v5294_v24 }
 0x3f5   :  { %v1746_v50 = vpop.f32.mrf.mxu0 }
 0x3f6   :  { %v1841_v53 = vmax.f32 %v1809_v14, 0.0  ;;  %v1747_v52 = vadd.f32 %v1746_v50, %v5305_v34  ;;  %v1897_v58 = vpack.c.bf16 %v1840_v49, %v1838_v54  ;;  %v1810_v42 = vadd.f32 %v5302_v30, %v1745_v56 }
 0x3f7   :  { %v1748_v59 = vpop.f32.mrf.mxu0 }
 0x3f8   :  { %v1749_v27 = vadd.f32 %v1748_v59, %v5312_v41  ;;  %v1898_v60 = vpack.c.bf16 %v1841_v53, %v1839_v51  ;;  %v1811_v55 = vadd.f32 %v5298_v28, %v1747_v52  ;;  %v1495_v41 = vpop.f32.mrf.mxu1  ;;  %v1842_v1 = vmax.f32 %v1810_v42, 0.0 }
 0x3f9   :  { %v1750_v62 = vpop.f32.mrf.mxu0 }
 0x3fa   :  { %v1812_v2 = vadd.f32 %v5302_v30, %v1749_v27  ;;  %v1751_v61 = vadd.f32 %v1750_v62, %v5317_v57  ;;  %2140 = vmatprep.mubr.bf16.mxu1 %v1898_v60  ;;  %v1843_v7 = vmax.f32 %v1811_v55, 0.0  ;;  %v1497_v20 = vpop.f32.mrf.mxu1 }
 0x3fb   :  { %v1754_v34 = vpop.f32.mrf.mxu0  ;;  %2141 = vmatmul.mubr.bf16.gmra.mxu1 %v1897_v58 }
 0x3fc   :  { %v1813_v24 = vadd.f32 %v5298_v28, %v1751_v61  ;;  %v1844_v4 = vmax.f32 %v1812_v2, 0.0  ;;  %v1755_v12 = vadd.f32 %v1754_v34, %v5324_v43  ;;  %v1501_v43 = vpop.f32.mrf.mxu1 }
 0x3fd   :  { %v1756_v6 = vpop.f32.mrf.mxu0 }
 0x3fe   :  { %v1845_v9 = vmax.f32 %v1813_v24, 0.0  ;;  %v1757_v10 = vadd.f32 %v1756_v6, %v1483_v16  ;;  %v1899_v26 = vpack.c.bf16 %v1844_v4, %v1842_v1  ;;  %v1814_v25 = vadd.f32 %v5302_v30, %v1755_v12  ;;  %v1503_v46 = vpop.f32.mrf.mxu1  ;;  %v4515_v1 = vld [vmem:[#allocation12 + $0xa4] ss:$8 sps:$4 sm:$0xff]   ;;  %v4513_v12 = vld [vmem:[#allocation12 + $0xa0] ss:$8 sps:$4 sm:$0xff]  }
 0x3ff   :  { %v1758_v13 = vpop.f32.mrf.mxu0  ;;  %2469 = vmatprep.subr.bf16.mxu0 %v4515_v1 }
 0x400   :  { %v1759_v15 = vadd.f32 %v1758_v13, %v1485_v8  ;;  %v1900_v18 = vpack.c.bf16 %v1845_v9, %v1843_v7  ;;  %v1815_v21 = vadd.f32 %v5298_v28, %v1757_v10  ;;  %v1846_v36 = vmax.f32 %v1814_v25, 0.0  ;;  %2470 = vmatpush2.bf16.msra.mxu0 %v4513_v12  ;;  %v4518_v13 = vld [vmem:[#allocation12 + $0x94] ss:$8 sps:$4 sm:$0xff]   ;;  %v4551_v25 = vld [vmem:[#allocation15 + $0x44] ss:$8 sps:$4 sm:$0xff]  }
 0x401   :  { %v1760_v57 = vpop.f32.mrf.mxu0  ;;  %2471 = vmatprep.subr.bf16.mxu0 %v4518_v13 }
 0x402   :  { %v1816_v5 = vadd.f32 %v5302_v30, %v1759_v15  ;;  %v1761_v3 = vadd.f32 %v1760_v57, %v1487_v40  ;;  %2150 = vmatprep.mubr.bf16.mxu1 %v1900_v18  ;;  %v1847_v8 = vmax.f32 %v1815_v21, 0.0  ;;  %v4516_v15 = vld [vmem:[#allocation12 + $0x90] ss:$8 sps:$4 sm:$0xff]   ;;  %v4524_v57 = vld [vmem:[#allocation15 + $0x74] ss:$8 sps:$4 sm:$0xff]  }
 0x403   :  { %v1764_v29 = vpop.f32.mrf.mxu0  ;;  %2151 = vmatmul.mubr.bf16.gmra.mxu1 %v1899_v26  ;;  %v4522_v18 = vld [vmem:[#allocation15 + $0x70] ss:$8 sps:$4 sm:$0xff]   ;;  %2733 = vmatprep.subr.bf16.mxu1 %v4524_v57  ;;  %v4533_v26 = vld [vmem:[#allocation15 + $0x64] ss:$8 sps:$4 sm:$0xff]   ;;  %v4531_v21 = vld [vmem:[#allocation15 + $0x60] ss:$8 sps:$4 sm:$0xff]  }
 0x404   :  { %v1817_v16 = vadd.f32 %v5298_v28, %v1761_v3  ;;  %v1848_v31 = vmax.f32 %v1816_v5, 0.0  ;;  %v1765_v37 = vadd.f32 %v1764_v29, %v1491_v19  ;;  %v1505_v19 = vpop.f32.mrf.mxu1  ;;  %2472 = vmatpush2.bf16.msra.mxu0 %v4516_v15  ;;  %2734 = vmatpush1.bf16.msra.mxu1 %v4522_v18  ;;  %v4542_v5 = vld [vmem:[#allocation15 + $0x54] ss:$8 sps:$4 sm:$0xff]   ;;  %v4540_v3 = vld [vmem:[#allocation15 + $0x50] ss:$8 sps:$4 sm:$0xff]  }
 0x405   :  { %v1766_v32 = vpop.f32.mrf.mxu0  ;;  %2735 = vmatprep.subr.bf16.mxu1 %v4533_v26  ;;  %v4549_v29 = vld [vmem:[#allocation15 + $0x40] ss:$8 sps:$4 sm:$0xff]  }
 0x406   :  { %v1849_v33 = vmax.f32 %v1817_v16, 0.0  ;;  %v1767_v35 = vadd.f32 %v1766_v32, %v1493_v63  ;;  %v1901_v45 = vpack.c.bf16 %v1848_v31, %v1846_v36  ;;  %v1818_v17 = vadd.f32 %v5302_v30, %v1765_v37  ;;  %v1507_v58 = vpop.f32.mrf.mxu1  ;;  %v4560_v16 = vld [vmem:[#allocation15 + $0x34] ss:$8 sps:$4 sm:$0xff]   ;;  %v4558_v31 = vld [vmem:[#allocation15 + $0x30] ss:$8 sps:$4 sm:$0xff]  }
 0x407   :  { %v1768_v11 = vpop.f32.mrf.mxu0  ;;  %v4567_v32 = vld [vmem:[#allocation15 + $0x20] ss:$8 sps:$4 sm:$0xff]  }
 0x408   :  { %v1769_v38 = vadd.f32 %v1768_v11, %v1495_v41  ;;  %v1902_v39 = vpack.c.bf16 %v1849_v33, %v1847_v8  ;;  %v1819_v44 = vadd.f32 %v5298_v28, %v1767_v35  ;;  %v1850_v56 = vmax.f32 %v1818_v17, 0.0  ;;  %2736 = vmatpush1.bf16.msra.mxu1 %v4531_v21  ;;  %v4578_v8 = vld [vmem:[#allocation15 + $0x14] ss:$8 sps:$4 sm:$0xff]   ;;  %v4576_v33 = vld [vmem:[#allocation15 + $0x10] ss:$8 sps:$4 sm:$0xff]  }
 0x409   :  { %v1770_v40 = vpop.f32.mrf.mxu0  ;;  %2737 = vmatprep.subr.bf16.mxu1 %v4542_v5  ;;  %v1890_v35 = vld [vmem:[%s5748_s11] sm:$0x3] }
 0x40a   :  { %v1820_v47 = vadd.f32 %v5302_v30, %v1769_v38  ;;  %v1771_v48 = vadd.f32 %v1770_v40, %v1497_v20  ;;  %2160 = vmatprep.mubr.bf16.mxu1 %v1902_v39  ;;  %v1851_v53 = vmax.f32 %v1819_v44, 0.0  ;;  %v4527_v20 = vld [vmem:[#allocation13 + $0x74] ss:$8 sps:$4 sm:$0xff]   ;;  %v5368_v37 = vrot.slane %v1890_v35, %v5124_v22 }
 0x40b   :  { %v1774_v14 = vpop.f32.mrf.mxu0  ;;  %2161 = vmatmul.mubr.bf16.gmra.mxu1 %v1901_v45  ;;  %v5371_v11 = vrot.slane %v1890_v35, %v5126_v23 }
 0x40c   :  { %v1821_v49 = vadd.f32 %v5298_v28, %v1771_v48  ;;  %v1852_v50 = vmax.f32 %v1820_v47, 0.0  ;;  %v1775_v59 = vadd.f32 %v1774_v14, %v1501_v43  ;;  %2738 = vmatpush1.bf16.msra.mxu1 %v4540_v3  ;;  %v4569_v43 = vld [vmem:[#allocation15 + $0x24] ss:$8 sps:$4 sm:$0xff]  }
 0x40d   :  { %v1776_v51 = vpop.f32.mrf.mxu0  ;;  %2739 = vmatprep.subr.bf16.mxu1 %v4551_v25 }
 0x40e   :  { %v1853_v52 = vmax.f32 %v1821_v49, 0.0  ;;  %v1777_v54 = vadd.f32 %v1776_v51, %v1503_v46  ;;  %v1903_v55 = vpack.c.bf16 %v1852_v50, %v1850_v56  ;;  %v1822_v34 = vadd.f32 %v5302_v30, %v1775_v59  ;;  %v4530_v56 = vld [vmem:[#allocation13 + $0x64] ss:$8 sps:$4 sm:$0xff]  }
 0x40f   :  { %v1778_v27 = vpop.f32.mrf.mxu0 }
 0x410   :  { %v1779_v60 = vadd.f32 %v1778_v27, %v1505_v19  ;;  %v1904_v62 = vpack.c.bf16 %v1853_v52, %v1851_v53  ;;  %v1823_v2 = vadd.f32 %v5298_v28, %v1777_v54  ;;  %v1854_v7 = vmax.f32 %v1822_v34, 0.0  ;;  %2740 = vmatpush1.bf16.msra.mxu1 %v4549_v29  ;;  %v4525_v53 = vld [vmem:[#allocation13 + $0x70] ss:$8 sps:$4 sm:$0xff]  }
 0x411   :  { %v1780_v63 = vpop.f32.mrf.mxu0  ;;  %2741 = vmatprep.subr.bf16.mxu1 %v4560_v16  ;;  %v4543_v29 = vld [vmem:[#allocation13 + $0x30] ss:$8 sps:$4 sm:$0xff]  }
 0x412   :  { %v1824_v61 = vadd.f32 %v5302_v30, %v1779_v60  ;;  %v1781_v42 = vadd.f32 %v1780_v63, %v1507_v58  ;;  %2170 = vmatprep.mubr.bf16.mxu1 %v1904_v62  ;;  %v1855_v6 = vmax.f32 %v1823_v2, 0.0  ;;  %v4521_v30 = vld [vmem:[#allocation12 + $0x84] ss:$8 sps:$4 sm:$0xff]   ;;  %v4528_v63 = vld [vmem:[#allocation13 + $0x60] ss:$8 sps:$4 sm:$0xff]  }
 0x413   :  { %2171 = vmatmul.mubr.bf16.gmra.mxu1 %v1903_v55  ;;  %2473 = vmatprep.subr.bf16.mxu0 %v4521_v30 }
 0x414   :  { %v1825_v24 = vadd.f32 %v5298_v28, %v1781_v42  ;;  %v1856_v4 = vmax.f32 %v1824_v61, 0.0  ;;  %v4519_v28 = vld [vmem:[#allocation12 + $0x80] ss:$8 sps:$4 sm:$0xff]   ;;  %2742 = vmatpush1.bf16.msra.mxu1 %v4558_v31  ;;  %v4536_v61 = vld [vmem:[#allocation13 + $0x54] ss:$8 sps:$4 sm:$0xff]  }
 0x415   :  { %2474 = vmatpush2.bf16.msra.mxu0 %v4519_v28  ;;  %2743 = vmatprep.subr.bf16.mxu1 %v4569_v43  ;;  %v4537_v28 = vld [vmem:[#allocation13 + $0x40] ss:$8 sps:$4 sm:$0xff]   ;;  %v4548_v43 = vld [vmem:[#allocation13 + $0x24] ss:$8 sps:$4 sm:$0xff]  }
 0x416   :  { %v1857_v41 = vmax.f32 %v1825_v24, 0.0  ;;  %v1905_v10 = vpack.c.bf16 %v1856_v4, %v1854_v7  ;;  %3006 = vmatprep.subr.bf16.mxu0 %v4527_v20  ;;  %v4545_v20 = vld [vmem:[#allocation13 + $0x34] ss:$8 sps:$4 sm:$0xff]  }
 0x418   :  { %v1906_v9 = vpack.c.bf16 %v1857_v41, %v1855_v6  ;;  %2744 = vmatpush1.bf16.msra.mxu1 %v4567_v32  ;;  %v4534_v41 = vld [vmem:[#allocation13 + $0x50] ss:$8 sps:$4 sm:$0xff]  }
 0x419   :  { %2745 = vmatprep.subr.bf16.mxu1 %v4578_v8 }
 0x41a   :  { %2180 = vmatprep.mubr.bf16.mxu1 %v1906_v9 }
 0x41b   :  { %2181 = vmatmul.mubr.bf16.gmra.mxu1 %v1905_v10  ;;  %v4539_v10 = vld [vmem:[#allocation13 + $0x44] ss:$8 sps:$4 sm:$0xff]  }
 0x41c   :  { %2765 = vmatprep.mubr.bf16.mxu1 %v4900_v0  ;;  %2746 = vmatpush1.bf16.msra.mxu1 %v4576_v33 }
 0x4a3   :  { %v2112_v36 = vpop.f32.mrf.mxu1 }
 0x4a4   :  { %v2113_v45 = vadd.f32 %v2112_v36, %v5371_v11 }
 0x4a5   :  { %v2114_v38 = vpop.f32.mrf.mxu1 }
 0x4a6   :  { %v2115_v46 = vadd.f32 %v2114_v38, %v5368_v37  ;;  %v2191_v50 = vmax.f32 %v2113_v45, 0.0  ;;  %v4546_v38 = vld [vmem:[#allocation13 + $0x20] ss:$8 sps:$4 sm:$0xff]  }
 0x4a7   :  { %v2116_v39 = vpop.f32.mrf.mxu1 }
 0x4a8   :  { %v2117_v40 = vadd.f32 %v2116_v39, %v5371_v11  ;;  %v2192_v14 = vmax.f32 %v2115_v46, 0.0 }
 0x4a9   :  { %v2118_v44 = vpop.f32.mrf.mxu1 }
 0x4aa   :  { %v2119_v47 = vadd.f32 %v2118_v44, %v5368_v37  ;;  %v2193_v48 = vmax.f32 %v2117_v40, 0.0  ;;  %v4554_v40 = vld [vmem:[#allocation13 + $0x14] ss:$8 sps:$4 sm:$0xff]  }
 0x4ab   :  { %v2122_v17 = vpop.f32.mrf.mxu1 }
 0x4ac   :  { %v2194_v49 = vmax.f32 %v2119_v47, 0.0  ;;  %v2256_v52 = vpack.c.bf16 %v2193_v48, %v2191_v50  ;;  %v2123_v60 = vadd.f32 %v2122_v17, %v5371_v11 }
 0x4ad   :  { %v2124_v19 = vpop.f32.mrf.mxu1 }
 0x4ae   :  { %v2257_v51 = vpack.c.bf16 %v2194_v49, %v2192_v14  ;;  %v2125_v59 = vadd.f32 %v2124_v19, %v5368_v37  ;;  %v2195_v24 = vmax.f32 %v2123_v60, 0.0  ;;  %v4552_v14 = vld [vmem:[#allocation13 + $0x10] ss:$8 sps:$4 sm:$0xff]   ;;  %v4557_v19 = vld [vmem:[#allocation13 + $0x4] ss:$8 sps:$4 sm:$0xff]  }
 0x4af   :  { %v2126_v54 = vpop.f32.mrf.mxu1 }
 0x4b0   :  { %v2127_v27 = vadd.f32 %v2126_v54, %v5371_v11  ;;  %2475 = vmatprep.mubr.bf16.mxu0 %v2257_v51  ;;  %v2196_v42 = vmax.f32 %v2125_v59, 0.0  ;;  %v4555_v59 = vld [vmem:[#allocation13] ss:$8 sps:$4 sm:$0xff]  }
 0x4b1   :  { %v2128_v62 = vpop.f32.mrf.mxu1  ;;  %2476 = vmatmul.mubr.bf16.vlgmr.msra.gmra.mxu0 %v2256_v52 }
 0x4b2   :  { %v2129_v58 = vadd.f32 %v2128_v62, %v5368_v37  ;;  %3007 = vmatpush1.bf16.msra.mxu0 %v4525_v53  ;;  %v2197_v55 = vmax.f32 %v2127_v27, 0.0  ;;  %v4563_v62 = vld [vmem:[#allocation13 + $0xf4] ss:$8 sps:$4 sm:$0xff]  }
 0x4b3   :  { %v2132_v2 = vpop.f32.mrf.mxu1  ;;  %3008 = vmatprep.subr.bf16.mxu0 %v4530_v56 }
 0x4b4   :  { %v2198_v34 = vmax.f32 %v2129_v58, 0.0  ;;  %v2258_v7 = vpack.c.bf16 %v2197_v55, %v2195_v24  ;;  %v2133_v13 = vadd.f32 %v2132_v2, %v5371_v11 }
 0x4b5   :  { %v2134_v4 = vpop.f32.mrf.mxu1 }
 0x4b6   :  { %v2259_v6 = vpack.c.bf16 %v2198_v34, %v2196_v42  ;;  %3009 = vmatpush1.bf16.msra.mxu0 %v4528_v63  ;;  %v2135_v1 = vadd.f32 %v2134_v4, %v5368_v37  ;;  %v2199_v5 = vmax.f32 %v2133_v13, 0.0  ;;  %v4561_v42 = vld [vmem:[#allocation13 + $0xf0] ss:$8 sps:$4 sm:$0xff]   ;;  %v4566_v4 = vld [vmem:[#allocation13 + $0xe4] ss:$8 sps:$4 sm:$0xff]  }
 0x4b7   :  { %v2136_v9 = vpop.f32.mrf.mxu1  ;;  %3010 = vmatprep.subr.bf16.mxu0 %v4536_v61 }
 0x4b8   :  { %v2137_v12 = vadd.f32 %v2136_v9, %v5371_v11  ;;  %2485 = vmatprep.mubr.bf16.mxu0 %v2259_v6  ;;  %v2200_v26 = vmax.f32 %v2135_v1, 0.0  ;;  %v4564_v1 = vld [vmem:[#allocation13 + $0xe0] ss:$8 sps:$4 sm:$0xff]  }
 0x4b9   :  { %v2138_v15 = vpop.f32.mrf.mxu1  ;;  %2486 = vmatmul.mubr.bf16.gmra.mxu0 %v2258_v7 }
 0x4ba   :  { %v2139_v30 = vadd.f32 %v2138_v15, %v5368_v37  ;;  %3011 = vmatpush1.bf16.msra.mxu0 %v4534_v41  ;;  %v2201_v18 = vmax.f32 %v2137_v12, 0.0  ;;  %v4572_v15 = vld [vmem:[#allocation13 + $0xd4] ss:$8 sps:$4 sm:$0xff]  }
 0x4bb   :  { %v2142_v57 = vpop.f32.mrf.mxu1  ;;  %3012 = vmatprep.subr.bf16.mxu0 %v4539_v10 }
 0x4bc   :  { %v2202_v21 = vmax.f32 %v2139_v30, 0.0  ;;  %v2260_v16 = vpack.c.bf16 %v2201_v18, %v2199_v5  ;;  %v2143_v33 = vadd.f32 %v2142_v57, %v5371_v11 }
 0x4bd   :  { %v2144_v3 = vpop.f32.mrf.mxu1 }
 0x4be   :  { %v2261_v25 = vpack.c.bf16 %v2202_v21, %v2200_v26  ;;  %3013 = vmatpush1.bf16.msra.mxu0 %v4537_v28  ;;  %v2145_v32 = vadd.f32 %v2144_v3, %v5368_v37  ;;  %v2203_v47 = vmax.f32 %v2143_v33, 0.0  ;;  %v4570_v26 = vld [vmem:[#allocation13 + $0xd0] ss:$8 sps:$4 sm:$0xff]   ;;  %v4575_v3 = vld [vmem:[#allocation13 + $0xc4] ss:$8 sps:$4 sm:$0xff]  }
 0x4bf   :  { %v2146_v31 = vpop.f32.mrf.mxu1  ;;  %3014 = vmatprep.subr.bf16.mxu0 %v4545_v20 }
 0x4c0   :  { %v2147_v8 = vadd.f32 %v2146_v31, %v5371_v11  ;;  %2495 = vmatprep.mubr.bf16.mxu0 %v2261_v25  ;;  %v2204_v45 = vmax.f32 %v2145_v32, 0.0  ;;  %v4573_v32 = vld [vmem:[#allocation13 + $0xc0] ss:$8 sps:$4 sm:$0xff]  }
 0x4c1   :  { %v2148_v35 = vpop.f32.mrf.mxu1  ;;  %2496 = vmatmul.mubr.bf16.gmra.mxu0 %v2260_v16 }
 0x4c2   :  { %v2149_v36 = vadd.f32 %v2148_v35, %v5368_v37  ;;  %3015 = vmatpush1.bf16.msra.mxu0 %v4543_v29  ;;  %v2205_v39 = vmax.f32 %v2147_v8, 0.0  ;;  %v4581_v35 = vld [vmem:[#allocation13 + $0xb4] ss:$8 sps:$4 sm:$0xff]  }
 0x4c3   :  { %v2152_v46 = vpop.f32.mrf.mxu1  ;;  %3016 = vmatprep.subr.bf16.mxu0 %v4548_v43 }
 0x4c4   :  { %v2206_v44 = vmax.f32 %v2149_v36, 0.0  ;;  %v2262_v49 = vpack.c.bf16 %v2205_v39, %v2203_v47  ;;  %v2153_v52 = vadd.f32 %v2152_v46, %v5371_v11 }
 0x4c5   :  { %v2154_v48 = vpop.f32.mrf.mxu1 }
 0x4c6   :  { %v2263_v17 = vpack.c.bf16 %v2206_v44, %v2204_v45  ;;  %3017 = vmatpush1.bf16.msra.mxu0 %v4546_v38  ;;  %v2155_v51 = vadd.f32 %v2154_v48, %v5368_v37  ;;  %v2207_v55 = vmax.f32 %v2153_v52, 0.0  ;;  %v4579_v45 = vld [vmem:[#allocation13 + $0xb0] ss:$8 sps:$4 sm:$0xff]  }
 0x4c7   :  { %v2156_v50 = vpop.f32.mrf.mxu1  ;;  %3018 = vmatprep.subr.bf16.mxu0 %v4554_v40 }
 0x4c8   :  { %v2157_v53 = vadd.f32 %v2156_v50, %v5371_v11  ;;  %2505 = vmatprep.mubr.bf16.mxu0 %v2263_v17  ;;  %v2208_v58 = vmax.f32 %v2155_v51, 0.0 }
 0x4c9   :  { %v2158_v54 = vpop.f32.mrf.mxu1  ;;  %2506 = vmatmul.mubr.bf16.gmra.mxu0 %v2262_v49 }
 0x4ca   :  { %v2159_v56 = vadd.f32 %v2158_v54, %v5368_v37  ;;  %3019 = vmatpush1.bf16.msra.mxu0 %v4552_v14  ;;  %v2209_v27 = vmax.f32 %v2157_v53, 0.0 }
 0x4cb   :  { %v2162_v60 = vpop.f32.mrf.mxu1  ;;  %3020 = vmatprep.subr.bf16.mxu0 %v4557_v19 }
 0x4cc   :  { %v2210_v63 = vmax.f32 %v2159_v56, 0.0  ;;  %v2264_v34 = vpack.c.bf16 %v2209_v27, %v2207_v55  ;;  %v2163_v7 = vadd.f32 %v2162_v60, %v5371_v11  ;;  %v4582_v27 = vld [vmem:[#allocation13 + $0xa0] ss:$8 sps:$4 sm:$0xff]   ;;  %v4587_v60 = vld [vmem:[#allocation15 + $0x4] ss:$8 sps:$4 sm:$0xff]  }
 0x4cd   :  { %v2164_v2 = vpop.f32.mrf.mxu1  ;;  %2747 = vmatprep.subr.bf16.mxu1 %v4587_v60  ;;  %v4591_v55 = vld [vmem:[#allocation13 + $0x80] ss:$8 sps:$4 sm:$0xff]  }
 0x4ce   :  { %v2265_v61 = vpack.c.bf16 %v2210_v63, %v2208_v58  ;;  %3021 = vmatpush1.bf16.msra.mxu0 %v4555_v59  ;;  %v2165_v6 = vadd.f32 %v2164_v2, %v5368_v37  ;;  %v2211_v18 = vmax.f32 %v2163_v7, 0.0  ;;  %v4584_v59 = vld [vmem:[#allocation13 + $0xa4] ss:$8 sps:$4 sm:$0xff]   ;;  %v4588_v58 = vld [vmem:[#allocation13 + $0x90] ss:$8 sps:$4 sm:$0xff]  }
 0x4cf   :  { %v2166_v24 = vpop.f32.mrf.mxu1  ;;  %3022 = vmatprep.subr.bf16.mxu0 %v4563_v62  ;;  %v4585_v62 = vld [vmem:[#allocation15] ss:$8 sps:$4 sm:$0xff]   ;;  %v4593_v63 = vld [vmem:[#allocation13 + $0x84] ss:$8 sps:$4 sm:$0xff]   ;;  %v4596_v7 = vld [vmem:[#allocation16 + $0x74] ss:$8 sps:$4 sm:$0xff]  }
 0x4d0   :  { %v2167_v41 = vadd.f32 %v2166_v24, %v5371_v11  ;;  %2515 = vmatprep.mubr.bf16.mxu0 %v2265_v61  ;;  %v2212_v30 = vmax.f32 %v2165_v6, 0.0  ;;  %2748 = vmatpush1.bf16.msra.mxu1 %v4585_v62  ;;  %v4667_v2 = vld [vmem:[#allocation2 + $0x8] sm:$0xff]   ;;  %v4668_v61 = vld [vmem:[#allocation2 + $0x10] sm:$0xff]   ;;  %v4673_v6 = vld [vmem:[#allocation2 + $0x38] sm:$0xff]  }
 0x4d1   :  { %v2168_v9 = vpop.f32.mrf.mxu1  ;;  %2516 = vmatmul.mubr.bf16.gmra.mxu0 %v2264_v34  ;;  %v4670_v34 = vld [vmem:[#allocation2 + $0x20] sm:$0xff]   ;;  %v4671_v24 = vld [vmem:[#allocation2 + $0x28] sm:$0xff]   ;;  %3414 = vmatprep.subr.bf16.mxu1 %v4596_v7 }
 0x4d2   :  { %v2169_v10 = vadd.f32 %v2168_v9, %v5368_v37  ;;  %3023 = vmatpush2.bf16.msra.mxu0 %v4561_v42  ;;  %v2213_v12 = vmax.f32 %v2167_v41, 0.0  ;;  %v4669_v42 = vld [vmem:[#allocation2 + $0x18] sm:$0xff]   ;;  %v4599_v9 = vld [vmem:[#allocation16 + $0x64] ss:$8 sps:$4 sm:$0xff]  }
 0x4d3   :  { %v2172_v13 = vpop.f32.mrf.mxu1  ;;  %3024 = vmatprep.subr.bf16.mxu0 %v4566_v4  ;;  %v4672_v4 = vld [vmem:[#allocation2 + $0x30] sm:$0xff]  }
 0x4d4   :  { %v2214_v28 = vmax.f32 %v2169_v10, 0.0  ;;  %v2266_v21 = vpack.c.bf16 %v2213_v12, %v2211_v18  ;;  %v2173_v16 = vadd.f32 %v2172_v13, %v5371_v11  ;;  %v4594_v41 = vld [vmem:[#allocation16 + $0x70] ss:$8 sps:$4 sm:$0xff]   ;;  %v4597_v10 = vld [vmem:[#allocation16 + $0x60] ss:$8 sps:$4 sm:$0xff]  }
 0x4d5   :  { %v2174_v57 = vpop.f32.mrf.mxu1  ;;  %v4600_v12 = vld [vmem:[#allocation16 + $0x50] ss:$8 sps:$4 sm:$0xff]   ;;  %v4605_v13 = vld [vmem:[#allocation16 + $0x44] ss:$8 sps:$4 sm:$0xff]   ;;  %v4609_v18 = vld [vmem:[#allocation16 + $0x20] ss:$8 sps:$4 sm:$0xff]  }
 0x4d6   :  { %v2267_v20 = vpack.c.bf16 %v2214_v28, %v2212_v30  ;;  %3025 = vmatpush2.bf16.msra.mxu0 %v4564_v1  ;;  %v2175_v25 = vadd.f32 %v2174_v57, %v5368_v37  ;;  %v2215_v39 = vmax.f32 %v2173_v16, 0.0  ;;  %v4602_v1 = vld [vmem:[#allocation16 + $0x54] ss:$8 sps:$4 sm:$0xff]   ;;  %v4611_v28 = vld [vmem:[#allocation16 + $0x24] ss:$8 sps:$4 sm:$0xff]  }
 0x4d7   :  { %v2176_v5 = vpop.f32.mrf.mxu1  ;;  %3026 = vmatprep.subr.bf16.mxu0 %v4572_v15  ;;  %v4603_v15 = vld [vmem:[#allocation16 + $0x40] ss:$8 sps:$4 sm:$0xff]   ;;  %v4608_v30 = vld [vmem:[#allocation16 + $0x34] ss:$8 sps:$4 sm:$0xff]  }
 0x4d8   :  { %v2177_v29 = vadd.f32 %v2176_v5, %v5371_v11  ;;  %2525 = vmatprep.mubr.bf16.mxu0 %v2267_v20  ;;  %v2216_v36 = vmax.f32 %v2175_v25, 0.0  ;;  %v4614_v57 = vld [vmem:[#allocation16 + $0x14] ss:$8 sps:$4 sm:$0xff]   ;;  %v4612_v20 = vld [vmem:[#allocation16 + $0x10] ss:$8 sps:$4 sm:$0xff]  }
 0x4d9   :  { %v2178_v31 = vpop.f32.mrf.mxu1  ;;  %2526 = vmatmul.mubr.bf16.gmra.mxu0 %v2266_v21  ;;  %v4615_v21 = vld [vmem:[#allocation16] ss:$8 sps:$4 sm:$0xff]   ;;  %v4620_v5 = vld [vmem:[#allocation16 + $0xf4] ss:$8 sps:$4 sm:$0xff]   ;;  %v4623_v25 = vld [vmem:[#allocation16 + $0xe4] ss:$8 sps:$4 sm:$0xff]  }
 0x4da   :  { %v2179_v43 = vadd.f32 %v2178_v31, %v5368_v37  ;;  %3027 = vmatpush2.bf16.msra.mxu0 %v4570_v26  ;;  %v2217_v8 = vmax.f32 %v2177_v29, 0.0  ;;  %v4617_v26 = vld [vmem:[#allocation16 + $0x4] ss:$8 sps:$4 sm:$0xff]   ;;  %v4621_v29 = vld [vmem:[#allocation16 + $0xe0] ss:$8 sps:$4 sm:$0xff]  }
 0x4db   :  { %v2182_v33 = vpop.f32.mrf.mxu1  ;;  %3028 = vmatprep.subr.bf16.mxu0 %v4575_v3  ;;  %v4618_v3 = vld [vmem:[#allocation16 + $0xf0] ss:$8 sps:$4 sm:$0xff]   ;;  %v4626_v16 = vld [vmem:[#allocation16 + $0xd4] ss:$8 sps:$4 sm:$0xff]  }
 0x4dc   :  { %v2218_v38 = vmax.f32 %v2179_v43, 0.0  ;;  %v2268_v44 = vpack.c.bf16 %v2217_v8, %v2215_v39  ;;  %v2183_v14 = vadd.f32 %v2182_v33, %v5371_v11  ;;  %v4624_v31 = vld [vmem:[#allocation16 + $0xd0] ss:$8 sps:$4 sm:$0xff]   ;;  %v4629_v43 = vld [vmem:[#allocation16 + $0xc4] ss:$8 sps:$4 sm:$0xff]  }
 0x4dd   :  { %v2184_v46 = vpop.f32.mrf.mxu1  ;;  %v4632_v8 = vld [vmem:[#allocation16 + $0xb4] ss:$8 sps:$4 sm:$0xff]   ;;  %v4630_v33 = vld [vmem:[#allocation16 + $0xb0] ss:$8 sps:$4 sm:$0xff]  }
 0x4de   :  { %v2269_v40 = vpack.c.bf16 %v2218_v38, %v2216_v36  ;;  %3029 = vmatpush2.bf16.msra.mxu0 %v4573_v32  ;;  %v2185_v48 = vadd.f32 %v2184_v46, %v5368_v37  ;;  %v2219_v52 = vmax.f32 %v2183_v14, 0.0  ;;  %v4627_v32 = vld [vmem:[#allocation16 + $0xc0] ss:$8 sps:$4 sm:$0xff]  }
 0x4df   :  { %v2186_v47 = vpop.f32.mrf.mxu1  ;;  %3030 = vmatprep.subr.bf16.mxu0 %v4581_v35  ;;  %v2255_v35 = vld [vmem:[%s5750_s13] sm:$0x3] }
 0x4e0   :  { %v2187_v17 = vadd.f32 %v2186_v47, %v5371_v11  ;;  %2535 = vmatprep.mubr.bf16.mxu0 %v2269_v40  ;;  %v2220_v51 = vmax.f32 %v2185_v48, 0.0  ;;  %v4590_v11 = vld [vmem:[#allocation13 + $0x94] ss:$8 sps:$4 sm:$0xff]   ;;  %v5416_v38 = vrot.slane %v2255_v35, %v5124_v22  ;;  %v5419_v39 = vrot.slane %v2255_v35, %v5126_v23 }
 0x4e1   :  { %v2188_v49 = vpop.f32.mrf.mxu1  ;;  %2536 = vmatmul.mubr.bf16.gmra.mxu0 %v2268_v44 }
 0x4e2   :  { %v2189_v50 = vadd.f32 %v2188_v49, %v5368_v37  ;;  %3031 = vmatpush2.bf16.msra.mxu0 %v4579_v45  ;;  %v2221_v19 = vmax.f32 %v2187_v17, 0.0  ;;  %v4666_v37 = vld [vmem:[#allocation2] sm:$0xff]  }
 0x4e3   :  { %3032 = vmatprep.subr.bf16.mxu0 %v4584_v59  ;;  %2766 = vmatmul.mubr.bf16.vlgmr.msra.gmra.mxu1 %v4666_v37 }
 0x4e4   :  { %v2222_v53 = vmax.f32 %v2189_v50, 0.0  ;;  %v2270_v56 = vpack.c.bf16 %v2221_v19, %v2219_v52  ;;  %2775 = vmatprep.mubr.bf16.mxu1 %v4900_v0  ;;  %3415 = vmatpush1.bf16.msra.mxu1 %v4594_v41 }
 0x4e5   :  { %3416 = vmatprep.subr.bf16.mxu1 %v4599_v9 }
 0x4e6   :  { %v2271_v54 = vpack.c.bf16 %v2222_v53, %v2220_v51  ;;  %3033 = vmatpush2.bf16.msra.mxu0 %v4582_v27 }
 0x4e7   :  { %3034 = vmatprep.subr.bf16.mxu0 %v4590_v11 }
 0x4e8   :  { %2545 = vmatprep.mubr.bf16.mxu0 %v2271_v54  ;;  %3417 = vmatpush1.bf16.msra.mxu1 %v4597_v10 }
 0x4e9   :  { %2546 = vmatmul.mubr.bf16.gmra.mxu0 %v2270_v56  ;;  %3418 = vmatprep.subr.bf16.mxu1 %v4602_v1 }
 0x4ea   :  { %3035 = vmatpush2.bf16.msra.mxu0 %v4588_v58 }
 0x4eb   :  { %3036 = vmatprep.subr.bf16.mxu0 %v4593_v63  ;;  %2776 = vmatmul.mubr.bf16.gmra.mxu1 %v4667_v2 }
 0x4ec   :  { %2785 = vmatprep.mubr.bf16.mxu1 %v4900_v0  ;;  %3419 = vmatpush1.bf16.msra.mxu1 %v4600_v12 }
 0x4ed   :  { %3420 = vmatprep.subr.bf16.mxu1 %v4605_v13 }
 0x4ee   :  { %3037 = vmatpush2.bf16.msra.mxu0 %v4591_v55 }
 0x4f0   :  { %3421 = vmatpush1.bf16.msra.mxu1 %v4603_v15 }
 0x4f1   :  { %3422 = vmatprep.subr.bf16.mxu1 %v4608_v30 }
 0x4f3   :  { %2786 = vmatmul.mubr.bf16.gmra.mxu1 %v4668_v61 }
 0x4f4   :  { %2795 = vmatprep.mubr.bf16.mxu1 %v4900_v0 }
 0x4fb   :  { %2796 = vmatmul.mubr.bf16.gmra.mxu1 %v4669_v42 }
 0x4fc   :  { %2805 = vmatprep.mubr.bf16.mxu1 %v4900_v0 }
 0x503   :  { %2806 = vmatmul.mubr.bf16.gmra.mxu1 %v4670_v34 }
 0x504   :  { %2815 = vmatprep.mubr.bf16.mxu1 %v4900_v0 }
 0x50b   :  { %2816 = vmatmul.mubr.bf16.gmra.mxu1 %v4671_v24 }
 0x50c   :  { %2825 = vmatprep.mubr.bf16.mxu1 %v4900_v0 }
 0x513   :  { %2826 = vmatmul.mubr.bf16.gmra.mxu1 %v4672_v4 }
 0x514   :  { %2835 = vmatprep.mubr.bf16.mxu1 %v4900_v0  ;;  %v4606_v0 = vld [vmem:[#allocation16 + $0x30] ss:$8 sps:$4 sm:$0xff]  }
 0x515   :  { %3423 = vmatpush1.bf16.msra.mxu1 %v4606_v0 }
 0x516   :  { %3424 = vmatprep.subr.bf16.mxu1 %v4611_v28 }
 0x519   :  { %3425 = vmatpush1.bf16.msra.mxu1 %v4609_v18 }
 0x51a   :  { %3426 = vmatprep.subr.bf16.mxu1 %v4614_v57 }
 0x51b   :  { %2836 = vmatmul.mubr.bf16.gmra.mxu1 %v4673_v6 }
 0x51d   :  { %3427 = vmatpush1.bf16.msra.mxu1 %v4612_v20 }
 0x51e   :  { %3428 = vmatprep.subr.bf16.mxu1 %v4617_v26 }
 0x521   :  { %3429 = vmatpush1.bf16.msra.mxu1 %v4615_v21 }
 0x522   :  { %3430 = vmatprep.subr.bf16.mxu1 %v4620_v5 }
 0x525   :  { %3431 = vmatpush2.bf16.msra.mxu1 %v4618_v3 }
 0x526   :  { %3432 = vmatprep.subr.bf16.mxu1 %v4623_v25 }
 0x529   :  { %3433 = vmatpush2.bf16.msra.mxu1 %v4621_v29 }
 0x52a   :  { %3434 = vmatprep.subr.bf16.mxu1 %v4626_v16 }
 0x52d   :  { %3435 = vmatpush2.bf16.msra.mxu1 %v4624_v31 }
 0x52e   :  { %3436 = vmatprep.subr.bf16.mxu1 %v4629_v43 }
 0x531   :  { %3437 = vmatpush2.bf16.msra.mxu1 %v4627_v32 }
 0x532   :  { %3438 = vmatprep.subr.bf16.mxu1 %v4632_v8 }
 0x535   :  { %3439 = vmatpush2.bf16.msra.mxu1 %v4630_v33 }
 0x571   :  { %v2477_v36 = vpop.f32.mrf.mxu0 }
 0x572   :  { %v2478_v47 = vadd.f32 %v2477_v36, %v5419_v39 }
 0x573   :  { %v2479_v46 = vpop.f32.mrf.mxu0 }
 0x574   :  { %v2480_v45 = vadd.f32 %v2479_v46, %v5416_v38  ;;  %v2556_v51 = vmax.f32 %v2478_v47, 0.0 }
 0x575   :  { %v2481_v40 = vpop.f32.mrf.mxu0 }
 0x576   :  { %v2482_v44 = vadd.f32 %v2481_v40, %v5419_v39  ;;  %v2557_v50 = vmax.f32 %v2480_v45, 0.0 }
 0x577   :  { %v2483_v48 = vpop.f32.mrf.mxu0 }
 0x578   :  { %v2484_v17 = vadd.f32 %v2483_v48, %v5416_v38  ;;  %v2558_v14 = vmax.f32 %v2482_v44, 0.0 }
 0x579   :  { %v2487_v49 = vpop.f32.mrf.mxu0 }
 0x57a   :  { %v2559_v19 = vmax.f32 %v2484_v17, 0.0  ;;  %v2637_v54 = vpack.c.bf16 %v2558_v14, %v2556_v51  ;;  %v2488_v60 = vadd.f32 %v2487_v49, %v5419_v39 }
 0x57b   :  { %v2489_v53 = vpop.f32.mrf.mxu0 }
 0x57c   :  { %v2638_v52 = vpack.c.bf16 %v2559_v19, %v2557_v50  ;;  %v2490_v59 = vadd.f32 %v2489_v53, %v5416_v38  ;;  %v2560_v2 = vmax.f32 %v2488_v60, 0.0 }
 0x57d   :  { %v2491_v56 = vpop.f32.mrf.mxu0 }
 0x57e   :  { %v2492_v27 = vadd.f32 %v2491_v56, %v5419_v39  ;;  %3038 = vmatprep.mubr.bf16.mxu0 %v2638_v52  ;;  %v2561_v63 = vmax.f32 %v2490_v59, 0.0 }
 0x57f   :  { %v2493_v62 = vpop.f32.mrf.mxu0  ;;  %3039 = vmatmul.mubr.bf16.vlgmr.msra.gmra.mxu0 %v2637_v54 }
 0x580   :  { %v2494_v11 = vadd.f32 %v2493_v62, %v5416_v38  ;;  %v2562_v58 = vmax.f32 %v2492_v27, 0.0 }
 0x581   :  { %v2497_v37 = vpop.f32.mrf.mxu0 }
 0x582   :  { %v2563_v55 = vmax.f32 %v2494_v11, 0.0  ;;  %v2639_v34 = vpack.c.bf16 %v2562_v58, %v2560_v2  ;;  %v2498_v41 = vadd.f32 %v2497_v37, %v5419_v39 }
 0x583   :  { %v2499_v61 = vpop.f32.mrf.mxu0 }
 0x584   :  { %v2640_v42 = vpack.c.bf16 %v2563_v55, %v2561_v63  ;;  %v2500_v4 = vadd.f32 %v2499_v61, %v5416_v38  ;;  %v2564_v15 = vmax.f32 %v2498_v41, 0.0 }
 0x585   :  { %v2501_v24 = vpop.f32.mrf.mxu0 }
 0x586   :  { %v2502_v6 = vadd.f32 %v2501_v24, %v5419_v39  ;;  %3048 = vmatprep.mubr.bf16.mxu0 %v2640_v42  ;;  %v2565_v12 = vmax.f32 %v2500_v4, 0.0 }
 0x587   :  { %v2503_v7 = vpop.f32.mrf.mxu0  ;;  %3049 = vmatmul.mubr.bf16.gmra.mxu0 %v2639_v34 }
 0x588   :  { %v2504_v9 = vadd.f32 %v2503_v7, %v5416_v38  ;;  %v2566_v10 = vmax.f32 %v2502_v6, 0.0 }
 0x589   :  { %v2507_v1 = vpop.f32.mrf.mxu0 }
 0x58a   :  { %v2567_v13 = vmax.f32 %v2504_v9, 0.0  ;;  %v2641_v28 = vpack.c.bf16 %v2566_v10, %v2564_v15  ;;  %v2508_v26 = vadd.f32 %v2507_v1, %v5419_v39 }
 0x58b   :  { %v2509_v30 = vpop.f32.mrf.mxu0 }
 0x58c   :  { %v2642_v0 = vpack.c.bf16 %v2567_v13, %v2565_v12  ;;  %v2510_v57 = vadd.f32 %v2509_v30, %v5416_v38  ;;  %v2568_v31 = vmax.f32 %v2508_v26, 0.0 }
 0x58d   :  { %v2511_v18 = vpop.f32.mrf.mxu0 }
 0x58e   :  { %v2512_v20 = vadd.f32 %v2511_v18, %v5419_v39  ;;  %3058 = vmatprep.mubr.bf16.mxu0 %v2642_v0  ;;  %v2569_v29 = vmax.f32 %v2510_v57, 0.0 }
 0x58f   :  { %v2513_v21 = vpop.f32.mrf.mxu0  ;;  %3059 = vmatmul.mubr.bf16.gmra.mxu0 %v2641_v28 }
 0x590   :  { %v2514_v5 = vadd.f32 %v2513_v21, %v5416_v38  ;;  %v2570_v3 = vmax.f32 %v2512_v20, 0.0 }
 0x591   :  { %v2517_v25 = vpop.f32.mrf.mxu0 }
 0x592   :  { %v2571_v16 = vmax.f32 %v2514_v5, 0.0  ;;  %v2643_v8 = vpack.c.bf16 %v2570_v3, %v2568_v31  ;;  %v2518_v46 = vadd.f32 %v2517_v25, %v5419_v39  ;;  %v4638_v31 = vld [vmem:[#allocation16 + $0x94] ss:$8 sps:$4 sm:$0xff]  }
 0x593   :  { %v2519_v43 = vpop.f32.mrf.mxu0 }
 0x594   :  { %v2644_v32 = vpack.c.bf16 %v2571_v16, %v2569_v29  ;;  %v2520_v35 = vadd.f32 %v2519_v43, %v5416_v38  ;;  %v2572_v14 = vmax.f32 %v2518_v46, 0.0  ;;  %v4635_v29 = vld [vmem:[#allocation16 + $0xa4] ss:$8 sps:$4 sm:$0xff]   ;;  %v4633_v16 = vld [vmem:[#allocation16 + $0xa0] ss:$8 sps:$4 sm:$0xff]  }
 0x595   :  { %v2521_v33 = vpop.f32.mrf.mxu0  ;;  %3440 = vmatprep.subr.bf16.mxu1 %v4635_v29  ;;  %v4636_v43 = vld [vmem:[#allocation16 + $0x90] ss:$8 sps:$4 sm:$0xff]  }
 0x596   :  { %v2522_v36 = vadd.f32 %v2521_v33, %v5419_v39  ;;  %3068 = vmatprep.mubr.bf16.mxu0 %v2644_v32  ;;  %v2573_v48 = vmax.f32 %v2520_v35, 0.0  ;;  %3441 = vmatpush2.bf16.msra.mxu1 %v4633_v16  ;;  %v4639_v32 = vld [vmem:[#allocation16 + $0x80] ss:$8 sps:$4 sm:$0xff]   ;;  %v4642_v33 = vld [vmem:[%s5756_s19 + $0x78] sm:$0xff]  }
 0x597   :  { %v2523_v40 = vpop.f32.mrf.mxu0  ;;  %3069 = vmatmul.mubr.bf16.gmra.mxu0 %v2643_v8  ;;  %3442 = vmatprep.subr.bf16.mxu1 %v4638_v31  ;;  %v5459_v35 = vld [vmem:[%s5756_s19 + $0x38] sm:$0xff]  }
 0x598   :  { %v2524_v45 = vadd.f32 %v2523_v40, %v5416_v38  ;;  %v2574_v44 = vmax.f32 %v2522_v36, 0.0  ;;  %v5464_v36 = vld [vmem:[%s5756_s19 + $0x70] sm:$0xff]   ;;  %4131 = vmatprep.subr.bf16.mxu0 %v4642_v33 }
 0x599   :  { %v2527_v47 = vpop.f32.mrf.mxu0  ;;  %4132 = vmatpush3.bf16.msra.mxu0 %v5459_v35  ;;  %v5470_v40 = vld [vmem:[%s5756_s19 + $0x30] sm:$0xff]  }
 0x59a   :  { %v2575_v17 = vmax.f32 %v2524_v45, 0.0  ;;  %v2645_v19 = vpack.c.bf16 %v2574_v44, %v2572_v14  ;;  %v2528_v54 = vadd.f32 %v2527_v47, %v5419_v39  ;;  %3443 = vmatpush2.bf16.msra.mxu1 %v4636_v43  ;;  %4133 = vmatprep.subr.bf16.mxu0 %v5464_v36  ;;  %v5476_v45 = vld [vmem:[%s5756_s19 + $0x68] sm:$0xff]   ;;  %v5494_v14 = vld [vmem:[%s5756_s19 + $0x20] sm:$0xff]  }
 0x59b   :  { %v2529_v49 = vpop.f32.mrf.mxu0  ;;  %v5482_v47 = vld [vmem:[%s5756_s19 + $0x28] sm:$0xff]  }
 0x59c   :  { %v2646_v50 = vpack.c.bf16 %v2575_v17, %v2573_v48  ;;  %v2530_v53 = vadd.f32 %v2529_v49, %v5416_v38  ;;  %v2576_v58 = vmax.f32 %v2528_v54, 0.0  ;;  %v5488_v48 = vld [vmem:[%s5756_s19 + $0x60] sm:$0xff]   ;;  %v5500_v49 = vld [vmem:[%s5756_s19 + $0x58] sm:$0xff]  }
 0x59d   :  { %v2531_v51 = vpop.f32.mrf.mxu0  ;;  %4134 = vmatpush3.bf16.msra.mxu0 %v5470_v40 }
 0x59e   :  { %v2532_v52 = vadd.f32 %v2531_v51, %v5419_v39  ;;  %3078 = vmatprep.mubr.bf16.mxu0 %v2646_v50  ;;  %v2577_v62 = vmax.f32 %v2530_v53, 0.0  ;;  %4135 = vmatprep.subr.bf16.mxu0 %v5476_v45 }
 0x59f   :  { %v2533_v56 = vpop.f32.mrf.mxu0  ;;  %3079 = vmatmul.mubr.bf16.gmra.mxu0 %v2645_v19  ;;  %v5506_v19 = vld [vmem:[%s5756_s19 + $0x18] sm:$0xff]  }
 0x5a0   :  { %v2534_v59 = vadd.f32 %v2533_v56, %v5416_v38  ;;  %v2578_v27 = vmax.f32 %v2532_v52, 0.0 }
 0x5a1   :  { %v2537_v60 = vpop.f32.mrf.mxu0  ;;  %4136 = vmatpush3.bf16.msra.mxu0 %v5482_v47 }
 0x5a2   :  { %v2579_v11 = vmax.f32 %v2534_v59, 0.0  ;;  %v2647_v55 = vpack.c.bf16 %v2578_v27, %v2576_v58  ;;  %v2538_v34 = vadd.f32 %v2537_v60, %v5419_v39  ;;  %4137 = vmatprep.subr.bf16.mxu0 %v5488_v48 }
 0x5a3   :  { %v2539_v37 = vpop.f32.mrf.mxu0 }
 0x5a4   :  { %v2648_v63 = vpack.c.bf16 %v2579_v11, %v2577_v62  ;;  %v2540_v61 = vadd.f32 %v2539_v37, %v5416_v38  ;;  %v2580_v10 = vmax.f32 %v2538_v34, 0.0  ;;  %v2636_v37 = vld [vmem:[%s5753_s16] sm:$0x3] }
 0x5a5   :  { %v2541_v2 = vpop.f32.mrf.mxu0  ;;  %4138 = vmatpush3.bf16.msra.mxu0 %v5494_v14  ;;  %v5529_v34 = vrot.slane %v2636_v37, %v5126_v23 }
 0x5a6   :  { %v2542_v42 = vadd.f32 %v2541_v2, %v5419_v39  ;;  %3088 = vmatprep.mubr.bf16.mxu0 %v2648_v63  ;;  %v2581_v7 = vmax.f32 %v2540_v61, 0.0  ;;  %4139 = vmatprep.subr.bf16.mxu0 %v5500_v49  ;;  %v5526_v61 = vrot.slane %v2636_v37, %v5124_v22 }
 0x5a7   :  { %v2543_v24 = vpop.f32.mrf.mxu0  ;;  %3089 = vmatmul.mubr.bf16.gmra.mxu0 %v2647_v55 }
 0x5a8   :  { %v2544_v4 = vadd.f32 %v2543_v24, %v5416_v38  ;;  %v2582_v6 = vmax.f32 %v2542_v42, 0.0 }
 0x5a9   :  { %v2547_v41 = vpop.f32.mrf.mxu0  ;;  %4140 = vmatpush3.bf16.msra.mxu0 %v5506_v19 }
 0x5aa   :  { %v2583_v9 = vmax.f32 %v2544_v4, 0.0  ;;  %v2649_v13 = vpack.c.bf16 %v2582_v6, %v2580_v10  ;;  %v2548_v28 = vadd.f32 %v2547_v41, %v5419_v39 }
 0x5ab   :  { %v2549_v1 = vpop.f32.mrf.mxu0 }
 0x5ac   :  { %v2650_v12 = vpack.c.bf16 %v2583_v9, %v2581_v7  ;;  %v2550_v30 = vadd.f32 %v2549_v1, %v5416_v38  ;;  %v2584_v5 = vmax.f32 %v2548_v28, 0.0 }
 0x5ad   :  { %v2551_v15 = vpop.f32.mrf.mxu0 }
 0x5ae   :  { %v2552_v0 = vadd.f32 %v2551_v15, %v5419_v39  ;;  %3098 = vmatprep.mubr.bf16.mxu0 %v2650_v12  ;;  %v2585_v26 = vmax.f32 %v2550_v30, 0.0  ;;  %v4641_v39 = vld [vmem:[#allocation16 + $0x84] ss:$8 sps:$4 sm:$0xff]  }
 0x5af   :  { %v2553_v18 = vpop.f32.mrf.mxu0  ;;  %3099 = vmatmul.mubr.bf16.gmra.mxu0 %v2649_v13  ;;  %3444 = vmatprep.subr.bf16.mxu1 %v4641_v39 }
 0x5b0   :  { %v2554_v57 = vadd.f32 %v2553_v18, %v5416_v38  ;;  %v2586_v20 = vmax.f32 %v2552_v0, 0.0  ;;  %3445 = vmatpush2.bf16.msra.mxu1 %v4639_v32  ;;  %v2767_v38 = vpop.f32.mrf.mxu1 }
 0x5b1   :  { %4195 = vmatprep.subr.bf16.mxu1 %v4642_v33 }
 0x5b2   :  { %v2587_v21 = vmax.f32 %v2554_v57, 0.0  ;;  %v2651_v25 = vpack.c.bf16 %v2586_v20, %v2584_v5  ;;  %v2769_v8 = vpop.f32.mrf.mxu1 }
 0x5b4   :  { %v2652_v3 = vpack.c.bf16 %v2587_v21, %v2585_v26  ;;  %v2771_v46 = vpop.f32.mrf.mxu1 }
 0x5b6   :  { %3108 = vmatprep.mubr.bf16.mxu0 %v2652_v3  ;;  %v2773_v44 = vpop.f32.mrf.mxu1 }
 0x5b7   :  { %3109 = vmatmul.mubr.bf16.gmra.mxu0 %v2651_v25 }
 0x5b8   :  { %v2777_v17 = vpop.f32.mrf.mxu1 }
 0x5ba   :  { %v2779_v50 = vpop.f32.mrf.mxu1 }
 0x5bc   :  { %v2781_v51 = vpop.f32.mrf.mxu1 }
 0x5be   :  { %v2783_v53 = vpop.f32.mrf.mxu1 }
 0x5c0   :  { %v2787_v52 = vpop.f32.mrf.mxu1 }
 0x5c2   :  { %v2789_v54 = vpop.f32.mrf.mxu1 }
 0x5c4   :  { %v2791_v56 = vpop.f32.mrf.mxu1 }
 0x5c6   :  { %v5510_v59 = vpop.f32.mrf.mxu1 }
 0x5c8   :  { %v5512_v27 = vpop.f32.mrf.mxu1 }
 0x5ca   :  { %v5514_v60 = vpop.f32.mrf.mxu1 }
 0x5cc   :  { %v5516_v62 = vpop.f32.mrf.mxu1 }
 0x5ce   :  { %v5518_v11 = vpop.f32.mrf.mxu1 }
 0x5d0   :  { %v5523_v55 = vpop.f32.mrf.mxu1 }
 0x5d2   :  { %v5531_v41 = vpop.f32.mrf.mxu1 }
 0x5d4   :  { %v5537_v0 = vpop.f32.mrf.mxu1 }
 0x5d6   :  { %v5539_v16 = vpop.f32.mrf.mxu1 }
 0x63f   :  { %v3040_v58 = vpop.f32.mrf.mxu0 }
 0x640   :  { %v3041_v42 = vadd.f32 %v3040_v58, %v2767_v38 }
 0x641   :  { %v3042_v63 = vpop.f32.mrf.mxu0 }
 0x642   :  { %v3043_v2 = vadd.f32 %v3042_v63, %v2769_v8  ;;  %v3130_v1 = vadd.f32 %v5529_v34, %v3041_v42 }
 0x643   :  { %v3044_v24 = vpop.f32.mrf.mxu0 }
 0x644   :  { %v3045_v4 = vadd.f32 %v3044_v24, %v2771_v46  ;;  %v3131_v7 = vadd.f32 %v5526_v61, %v3043_v2  ;;  %v3162_v20 = vmax.f32 %v3130_v1, 0.0 }
 0x645   :  { %v3046_v6 = vpop.f32.mrf.mxu0 }
 0x646   :  { %v3132_v9 = vadd.f32 %v5529_v34, %v3045_v4  ;;  %v3047_v10 = vadd.f32 %v3046_v6, %v2773_v44  ;;  %v3163_v28 = vmax.f32 %v3131_v7, 0.0  ;;  %v5546_v44 = vpop.f32.mrf.mxu1 }
 0x647   :  { %v3050_v12 = vpop.f32.mrf.mxu0 }
 0x648   :  { %v3133_v13 = vadd.f32 %v5526_v61, %v3047_v10  ;;  %v3164_v15 = vmax.f32 %v3132_v9, 0.0  ;;  %v3051_v26 = vadd.f32 %v3050_v12, %v2777_v17  ;;  %v5550_v4 = vpop.f32.mrf.mxu1 }
 0x649   :  { %v3052_v30 = vpop.f32.mrf.mxu0 }
 0x64a   :  { %v3165_v18 = vmax.f32 %v3133_v13, 0.0  ;;  %v3053_v57 = vadd.f32 %v3052_v30, %v2779_v50  ;;  %v3227_v25 = vpack.c.bf16 %v3164_v15, %v3162_v20  ;;  %v3134_v32 = vadd.f32 %v5529_v34, %v3051_v26  ;;  %v2821_v9 = vpop.f32.mrf.mxu1 }
 0x64b   :  { %v3054_v21 = vpop.f32.mrf.mxu0 }
 0x64c   :  { %v3055_v5 = vadd.f32 %v3054_v21, %v2781_v51  ;;  %v3228_v3 = vpack.c.bf16 %v3165_v18, %v3163_v28  ;;  %v3135_v31 = vadd.f32 %v5526_v61, %v3053_v57  ;;  %v3166_v58 = vmax.f32 %v3134_v32, 0.0  ;;  %v2823_v18 = vpop.f32.mrf.mxu1 }
 0x64d   :  { %v3056_v29 = vpop.f32.mrf.mxu0 }
 0x64e   :  { %v3136_v43 = vadd.f32 %v5529_v34, %v3055_v5  ;;  %v3057_v39 = vadd.f32 %v3056_v29, %v2783_v53  ;;  %3446 = vmatprep.mubr.bf16.mxu1 %v3228_v3  ;;  %v3167_v17 = vmax.f32 %v3135_v31, 0.0  ;;  %v2827_v21 = vpop.f32.mrf.mxu1 }
 0x64f   :  { %v3060_v38 = vpop.f32.mrf.mxu0  ;;  %3447 = vmatmul.mubr.bf16.vlgmr.msra.gmra.mxu1 %v3227_v25 }
 0x650   :  { %v3137_v8 = vadd.f32 %v5526_v61, %v3057_v39  ;;  %4203 = vmatpush3.bf16.msra.mxu1 %v5459_v35  ;;  %v3168_v33 = vmax.f32 %v3136_v43, 0.0  ;;  %v3061_v53 = vadd.f32 %v3060_v38, %v2787_v52  ;;  %v2829_v38 = vpop.f32.mrf.mxu1 }
 0x651   :  { %v3062_v46 = vpop.f32.mrf.mxu0  ;;  %4196 = vmatprep.subr.bf16.mxu1 %v5464_v36 }
 0x652   :  { %v3169_v50 = vmax.f32 %v3137_v8, 0.0  ;;  %v3063_v51 = vadd.f32 %v3062_v46, %v2789_v54  ;;  %v3229_v42 = vpack.c.bf16 %v3168_v33, %v3166_v58  ;;  %v3138_v52 = vadd.f32 %v5529_v34, %v3061_v53 }
 0x653   :  { %v3064_v37 = vpop.f32.mrf.mxu0 }
 0x654   :  { %v3065_v63 = vadd.f32 %v3064_v37, %v2791_v56  ;;  %v3230_v2 = vpack.c.bf16 %v3169_v50, %v3167_v17  ;;  %4204 = vmatpush3.bf16.msra.mxu1 %v5470_v40  ;;  %v3139_v35 = vadd.f32 %v5526_v61, %v3063_v51  ;;  %v3170_v12 = vmax.f32 %v3138_v52, 0.0 }
 0x655   :  { %v3066_v24 = vpop.f32.mrf.mxu0  ;;  %4197 = vmatprep.subr.bf16.mxu1 %v5476_v45 }
 0x656   :  { %v3140_v36 = vadd.f32 %v5529_v34, %v3065_v63  ;;  %v3067_v6 = vadd.f32 %v3066_v24, %v5510_v59  ;;  %3456 = vmatprep.mubr.bf16.mxu1 %v3230_v2  ;;  %v3171_v45 = vmax.f32 %v3139_v35, 0.0 }
 0x657   :  { %v3070_v54 = vpop.f32.mrf.mxu0  ;;  %3457 = vmatmul.mubr.bf16.gmra.mxu1 %v3229_v42 }
 0x658   :  { %v3141_v56 = vadd.f32 %v5526_v61, %v3067_v6  ;;  %4205 = vmatpush3.bf16.msra.mxu1 %v5482_v47  ;;  %v3172_v40 = vmax.f32 %v3140_v36, 0.0  ;;  %v3071_v59 = vadd.f32 %v3070_v54, %v5512_v27 }
 0x659   :  { %v3072_v7 = vpop.f32.mrf.mxu0  ;;  %4198 = vmatprep.subr.bf16.mxu1 %v5488_v48 }
 0x65a   :  { %v3173_v10 = vmax.f32 %v3141_v56, 0.0  ;;  %v3073_v1 = vadd.f32 %v3072_v7, %v5514_v60  ;;  %v3231_v28 = vpack.c.bf16 %v3172_v40, %v3170_v12  ;;  %v3142_v27 = vadd.f32 %v5529_v34, %v3071_v59 }
 0x65b   :  { %v3074_v13 = vpop.f32.mrf.mxu0 }
 0x65c   :  { %v3075_v15 = vadd.f32 %v3074_v13, %v5516_v62  ;;  %v3232_v30 = vpack.c.bf16 %v3173_v10, %v3171_v45  ;;  %4206 = vmatpush3.bf16.msra.mxu1 %v5494_v14  ;;  %v3143_v48 = vadd.f32 %v5526_v61, %v3073_v1  ;;  %v3174_v25 = vmax.f32 %v3142_v27, 0.0 }
 0x65d   :  { %v3076_v47 = vpop.f32.mrf.mxu0  ;;  %4199 = vmatprep.subr.bf16.mxu1 %v5500_v49 }
 0x65e   :  { %v3144_v57 = vadd.f32 %v5529_v34, %v3075_v15  ;;  %v3077_v60 = vadd.f32 %v3076_v47, %v5518_v11  ;;  %3466 = vmatprep.mubr.bf16.mxu1 %v3232_v30  ;;  %v3175_v5 = vmax.f32 %v3143_v48, 0.0 }
 0x65f   :  { %v3080_v20 = vpop.f32.mrf.mxu0  ;;  %3467 = vmatmul.mubr.bf16.gmra.mxu1 %v3231_v28 }
 0x660   :  { %v3145_v62 = vadd.f32 %v5526_v61, %v3077_v60  ;;  %4207 = vmatpush3.bf16.msra.mxu1 %v5506_v19  ;;  %v3176_v14 = vmax.f32 %v3144_v57, 0.0  ;;  %v3081_v29 = vadd.f32 %v3080_v20, %v5523_v55 }
 0x661   :  { %v3082_v26 = vpop.f32.mrf.mxu0 }
 0x662   :  { %v3177_v49 = vmax.f32 %v3145_v62, 0.0  ;;  %v3083_v3 = vadd.f32 %v3082_v26, %v5531_v41  ;;  %v3233_v39 = vpack.c.bf16 %v3176_v14, %v3174_v25  ;;  %v3146_v46 = vadd.f32 %v5529_v34, %v3081_v29 }
 0x663   :  { %v3084_v11 = vpop.f32.mrf.mxu0 }
 0x664   :  { %v3085_v31 = vadd.f32 %v3084_v11, %v5537_v0  ;;  %v3234_v43 = vpack.c.bf16 %v3177_v49, %v3175_v5  ;;  %v3147_v8 = vadd.f32 %v5526_v61, %v3083_v3  ;;  %v2831_v0 = vpop.f32.mrf.mxu1  ;;  %v3178_v37 = vmax.f32 %v3146_v46, 0.0 }
 0x665   :  { %v3086_v32 = vpop.f32.mrf.mxu0 }
 0x666   :  { %v3148_v19 = vadd.f32 %v5529_v34, %v3085_v31  ;;  %v3087_v33 = vadd.f32 %v3086_v32, %v5539_v16  ;;  %3476 = vmatprep.mubr.bf16.mxu1 %v3234_v43  ;;  %v3179_v51 = vmax.f32 %v3147_v8, 0.0  ;;  %v2833_v36 = vpop.f32.mrf.mxu1 }
 0x667   :  { %v3090_v41 = vpop.f32.mrf.mxu0  ;;  %3477 = vmatmul.mubr.bf16.gmra.mxu1 %v3233_v39 }
 0x668   :  { %v3149_v55 = vadd.f32 %v5526_v61, %v3087_v33  ;;  %v3180_v17 = vmax.f32 %v3148_v19, 0.0  ;;  %v3091_v63 = vadd.f32 %v3090_v41, %v5546_v44  ;;  %v2837_v44 = vpop.f32.mrf.mxu1 }
 0x669   :  { %v3092_v50 = vpop.f32.mrf.mxu0 }
 0x66a   :  { %v3181_v58 = vmax.f32 %v3149_v55, 0.0  ;;  %v3093_v53 = vadd.f32 %v3092_v50, %v5550_v4  ;;  %v3235_v24 = vpack.c.bf16 %v3180_v17, %v3178_v37  ;;  %v3150_v56 = vadd.f32 %v5529_v34, %v3091_v63  ;;  %v2839_v47 = vpop.f32.mrf.mxu1  ;;  %v4653_v37 = vld [vmem:[%s5756_s19 + $0x10] sm:$0xff]   ;;  %v4656_v63 = vld [vmem:[%s5756_s19 + $0x40] sm:$0xff]  }
 0x66b   :  { %v3094_v2 = vpop.f32.mrf.mxu0 }
 0x66c   :  { %v3095_v42 = vadd.f32 %v3094_v2, %v2821_v9  ;;  %v3236_v16 = vpack.c.bf16 %v3181_v58, %v3179_v51  ;;  %v3151_v6 = vadd.f32 %v5526_v61, %v3093_v53  ;;  %v3182_v12 = vmax.f32 %v3150_v56, 0.0  ;;  %v2841_v26 = vpop.f32.mrf.mxu1  ;;  %v4652_v53 = vld [vmem:[%s5756_s19 + $0x50] sm:$0xff]   ;;  %v4657_v2 = vld [vmem:[%s5756_s19] sm:$0xff]  }
 0x66d   :  { %v3096_v35 = vpop.f32.mrf.mxu0  ;;  %4141 = vmatprep.subr.bf16.mxu0 %v4652_v53  ;;  %4200 = vmatprep.subr.bf16.mxu1 %v4652_v53 }
 0x66e   :  { %v3152_v52 = vadd.f32 %v5529_v34, %v3095_v42  ;;  %v3097_v54 = vadd.f32 %v3096_v35, %v2823_v18  ;;  %3486 = vmatprep.mubr.bf16.mxu1 %v3236_v16  ;;  %v3183_v9 = vmax.f32 %v3151_v6, 0.0  ;;  %v2843_v32 = vpop.f32.mrf.mxu1  ;;  %4142 = vmatpush3.bf16.msra.mxu0 %v4653_v37  ;;  %v3226_v42 = vld [vmem:[%s5755_s18] sm:$0x3] }
 0x66f   :  { %v3100_v40 = vpop.f32.mrf.mxu0  ;;  %3487 = vmatmul.mubr.bf16.gmra.mxu1 %v3235_v24  ;;  %v5615_v24 = vrot.slane %v3226_v42, %v5124_v22  ;;  %v5618_v35 = vrot.slane %v3226_v42, %v5126_v23 }
 0x670   :  { %v3153_v4 = vadd.f32 %v5526_v61, %v3097_v54  ;;  %v3184_v7 = vmax.f32 %v3152_v52, 0.0  ;;  %v3101_v59 = vadd.f32 %v3100_v40, %v2827_v21  ;;  %4208 = vmatpush3.bf16.msra.mxu1 %v4653_v37 }
 0x671   :  { %v3102_v45 = vpop.f32.mrf.mxu0 }
 0x672   :  { %v3185_v10 = vmax.f32 %v3153_v4, 0.0  ;;  %v3103_v1 = vadd.f32 %v3102_v45, %v2829_v38  ;;  %v3237_v28 = vpack.c.bf16 %v3184_v7, %v3182_v12  ;;  %v3154_v27 = vadd.f32 %v5529_v34, %v3101_v59 }
 0x673   :  { %v3104_v13 = vpop.f32.mrf.mxu0 }
 0x674   :  { %v3105_v15 = vadd.f32 %v3104_v13, %v2831_v0  ;;  %v3238_v30 = vpack.c.bf16 %v3185_v10, %v3183_v9  ;;  %v3155_v48 = vadd.f32 %v5526_v61, %v3103_v1  ;;  %v3186_v25 = vmax.f32 %v3154_v27, 0.0 }
 0x675   :  { %v3106_v18 = vpop.f32.mrf.mxu0 }
 0x676   :  { %v3156_v57 = vadd.f32 %v5529_v34, %v3105_v15  ;;  %v3107_v60 = vadd.f32 %v3106_v18, %v2833_v36  ;;  %3496 = vmatprep.mubr.bf16.mxu1 %v3238_v30  ;;  %v3187_v5 = vmax.f32 %v3155_v48, 0.0 }
 0x677   :  { %v3110_v20 = vpop.f32.mrf.mxu0  ;;  %3497 = vmatmul.mubr.bf16.gmra.mxu1 %v3237_v28 }
 0x678   :  { %v3157_v62 = vadd.f32 %v5526_v61, %v3107_v60  ;;  %v3188_v14 = vmax.f32 %v3156_v57, 0.0  ;;  %v3111_v29 = vadd.f32 %v3110_v20, %v2837_v44 }
 0x679   :  { %v3112_v21 = vpop.f32.mrf.mxu0 }
 0x67a   :  { %v3189_v49 = vmax.f32 %v3157_v62, 0.0  ;;  %v3113_v3 = vadd.f32 %v3112_v21, %v2839_v47  ;;  %v3239_v39 = vpack.c.bf16 %v3188_v14, %v3186_v25  ;;  %v3158_v46 = vadd.f32 %v5529_v34, %v3111_v29 }
 0x67b   :  { %v3114_v11 = vpop.f32.mrf.mxu0 }
 0x67c   :  { %v3115_v31 = vadd.f32 %v3114_v11, %v2841_v26  ;;  %v3240_v43 = vpack.c.bf16 %v3189_v49, %v3187_v5  ;;  %v3159_v8 = vadd.f32 %v5526_v61, %v3113_v3  ;;  %v3190_v0 = vmax.f32 %v3158_v46, 0.0 }
 0x67d   :  { %v3116_v38 = vpop.f32.mrf.mxu0 }
 0x67e   :  { %v3160_v19 = vadd.f32 %v5529_v34, %v3115_v31  ;;  %v3117_v33 = vadd.f32 %v3116_v38, %v2843_v32  ;;  %3506 = vmatprep.mubr.bf16.mxu1 %v3240_v43  ;;  %v3191_v17 = vmax.f32 %v3159_v8, 0.0  ;;  %v4655_v34 = vld [vmem:[%s5756_s19 + $0x8] sm:$0xff]  }
 0x67f   :  { %3507 = vmatmul.mubr.bf16.gmra.mxu1 %v3239_v39 }
 0x680   :  { %v3161_v41 = vadd.f32 %v5526_v61, %v3117_v33  ;;  %v3192_v55 = vmax.f32 %v3160_v19, 0.0  ;;  %v4654_v61 = vld [vmem:[%s5756_s19 + $0x48] sm:$0xff]  }
 0x681   :  { %4143 = vmatprep.subr.bf16.mxu0 %v4654_v61  ;;  %4201 = vmatprep.subr.bf16.mxu1 %v4654_v61 }
 0x682   :  { %v3193_v50 = vmax.f32 %v3161_v41, 0.0  ;;  %v3241_v58 = vpack.c.bf16 %v3192_v55, %v3190_v0  ;;  %4144 = vmatpush3.bf16.msra.mxu0 %v4655_v34  ;;  %4209 = vmatpush3.bf16.msra.mxu1 %v4655_v34 }
 0x683   :  { %4145 = vmatprep.subr.bf16.mxu0 %v4656_v63  ;;  %4202 = vmatprep.subr.bf16.mxu1 %v4656_v63 }
 0x684   :  { %v3242_v51 = vpack.c.bf16 %v3193_v50, %v3191_v17 }
 0x686   :  { %3516 = vmatprep.mubr.bf16.mxu1 %v3242_v51  ;;  %4146 = vmatpush3.bf16.msra.mxu0 %v4657_v2 }
 0x687   :  { %3517 = vmatmul.mubr.bf16.gmra.mxu1 %v3241_v58 }
 0x688   :  { %4210 = vmatpush3.bf16.msra.mxu1 %v4657_v2 }
 0x70f   :  { %v3448_v16 = vpop.f32.mrf.mxu1 }
 0x710   :  { %v3449_v56 = vadd.f32 %v3448_v16, %v5618_v35 }
 0x711   :  { %v3450_v36 = vpop.f32.mrf.mxu1 }
 0x712   :  { %v3451_v52 = vadd.f32 %v3450_v36, %v5615_v24  ;;  %v3527_v22 = vmax.f32 %v3449_v56, 0.0 }
 0x713   :  { %v3452_v6 = vpop.f32.mrf.mxu1 }
 0x714   :  { %v3453_v54 = vadd.f32 %v3452_v6, %v5618_v35  ;;  %v3528_v45 = vmax.f32 %v3451_v52, 0.0 }
 0x715   :  { %v3454_v40 = vpop.f32.mrf.mxu1 }
 0x716   :  { %v3455_v4 = vadd.f32 %v3454_v40, %v5615_v24  ;;  %v3529_v7 = vmax.f32 %v3453_v54, 0.0 }
 0x717   :  { %v3458_v44 = vpop.f32.mrf.mxu1 }
 0x718   :  { %v3530_v9 = vmax.f32 %v3455_v4, 0.0  ;;  %v3592_v23 = vpack.c.bf16 %v3529_v7, %v3527_v22  ;;  %v3459_v15 = vadd.f32 %v3458_v44, %v5618_v35 }
 0x719   :  { %v3460_v10 = vpop.f32.mrf.mxu1 }
 0x71a   :  { %v3593_v1 = vpack.c.bf16 %v3530_v9, %v3528_v45  ;;  %v3461_v59 = vadd.f32 %v3460_v10, %v5615_v24  ;;  %v3531_v60 = vmax.f32 %v3459_v15, 0.0 }
 0x71b   :  { %v3462_v12 = vpop.f32.mrf.mxu1 }
 0x71c   :  { %v3463_v13 = vadd.f32 %v3462_v12, %v5618_v35  ;;  %3742 = vmatprep.mubr.bf16.mxu0 %v3593_v1  ;;  %v3532_v48 = vmax.f32 %v3461_v59, 0.0 }
 0x71d   :  { %v3464_v30 = vpop.f32.mrf.mxu1  ;;  %3743 = vmatmul.mubr.bf16.vlgmr.msra.gmra.mxu0 %v3592_v23 }
 0x71e   :  { %v3465_v28 = vadd.f32 %v3464_v30, %v5615_v24  ;;  %v3533_v47 = vmax.f32 %v3463_v13, 0.0 }
 0x71f   :  { %v3468_v18 = vpop.f32.mrf.mxu1 }
 0x720   :  { %v3534_v57 = vmax.f32 %v3465_v28, 0.0  ;;  %v3594_v62 = vpack.c.bf16 %v3533_v47, %v3531_v60  ;;  %v3469_v5 = vadd.f32 %v3468_v18, %v5618_v35 }
 0x721   :  { %v3470_v27 = vpop.f32.mrf.mxu1 }
 0x722   :  { %v3595_v20 = vpack.c.bf16 %v3534_v57, %v3532_v48  ;;  %v3471_v26 = vadd.f32 %v3470_v27, %v5615_v24  ;;  %v3535_v43 = vmax.f32 %v3469_v5, 0.0 }
 0x723   :  { %v3472_v14 = vpop.f32.mrf.mxu1 }
 0x724   :  { %v3473_v21 = vadd.f32 %v3472_v14, %v5618_v35  ;;  %3750 = vmatprep.mubr.bf16.mxu0 %v3595_v20  ;;  %v3536_v11 = vmax.f32 %v3471_v26, 0.0 }
 0x725   :  { %v3474_v49 = vpop.f32.mrf.mxu1  ;;  %3751 = vmatmul.mubr.bf16.gmra.mxu0 %v3594_v62 }
 0x726   :  { %v3475_v3 = vadd.f32 %v3474_v49, %v5615_v24  ;;  %v3537_v25 = vmax.f32 %v3473_v21, 0.0 }
 0x727   :  { %v3478_v29 = vpop.f32.mrf.mxu1 }
 0x728   :  { %v3538_v31 = vmax.f32 %v3475_v3, 0.0  ;;  %v3596_v38 = vpack.c.bf16 %v3537_v25, %v3535_v43  ;;  %v3479_v46 = vadd.f32 %v3478_v29, %v5618_v35 }
 0x729   :  { %v3480_v39 = vpop.f32.mrf.mxu1 }
 0x72a   :  { %v3597_v32 = vpack.c.bf16 %v3538_v31, %v3536_v11  ;;  %v3481_v19 = vadd.f32 %v3480_v39, %v5615_v24  ;;  %v3539_v58 = vmax.f32 %v3479_v46, 0.0 }
 0x72b   :  { %v3482_v8 = vpop.f32.mrf.mxu1 }
 0x72c   :  { %v3483_v33 = vadd.f32 %v3482_v8, %v5618_v35  ;;  %3758 = vmatprep.mubr.bf16.mxu0 %v3597_v32  ;;  %v3540_v0 = vmax.f32 %v3481_v19, 0.0 }
 0x72d   :  { %v3484_v41 = vpop.f32.mrf.mxu1  ;;  %3759 = vmatmul.mubr.bf16.gmra.mxu0 %v3596_v38 }
 0x72e   :  { %v3485_v55 = vadd.f32 %v3484_v41, %v5615_v24  ;;  %v3541_v17 = vmax.f32 %v3483_v33, 0.0 }
 0x72f   :  { %v3488_v50 = vpop.f32.mrf.mxu1 }
 0x730   :  { %v3542_v51 = vmax.f32 %v3485_v55, 0.0  ;;  %v3598_v61 = vpack.c.bf16 %v3541_v17, %v3539_v58  ;;  %v3489_v42 = vadd.f32 %v3488_v50, %v5618_v35  ;;  %v5655_v50 = vld [vmem:[%s5757_s20] ss:$0 sm:$0xff] }
 0x731   :  { %v3490_v53 = vpop.f32.mrf.mxu1 }
 0x732   :  { %v3599_v37 = vpack.c.bf16 %v3542_v51, %v3540_v0  ;;  %v3491_v63 = vadd.f32 %v3490_v53, %v5615_v24  ;;  %v3543_v40 = vmax.f32 %v3489_v42, 0.0 }
 0x733   :  { %v3492_v34 = vpop.f32.mrf.mxu1 }
 0x734   :  { %v3493_v2 = vadd.f32 %v3492_v34, %v5618_v35  ;;  %3766 = vmatprep.mubr.bf16.mxu0 %v3599_v37  ;;  %v3544_v54 = vmax.f32 %v3491_v63, 0.0 }
 0x735   :  { %v3494_v16 = vpop.f32.mrf.mxu1  ;;  %3767 = vmatmul.mubr.bf16.gmra.mxu0 %v3598_v61 }
 0x736   :  { %v3495_v36 = vadd.f32 %v3494_v16, %v5615_v24  ;;  %v3545_v6 = vmax.f32 %v3493_v2, 0.0 }
 0x737   :  { %v3498_v52 = vpop.f32.mrf.mxu1 }
 0x738   :  { %v3546_v56 = vmax.f32 %v3495_v36, 0.0  ;;  %v3600_v44 = vpack.c.bf16 %v3545_v6, %v3543_v40  ;;  %v3499_v10 = vadd.f32 %v3498_v52, %v5618_v35 }
 0x739   :  { %v3500_v4 = vpop.f32.mrf.mxu1 }
 0x73a   :  { %v3601_v7 = vpack.c.bf16 %v3546_v56, %v3544_v54  ;;  %v3501_v9 = vadd.f32 %v3500_v4, %v5615_v24  ;;  %v3547_v30 = vmax.f32 %v3499_v10, 0.0 }
 0x73b   :  { %v3502_v45 = vpop.f32.mrf.mxu1 }
 0x73c   :  { %v3503_v22 = vadd.f32 %v3502_v45, %v5618_v35  ;;  %3774 = vmatprep.mubr.bf16.mxu0 %v3601_v7  ;;  %v3548_v13 = vmax.f32 %v3501_v9, 0.0 }
 0x73d   :  { %v3504_v1 = vpop.f32.mrf.mxu1  ;;  %3775 = vmatmul.mubr.bf16.gmra.mxu0 %v3600_v44 }
 0x73e   :  { %v3505_v23 = vadd.f32 %v3504_v1, %v5615_v24  ;;  %v3549_v12 = vmax.f32 %v3503_v22, 0.0 }
 0x73f   :  { %v3508_v59 = vpop.f32.mrf.mxu1 }
 0x740   :  { %v3550_v15 = vmax.f32 %v3505_v23, 0.0  ;;  %v3602_v18 = vpack.c.bf16 %v3549_v12, %v3547_v30  ;;  %v3509_v27 = vadd.f32 %v3508_v59, %v5618_v35 }
 0x741   :  { %v3510_v28 = vpop.f32.mrf.mxu1 }
 0x742   :  { %v3603_v47 = vpack.c.bf16 %v3550_v15, %v3548_v13  ;;  %v3511_v57 = vadd.f32 %v3510_v28, %v5615_v24  ;;  %v3551_v49 = vmax.f32 %v3509_v27, 0.0 }
 0x743   :  { %v3512_v48 = vpop.f32.mrf.mxu1 }
 0x744   :  { %v3513_v60 = vadd.f32 %v3512_v48, %v5618_v35  ;;  %3782 = vmatprep.mubr.bf16.mxu0 %v3603_v47  ;;  %v3552_v21 = vmax.f32 %v3511_v57, 0.0 }
 0x745   :  { %v3514_v20 = vpop.f32.mrf.mxu1  ;;  %3783 = vmatmul.mubr.bf16.gmra.mxu0 %v3602_v18 }
 0x746   :  { %v3515_v62 = vadd.f32 %v3514_v20, %v5615_v24  ;;  %v3553_v14 = vmax.f32 %v3513_v60, 0.0 }
 0x747   :  { %v3518_v26 = vpop.f32.mrf.mxu1 }
 0x748   :  { %v3554_v5 = vmax.f32 %v3515_v62, 0.0  ;;  %v3604_v29 = vpack.c.bf16 %v3553_v14, %v3551_v49  ;;  %v3519_v39 = vadd.f32 %v3518_v26, %v5618_v35 }
 0x749   :  { %v3520_v3 = vpop.f32.mrf.mxu1 }
 0x74a   :  { %v3605_v25 = vpack.c.bf16 %v3554_v5, %v3552_v21  ;;  %v3521_v31 = vadd.f32 %v3520_v3, %v5615_v24  ;;  %v3555_v46 = vmax.f32 %v3519_v39, 0.0 }
 0x74b   :  { %v3522_v11 = vpop.f32.mrf.mxu1 }
 0x74c   :  { %v3523_v43 = vadd.f32 %v3522_v11, %v5618_v35  ;;  %3790 = vmatprep.mubr.bf16.mxu1 %v3605_v25  ;;  %v3556_v19 = vmax.f32 %v3521_v31, 0.0 }
 0x74d   :  { %v3524_v32 = vpop.f32.mrf.mxu1  ;;  %3791 = vmatmul.mubr.bf16.vlgmr.msra.gmra.mxu1 %v3604_v29 }
 0x74e   :  { %v3525_v38 = vadd.f32 %v3524_v32, %v5615_v24  ;;  %v3557_v8 = vmax.f32 %v3523_v43, 0.0 }
 0x750   :  { %v3558_v33 = vmax.f32 %v3525_v38, 0.0  ;;  %v3606_v55 = vpack.c.bf16 %v3557_v8, %v3555_v46 }
 0x752   :  { %v3607_v41 = vpack.c.bf16 %v3558_v33, %v3556_v19 }
 0x754   :  { %3798 = vmatprep.mubr.bf16.mxu1 %v3607_v41 }
 0x755   :  { %3799 = vmatmul.mubr.bf16.gmra.mxu1 %v3606_v55 }
 0x7dd   :  { %v4147_v17 = vpop.f32.mrf.mxu0 }
 0x7df   :  { %v4148_v0 = vpop.f32.mrf.mxu0 }
 0x7e0   :  { %v4149_v35 = vadd.f32 %v4148_v0, %v4147_v17 }
 0x7e1   :  { %v4150_v51 = vpop.f32.mrf.mxu0 }
 0x7e2   :  { %v3745_v24 = vadd.f32 %v4149_v35, %v5655_v50 }
 0x7e3   :  { %v4151_v58 = vpop.f32.mrf.mxu0 }
 0x7e4   :  { %3808 = vst.msk [vmem:[%s5758_s21] sm:$0xff] %vm3807_vm0, %v3745_v24  ;;  %v4152_v53 = vadd.f32 %v4151_v58, %v4150_v51 }
 0x7e5   :  { %v4153_v37 = vpop.f32.mrf.mxu0 }
 0x7e6   :  { %v3748_v61 = vadd.f32 %v4152_v53, %v5655_v50 }
 0x7e7   :  { %v4154_v34 = vpop.f32.mrf.mxu0 }
 0x7e8   :  { %3809 = vst.msk [vmem:[%s5758_s21 + $0x8] sm:$0xff] %vm3807_vm0, %v3748_v61  ;;  %v4155_v63 = vadd.f32 %v4154_v34, %v4153_v37 }
 0x7e9   :  { %v4156_v2 = vpop.f32.mrf.mxu0 }
 0x7ea   :  { %v3753_v42 = vadd.f32 %v4155_v63, %v5655_v50 }
 0x7eb   :  { %v4157_v16 = vpop.f32.mrf.mxu0 }
 0x7ec   :  { %3810 = vst.msk [vmem:[%s5758_s21 + $0x10] sm:$0xff] %vm3807_vm0, %v3753_v42  ;;  %v4158_v36 = vadd.f32 %v4157_v16, %v4156_v2 }
 0x7ed   :  { %v4159_v6 = vpop.f32.mrf.mxu0 }
 0x7ee   :  { %v3756_v52 = vadd.f32 %v4158_v36, %v5655_v50 }
 0x7ef   :  { %v4160_v54 = vpop.f32.mrf.mxu0 }
 0x7f0   :  { %3811 = vst.msk [vmem:[%s5758_s21 + $0x18] sm:$0xff] %vm3807_vm0, %v3756_v52  ;;  %v4161_v56 = vadd.f32 %v4160_v54, %v4159_v6 }
 0x7f1   :  { %v4162_v40 = vpop.f32.mrf.mxu0 }
 0x7f2   :  { %v3761_v4 = vadd.f32 %v4161_v56, %v5655_v50 }
 0x7f3   :  { %v4163_v7 = vpop.f32.mrf.mxu0 }
 0x7f4   :  { %3812 = vst.msk [vmem:[%s5758_s21 + $0x20] sm:$0xff] %vm3807_vm0, %v3761_v4  ;;  %v4164_v44 = vadd.f32 %v4163_v7, %v4162_v40 }
 0x7f5   :  { %v4165_v45 = vpop.f32.mrf.mxu0 }
 0x7f6   :  { %v3764_v9 = vadd.f32 %v4164_v44, %v5655_v50 }
 0x7f7   :  { %v4166_v22 = vpop.f32.mrf.mxu0 }
 0x7f8   :  { %3813 = vst.msk [vmem:[%s5758_s21 + $0x28] sm:$0xff] %vm3807_vm0, %v3764_v9  ;;  %v4167_v10 = vadd.f32 %v4166_v22, %v4165_v45 }
 0x7f9   :  { %v4168_v1 = vpop.f32.mrf.mxu0 }
 0x7fa   :  { %v3769_v23 = vadd.f32 %v4167_v10, %v5655_v50 }
 0x7fb   :  { %v4169_v12 = vpop.f32.mrf.mxu0 }
 0x7fc   :  { %3814 = vst.msk [vmem:[%s5758_s21 + $0x30] sm:$0xff] %vm3807_vm0, %v3769_v23  ;;  %v4170_v59 = vadd.f32 %v4169_v12, %v4168_v1 }
 0x7fd   :  { %v4171_v13 = vpop.f32.mrf.mxu0 }
 0x7fe   :  { %v3772_v15 = vadd.f32 %v4170_v59, %v5655_v50 }
 0x7ff   :  { %v4172_v30 = vpop.f32.mrf.mxu0 }
 0x800   :  { %3815 = vst.msk [vmem:[%s5758_s21 + $0x38] sm:$0xff] %vm3807_vm0, %v3772_v15  ;;  %v4173_v28 = vadd.f32 %v4172_v30, %v4171_v13 }
 0x801   :  { %v4174_v47 = vpop.f32.mrf.mxu0 }
 0x802   :  { %v3777_v18 = vadd.f32 %v4173_v28, %v5655_v50 }
 0x803   :  { %v4175_v48 = vpop.f32.mrf.mxu0 }
 0x804   :  { %3816 = vst.msk [vmem:[%s5758_s21 + $0x40] sm:$0xff] %vm3807_vm0, %v3777_v18  ;;  %v4176_v57 = vadd.f32 %v4175_v48, %v4174_v47 }
 0x805   :  { %v4177_v60 = vpop.f32.mrf.mxu0 }
 0x806   :  { %v3780_v27 = vadd.f32 %v4176_v57, %v5655_v50 }
 0x807   :  { %v4178_v20 = vpop.f32.mrf.mxu0 }
 0x808   :  { %3817 = vst.msk [vmem:[%s5758_s21 + $0x48] sm:$0xff] %vm3807_vm0, %v3780_v27  ;;  %v4179_v62 = vadd.f32 %v4178_v20, %v4177_v60 }
 0x809   :  { %v4180_v14 = vpop.f32.mrf.mxu0 }
 0x80a   :  { %v3785_v26 = vadd.f32 %v4179_v62, %v5655_v50 }
 0x80b   :  { %v4181_v21 = vpop.f32.mrf.mxu0 }
 0x80c   :  { %3818 = vst.msk [vmem:[%s5758_s21 + $0x50] sm:$0xff] %vm3807_vm0, %v3785_v26  ;;  %v4182_v5 = vadd.f32 %v4181_v21, %v4180_v14 }
 0x80d   :  { %v4183_v49 = vpop.f32.mrf.mxu1 }
 0x80e   :  { %v3788_v3 = vadd.f32 %v4182_v5, %v5655_v50 }
 0x80f   :  { %v4184_v25 = vpop.f32.mrf.mxu1 }
 0x810   :  { %3819 = vst.msk [vmem:[%s5758_s21 + $0x58] sm:$0xff] %vm3807_vm0, %v3788_v3  ;;  %v4185_v29 = vadd.f32 %v4184_v25, %v4183_v49 }
 0x811   :  { %v4186_v11 = vpop.f32.mrf.mxu1 }
 0x812   :  { %v3793_v31 = vadd.f32 %v4185_v29, %v5655_v50 }
 0x813   :  { %v4187_v43 = vpop.f32.mrf.mxu1 }
 0x814   :  { %3820 = vst.msk [vmem:[%s5758_s21 + $0x60] sm:$0xff] %vm3807_vm0, %v3793_v31  ;;  %v4188_v39 = vadd.f32 %v4187_v43, %v4186_v11 }
 0x815   :  { %v4189_v32 = vpop.f32.mrf.mxu1 }
 0x816   :  { %v3796_v38 = vadd.f32 %v4188_v39, %v5655_v50 }
 0x817   :  { %v4190_v8 = vpop.f32.mrf.mxu1 }
 0x818   :  { %3821 = vst.msk [vmem:[%s5758_s21 + $0x68] sm:$0xff] %vm3807_vm0, %v3796_v38  ;;  %v4191_v19 = vadd.f32 %v4190_v8, %v4189_v32 }
 0x819   :  { %v4192_v33 = vpop.f32.mrf.mxu1 }
 0x81a   :  { %v3801_v46 = vadd.f32 %v4191_v19, %v5655_v50 }
 0x81b   :  { %v4193_v41 = vpop.f32.mrf.mxu1 }
 0x81c   :  { %3822 = vst.msk [vmem:[%s5758_s21 + $0x70] sm:$0xff] %vm3807_vm0, %v3801_v46  ;;  %v4194_v55 = vadd.f32 %v4193_v41, %v4192_v33 }
 0x81e   :  { %v3804_v17 = vadd.f32 %v4194_v55, %v5655_v50 }
 0x820   :  { %3823 = vst.msk [vmem:[%s5758_s21 + $0x78] sm:$0xff] %vm3807_vm0, %v3804_v17 }
 0x821   :  { %3828 = vsyncpa [#allocation3], 1 }
 0x822   :  { %3829 = vsyncpa [#allocation5], 1 }
 0x823   :  { %3830 = vsyncpa [#allocation8], 1 }
 0x824   :  { %3831 = vsyncpa [#allocation11], 1 }
 0x825   :  { %3832 = vsyncpa [#allocation14], 1 }
 0x826   :  { %3833 = vsyncpa [#allocation17], 1 }

</bundles_post_ra>
